<compile_context>
chip_gen: v7x
topology: tpu7x:2x2x1
jax: 0.10.0
libtpu: 0.0.40
codegen_flags: <defaults>
</compile_context>

<pallas_src>
import jax
import jax.numpy as jnp
from jax import lax
from jax.experimental import pallas as pl
from jax.experimental.pallas import tpu as pltpu

BN_EPS = 1e-5

_VMEM_LIMIT_CACHE = None


def _vmem_limit():
    """Generation-aware scoped-VMEM cap (3/4 of physical, clamped)."""
    global _VMEM_LIMIT_CACHE
    if _VMEM_LIMIT_CACHE is None:
        try:
            cap = int(pltpu.get_tpu_info().vmem_capacity_bytes)
        except Exception:
            cap = 64 * 1024 * 1024          # safe fallback (v7x-sized)
        _VMEM_LIMIT_CACHE = max(32 * 1024 * 1024,
                                min(100 * 1024 * 1024, (cap * 3) // 4))
    return _VMEM_LIMIT_CACHE


# ---------------------------------------------------------------------------
# Kernel 1: initial ConvTranspose2d on a 1x1 spatial input == a single matmul.
# ---------------------------------------------------------------------------
def _initial_kernel(x_ref, w_ref, b_ref, o_ref, s_ref):
    y = jnp.dot(x_ref[...], w_ref[...],
                preferred_element_type=jnp.float32) + b_ref[...]
    o_ref[...] = y.astype(o_ref.dtype)
    s_ref[0:1, :] = jnp.sum(y, axis=0, keepdims=True)
    s_ref[1:2, :] = jnp.sum(y * y, axis=0, keepdims=True)


def initial_convt_call(z2, w_t, b):
    """z2: (N, Cin).  Returns raw (N, K*K*Cout) bf16 (kh, kw, co with co
    fastest -> a free reshape to NHWC) and sums (2, K*K*Cout) f32."""
    N, Cin = z2.shape
    _, Cout, K, _ = w_t.shape
    w2 = jnp.transpose(w_t, (0, 2, 3, 1)).reshape(Cin, K * K * Cout)
    b2 = jnp.tile(b.astype(jnp.float32), K * K).reshape(1, K * K * Cout)
    vmem = pl.BlockSpec(memory_space=pltpu.MemorySpace.VMEM)
    return pl.pallas_call(
        _initial_kernel,
        out_shape=(jax.ShapeDtypeStruct((N, K * K * Cout), jnp.bfloat16),
                   jax.ShapeDtypeStruct((2, K * K * Cout), jnp.float32)),
        in_specs=[vmem, vmem, vmem],
        out_specs=(vmem, vmem),
        compiler_params=pltpu.CompilerParams(vmem_limit_bytes=_vmem_limit()),
    )(z2.astype(jnp.bfloat16), w2.astype(jnp.bfloat16), b2)


# ---------------------------------------------------------------------------
# Kernel 2: fused [prev-layer BN affine + ReLU] + phase-decomposed
#           ConvTranspose2d (+ bias, + optional tanh, + BN stats).
# ---------------------------------------------------------------------------
def _make_fused_convt_kernel(offsets, bN, H, W, Hs, Ws, Cin,
                             pad_h, pad_w, c_block, mode):
    """offsets[p] = list of (row_start, col_start) into the padded activation
    scratch for tap t of phase p, matching the weight row/col ordering."""
    P = len(offsets)
    T = len(offsets[0])
    M = bN * Hs * Ws
    has_pad = (pad_h > 0) or (pad_w > 0)

    def kernel(x_ref, sc_ref, sh_ref, w_ref, b_ref, *rest):
        if mode == "bn_raw":
            o_ref, s_ref, xpad_ref = rest
        else:
            o_ref, xpad_ref = rest

        # Fused previous-layer BatchNorm affine + ReLU, zero-padded into a
        # VMEM scratch (replaces the standalone affine pass + HBM jnp.pad).
        if has_pad:
            xpad_ref[...] = jnp.zeros_like(xpad_ref)
        act = jnp.maximum(
            x_ref[...].astype(jnp.float32) * sc_ref[...] + sh_ref[...], 0.0)
        xpad_ref[:, pad_h:pad_h + H, pad_w:pad_w + W, :] = (
            act.astype(xpad_ref.dtype))

        bias = b_ref[...]                                    # hoisted
        if mode == "bn_raw":
            tot = jnp.zeros((1, c_block), jnp.float32)
            tot2 = jnp.zeros((1, c_block), jnp.float32)

        for p in range(P):
            # Concatenate the T taps along the contraction dim -> one MXU dot
            # per phase with K = T*Cin.
            parts = [xpad_ref[:, ro:ro + Hs, co:co + Ws, :]
                     for (ro, co) in offsets[p]]
            patch = parts[0] if T == 1 else jnp.concatenate(parts, axis=-1)
            patch = patch.reshape(M, T * Cin)                # bf16

            if mode == "bn_raw":
                y = jnp.dot(patch, w_ref[p],
                            preferred_element_type=jnp.float32) + bias
                tot = tot + jnp.sum(y, axis=0, keepdims=True)
                tot2 = tot2 + jnp.sum(y * y, axis=0, keepdims=True)
                o_ref[:, p, :, :] = (
                    y.reshape(bN, Hs * Ws, c_block).astype(o_ref.dtype))
            else:
                # Final layer: produce (Cout, Hs*Ws) directly from the MXU so
                # the Cout=3 output is stored lane-dense (spatial on lanes).
                yt = lax.dot_general(w_ref[p], patch,
                                     (((1,), (1,)), ((), ())),
                                     preferred_element_type=jnp.float32) + bias
                o_ref[0, p, :, :] = jnp.tanh(yt)

        if mode == "bn_raw":
            s_ref[0, 0:1, :] = tot
            s_ref[0, 1:2, :] = tot2

    return kernel


def _phase_taps_1d(K, stride, padding, in_size, phase_size):
    """Per output phase: list of (kernel index k, input offset d); plus the
    zero-padding needed so every tap slice stays in range."""
    taps, ds = [], []
    for ph in range(stride):
        row = []
        for k in range(K):
            num = ph + padding - k
            if num % stride == 0:
                d = num // stride
                row.append((k, d))
                ds.append(d)
        taps.append(row)
    pad = max([0] + [-d for d in ds] + [phase_size + d - in_size for d in ds])
    return taps, pad


def fused_convt_call(x, scale, shift, w_t, b, *, stride, padding, mode):
    """Fused [BN-affine(prev) + ReLU] -> phase-decomposed ConvTranspose2d.

    x     : (N, H, W, Cin) RAW previous-layer conv output (bf16, pre-BN)
    scale : (Cin,) previous-layer BN scale;  shift : (Cin,) BN shift
    w_t   : (Cin, Cout, K, K) PyTorch ConvTranspose2d weight
    Returns (phase p = ph*stride + pw, Hs = OH//stride, Ws = OW//stride):
      mode == "bn_raw": raw (N, P, Hs*Ws, Cout) bf16, sums (nb, 2, Cout) f32
      mode == "tanh"  : (N, P, Cout, Hs*Ws) f32 with tanh applied (lane-dense)
    """
    N, H, W, Cin = x.shape
    _, Cout, K, _ = w_t.shape
    OH = (H - 1) * stride - 2 * padding + K
    OW = (W - 1) * stride - 2 * padding + K
    assert OH % stride == 0 and OW % stride == 0
    Hs, Ws = OH // stride, OW // stride

    taps_h, pad_h = _phase_taps_1d(K, stride, padding, H, Hs)
    taps_w, pad_w = _phase_taps_1d(K, stride, padding, W, Ws)
    Hp, Wp = H + 2 * pad_h, W + 2 * pad_w

    offsets, mats_by_phase = [], []
    for ph in range(stride):
        for pw in range(stride):
            offs, mats = [], []
            for kh, dh in taps_h[ph]:
                for kw, dw in taps_w[pw]:
                    offs.append((dh + pad_h, dw + pad_w))
                    mats.append(w_t[:, :, kh, kw])           # (Cin, Cout)
            offsets.append(offs)
            mats_by_phase.append(mats)
    P = stride * stride
    T = len(offsets[0])
    assert all(len(o) == T for o in offsets)

    c_block = Cout if Cout <= 256 else 256                   # 256-wide tiles
    assert Cout % c_block == 0
    n_cblk = Cout // c_block

    # Block the batch on small-spatial layers so the MXU M dim is filled.
    if mode == "bn_raw":
        bN = 1
        for d in range(1, N + 1):
            if N % d == 0 and d * Hs * Ws <= 512:
                bN = d
    else:
        bN = 1
    nb = N // bN

    if mode == "bn_raw":
        # (P, T*Cin, Cout): contraction rows ordered (tap-major, cin-minor),
        # matching the in-kernel tap concatenation.
        w_phases = jnp.stack(
            [jnp.concatenate(m, axis=0) for m in mats_by_phase],
            axis=0).astype(jnp.bfloat16)
        b_arr = b.reshape(1, Cout).astype(jnp.float32)
        w_spec = pl.BlockSpec((P, T * Cin, c_block), lambda c, n: (0, 0, c))
        b_spec = pl.BlockSpec((1, c_block), lambda c, n: (0, c))
        out_shape = (jax.ShapeDtypeStruct((N, P, Hs * Ws, Cout), jnp.bfloat16),
                     jax.ShapeDtypeStruct((nb, 2, Cout), jnp.float32))
        out_specs = (pl.BlockSpec((bN, P, Hs * Ws, c_block),
                                  lambda c, n: (n, 0, 0, c)),
                     pl.BlockSpec((1, 2, c_block), lambda c, n: (n, 0, c)))
    else:
        # (P, Cout, T*Cin): output produced transposed (lane-dense spatial).
        w_phases = jnp.stack(
            [jnp.concatenate([mm.T for mm in m], axis=1)
             for m in mats_by_phase],
            axis=0).astype(jnp.bfloat16)
        b_arr = b.reshape(Cout, 1).astype(jnp.float32)
        w_spec = pl.BlockSpec((P, c_block, T * Cin), lambda c, n: (0, c, 0))
        b_spec = pl.BlockSpec((c_block, 1), lambda c, n: (c, 0))
        out_shape = jax.ShapeDtypeStruct((N, P, Cout, Hs * Ws), jnp.float32)
        out_specs = pl.BlockSpec((bN, P, c_block, Hs * Ws),
                                 lambda c, n: (n, 0, c, 0))

    kernel = _make_fused_convt_kernel(offsets, bN, H, W, Hs, Ws, Cin,
                                      pad_h, pad_w, c_block, mode)
    # Grid order (Cout blocks, batch blocks): the weight tile stays resident
    # across the batch (it is the large operand on early layers); both axes
    # are independent -> "parallel" for megacore sharding.
    return pl.pallas_call(
        kernel,
        out_shape=out_shape,
        grid=(n_cblk, nb),
        in_specs=[
            pl.BlockSpec((bN, H, W, Cin), lambda c, n: (n, 0, 0, 0)),
            pl.BlockSpec((1, 1, 1, Cin), lambda c, n: (0, 0, 0, 0)),
            pl.BlockSpec((1, 1, 1, Cin), lambda c, n: (0, 0, 0, 0)),
            w_spec,
            b_spec,
        ],
        out_specs=out_specs,
        scratch_shapes=[pltpu.VMEM((bN, Hp, Wp, Cin), jnp.bfloat16)],
        compiler_params=pltpu.CompilerParams(
            dimension_semantics=("parallel", "parallel"),
            vmem_limit_bytes=_vmem_limit()),
    )(x.astype(jnp.bfloat16),
      scale.reshape(1, 1, 1, Cin).astype(jnp.float32),
      shift.reshape(1, 1, 1, Cin).astype(jnp.float32),
      w_phases, b_arr)


def _bn_fold(total_sum, total_sq, count, gamma, beta):
    """Train-mode BatchNorm batch stats -> per-channel (scale, shift)."""
    mean = total_sum / count
    var = jnp.maximum(total_sq / count - mean * mean, 0.0)   # biased, like PyTorch
    scale = gamma * lax.rsqrt(var + BN_EPS)
    shift = beta - mean * scale
    return scale, shift


# ---------------------------------------------------------------------------
# Parameters + forward passes.
# ---------------------------------------------------------------------------
def build_generator_params(key, input_size, z_dim, channel, ngf,
                           n_extra_layers=0):
    """Deterministic synthetic parameters, mirroring Generator.__init__."""
    assert input_size % 16 == 0, "input_size has to be a multiple of 16."
    cngf, tisize = ngf, 4
    while tisize != input_size // 2:
        cngf *= 2
        tisize *= 2

    def convt_params(k, cin, cout, ksz):
        k1, k2 = jax.random.split(k)
        w = 0.05 * jax.random.normal(k1, (cin, cout, ksz, ksz), jnp.float32)
        b = 0.05 * jax.random.normal(k2, (cout,), jnp.float32)
        return w, b

    keys = iter(jax.random.split(key, 32))
    layers = []
    w, b = convt_params(next(keys), z_dim, cngf, 4)
    layers.append(dict(w=w, b=b, gamma=jnp.ones((cngf,), jnp.float32),
                       beta=jnp.zeros((cngf,), jnp.float32),
                       stride=1, padding=0, mode="bn_relu"))
    csize = 4
    while csize < input_size // 2:
        w, b = convt_params(next(keys), cngf, cngf // 2, 4)
        layers.append(dict(w=w, b=b, gamma=jnp.ones((cngf // 2,), jnp.float32),
                           beta=jnp.zeros((cngf // 2,), jnp.float32),
                           stride=2, padding=1, mode="bn_relu"))
        csize *= 2
        cngf //= 2
    for _ in range(n_extra_layers):
        w, b = convt_params(next(keys), cngf, cngf, 3)
        layers.append(dict(w=w, b=b, gamma=jnp.ones((cngf,), jnp.float32),
                           beta=jnp.zeros((cngf,), jnp.float32),
                           stride=1, padding=1, mode="bn_relu"))
    w, b = convt_params(next(keys), cngf, channel, 4)
    layers.append(dict(w=w, b=b, gamma=jnp.ones((channel,), jnp.float32),
                       beta=jnp.zeros((channel,), jnp.float32),
                       stride=2, padding=1, mode="tanh"))
    return layers


def generator_forward(x_nchw, layers):
    """Pallas forward pass.  Input/output are NCHW like PyTorch."""
    N = x_nchw.shape[0]

    # --- initial layer: ConvTranspose2d on a 1x1 input -> single matmul.
    # Its BN+ReLU is fused into the first pyramid conv kernel.
    L0 = layers[0]
    Cin0, C0, K0, _ = L0["w"].shape
    assert x_nchw.shape[1] == Cin0 and x_nchw.shape[2] == 1 and x_nchw.shape[3] == 1
    z2 = x_nchw.reshape(N, Cin0)
    raw0, sums0 = initial_convt_call(z2, L0["w"], L0["b"])
    tot = sums0[0].reshape(K0 * K0, C0).sum(axis=0)
    tot2 = sums0[1].reshape(K0 * K0, C0).sum(axis=0)
    scale, shift = _bn_fold(tot, tot2, N * K0 * K0, L0["gamma"], L0["beta"])
    h = raw0.reshape(N, K0, K0, C0)                      # (N, 4, 4, cngf) raw bf16

    out = None
    for L in layers[1:]:
        stride, padding = L["stride"], L["padding"]
        _, Cout, K, _ = L["w"].shape
        H, W = h.shape[1], h.shape[2]
        OH = (H - 1) * stride - 2 * padding + K
        OW = (W - 1) * stride - 2 * padding + K
        Hs, Ws = OH // stride, OW // stride

        if L["mode"] == "bn_relu":
            raw, sums = fused_convt_call(h, scale, shift, L["w"], L["b"],
                                         stride=stride, padding=padding,
                                         mode="bn_raw")
            tot = sums[:, 0, :].sum(axis=0)
            tot2 = sums[:, 1, :].sum(axis=0)
            scale, shift = _bn_fold(tot, tot2, N * OH * OW,
                                    L["gamma"], L["beta"])
            # de-phase raw (N, P, Hs*Ws, C) -> (N, OH, OW, C) for the next conv
            # TODO(synk): fold this interleave into the consumer's VMEM scratch
            # fill (strided phase writes) to drop the remaining per-layer HBM pass.
            h = raw.reshape(N, stride, stride, Hs, Ws, Cout)
            h = h.transpose(0, 3, 1, 4, 2, 5).reshape(N, OH, OW, Cout)
        else:                                            # final ConvT + tanh
            y = fused_convt_call(h, scale, shift, L["w"], L["b"],
                                 stride=stride, padding=padding, mode="tanh")
            # (N, P, Cout, Hs*Ws) lane-dense -> NCHW directly (tiny transpose)
            y = y.reshape(N, stride, stride, Cout, Hs, Ws)
            out = y.transpose(0, 3, 4, 1, 5, 2).reshape(N, Cout, OH, OW)

    return out.astype(jnp.float32)


def generator_forward_ref(x_nchw, layers):
    """Pure-JAX f32 reference (lax conv) for the correctness check."""
    y = x_nchw
    for L in layers:
        w = L["w"]
        K, p, s = w.shape[2], L["padding"], L["stride"]
        w_conv = jnp.transpose(w, (1, 0, 2, 3))[:, :, ::-1, ::-1]
        y = lax.conv_general_dilated(
            y, w_conv, window_strides=(1, 1),
            padding=[(K - 1 - p, K - 1 - p)] * 2,
            lhs_dilation=(s, s),
            dimension_numbers=("NCHW", "OIHW", "NCHW"))
        y = y + L["b"].reshape(1, -1, 1, 1)
        if L["mode"] == "bn_relu":
            mean = jnp.mean(y, axis=(0, 2, 3), keepdims=True)
            var = jnp.mean((y - mean) ** 2, axis=(0, 2, 3), keepdims=True)
            y = (y - mean) * lax.rsqrt(var + BN_EPS)
            y = (y * L["gamma"].reshape(1, -1, 1, 1)
                 + L["beta"].reshape(1, -1, 1, 1))
            y = jnp.maximum(y, 0.0)
        else:
            y = jnp.tanh(y)
    return y


if __name__ == "__main__":
    # Small DCGAN config: input_size=16 -> 1x1 latent -> 4x4 -> 8x8 -> 16x16
    input_size, z_dim, channel, ngf = 16, 8, 3, 4
    batch = 2

    key = jax.random.PRNGKey(0)
    kz, kp = jax.random.split(key)
    z = jax.random.normal(kz, (batch, z_dim, 1, 1), jnp.float32)   # NCHW latent

    layers = build_generator_params(kp, input_size, z_dim, channel, ngf,
                                    n_extra_layers=0)

    fwd = jax.jit(lambda latent: generator_forward(latent, layers))
    out = jax.block_until_ready(fwd(z))
    assert out.shape == (batch, channel, input_size, input_size), out.shape

    ref = jax.block_until_ready(generator_forward_ref(z, layers))
    # bf16 MXU operands / f32 accumulation & BN stats -> relaxed tolerance.
    max_err = float(jnp.max(jnp.abs(out - ref)))
    assert jnp.allclose(out, ref, atol=3e-2, rtol=3e-2), max_err

    print("KERNEL_OK")
</pallas_src>

<mosaic_0001>
module attributes {stable_mosaic.version = 11 : i64} {
  func.func @_initial_kernel(%arg0: memref<2x8xbf16, #tpu.memory_space<vmem>>, %arg1: memref<8x128xbf16, #tpu.memory_space<vmem>>, %arg2: memref<1x128xf32, #tpu.memory_space<vmem>>, %arg3: memref<2x128xbf16, #tpu.memory_space<vmem>>, %arg4: memref<2x128xf32, #tpu.memory_space<vmem>>) attributes {dimension_semantics = [], scalar_prefetch = 0 : i64, scratch_operands = 0 : i64, tpu.core_type = #tpu.core_type<tc>} {
    %c0 = arith.constant 0 : index
    %c0_0 = arith.constant 0 : index
    %0 = vector.load %arg0[%c0, %c0_0] : memref<2x8xbf16, #tpu.memory_space<vmem>>, vector<2x8xbf16>
    %c0_1 = arith.constant 0 : index
    %c0_2 = arith.constant 0 : index
    %1 = vector.load %arg1[%c0_1, %c0_2] : memref<8x128xbf16, #tpu.memory_space<vmem>>, vector<8x128xbf16>
    %cst = arith.constant dense<0.000000e+00> : vector<2x128xf32>
    %2 = tpu.matmul %0, %1, %cst {dimension_numbers = #tpu.dot_dimension_numbers<[1], [0], [0], [1], [0, 0, 1, 1], [], []>} : vector<2x8xbf16>, vector<8x128xbf16>, vector<2x128xf32> -> vector<2x128xf32>
    %c0_3 = arith.constant 0 : index
    %c0_4 = arith.constant 0 : index
    %3 = vector.load %arg2[%c0_3, %c0_4] : memref<1x128xf32, #tpu.memory_space<vmem>>, vector<1x128xf32>
    %4 = vector.broadcast %3 : vector<1x128xf32> to vector<2x128xf32>
    %5 = arith.addf %2, %4 : vector<2x128xf32>
    %6 = arith.truncf %5 : vector<2x128xf32> to vector<2x128xbf16>
    %c0_5 = arith.constant 0 : index
    %c0_6 = arith.constant 0 : index
    %7 = vector.load %arg3[%c0_5, %c0_6] : memref<2x128xbf16, #tpu.memory_space<vmem>>, vector<2x128xbf16>
    tpu.vector_store %arg3[%c0_5, %c0_6], %6 {strides = array<i32>} : memref<2x128xbf16, #tpu.memory_space<vmem>>, vector<2x128xbf16>,
    %cst_7 = arith.constant dense<0.000000e+00> : vector<128xf32>
    %8 = vector.multi_reduction <add>, %5, %cst_7 [0] : vector<2x128xf32> to vector<128xf32>
    %9 = vector.shape_cast %8 : vector<128xf32> to vector<1x128xf32>
    %c0_8 = arith.constant 0 : index
    %c0_9 = arith.constant 0 : index
    %10 = vector.load %arg4[%c0_8, %c0_9] : memref<2x128xf32, #tpu.memory_space<vmem>>, vector<1x128xf32>
    tpu.vector_store %arg4[%c0_8, %c0_9], %9 {strides = array<i32>} : memref<2x128xf32, #tpu.memory_space<vmem>>, vector<1x128xf32>,
    %11 = arith.mulf %5, %5 : vector<2x128xf32>
    %cst_10 = arith.constant dense<0.000000e+00> : vector<128xf32>
    %12 = vector.multi_reduction <add>, %11, %cst_10 [0] : vector<2x128xf32> to vector<128xf32>
    %13 = vector.shape_cast %12 : vector<128xf32> to vector<1x128xf32>
    %c1 = arith.constant 1 : index
    %c0_11 = arith.constant 0 : index
    %14 = vector.load %arg4[%c1, %c0_11] : memref<2x128xf32, #tpu.memory_space<vmem>>, vector<1x128xf32>
    tpu.vector_store %arg4[%c1, %c0_11], %13 {strides = array<i32>} : memref<2x128xf32, #tpu.memory_space<vmem>>, vector<1x128xf32>,
    return
  }
}

module attributes {stable_mosaic.version = 11 : i64} {
  func.func @kernel(%arg0: i32, %arg1: i32, %arg2: memref<2x4x4x8xbf16, #tpu.memory_space<vmem>>, %arg3: memref<1x1x1x8xf32, #tpu.memory_space<vmem>>, %arg4: memref<1x1x1x8xf32, #tpu.memory_space<vmem>>, %arg5: memref<4x32x4xbf16, #tpu.memory_space<vmem>>, %arg6: memref<1x4xf32, #tpu.memory_space<vmem>>, %arg7: memref<2x4x16x4xbf16, #tpu.memory_space<vmem>>, %arg8: memref<1x2x4xf32, #tpu.memory_space<vmem>>, %arg9: memref<2x6x6x8xbf16, #tpu.memory_space<vmem>>) attributes {dimension_semantics = [#tpu.dimension_semantics<parallel>, #tpu.dimension_semantics<parallel>], iteration_bounds = array<i64: 1, 1>, scalar_prefetch = 0 : i64, scratch_operands = 1 : i64, tpu.core_type = #tpu.core_type<tc>, window_params = [{transform_indices = @transform_0, window_bounds = array<i64: 2, 4, 4, 8>}, {pipeline_mode = #tpu.pipeline_mode<synchronous>, transform_indices = @transform_1, window_bounds = array<i64: 1, 1, 1, 8>}, {pipeline_mode = #tpu.pipeline_mode<synchronous>, transform_indices = @transform_2, window_bounds = array<i64: 1, 1, 1, 8>}, {transform_indices = @transform_3, window_bounds = array<i64: 4, 32, 4>}, {transform_indices = @transform_4, window_bounds = array<i64: 1, 4>}, {transform_indices = @transform_5, window_bounds = array<i64: 2, 4, 16, 4>}, {transform_indices = @transform_6, window_bounds = array<i64: 1, 2, 4>}]} {
    %cst = arith.constant 0.000000e+00 : bf16
    %0 = vector.broadcast %cst : bf16 to vector<2x6x6x8xbf16>
    %c0 = arith.constant 0 : index
    %c0_0 = arith.constant 0 : index
    %c0_1 = arith.constant 0 : index
    %c0_2 = arith.constant 0 : index
    %1 = vector.load %arg9[%c0, %c0_0, %c0_1, %c0_2] : memref<2x6x6x8xbf16, #tpu.memory_space<vmem>>, vector<2x6x6x8xbf16>
    tpu.vector_store %arg9[%c0, %c0_0, %c0_1, %c0_2], %0 {strides = array<i32>} : memref<2x6x6x8xbf16, #tpu.memory_space<vmem>>, vector<2x6x6x8xbf16>,
    %c0_3 = arith.constant 0 : index
    %c0_4 = arith.constant 0 : index
    %c0_5 = arith.constant 0 : index
    %c0_6 = arith.constant 0 : index
    %2 = vector.load %arg2[%c0_3, %c0_4, %c0_5, %c0_6] : memref<2x4x4x8xbf16, #tpu.memory_space<vmem>>, vector<2x4x4x8xbf16>
    %3 = arith.extf %2 : vector<2x4x4x8xbf16> to vector<2x4x4x8xf32>
    %c0_7 = arith.constant 0 : index
    %c0_8 = arith.constant 0 : index
    %c0_9 = arith.constant 0 : index
    %c0_10 = arith.constant 0 : index
    %4 = vector.load %arg3[%c0_7, %c0_8, %c0_9, %c0_10] : memref<1x1x1x8xf32, #tpu.memory_space<vmem>>, vector<1x1x1x8xf32>
    %5 = vector.broadcast %4 : vector<1x1x1x8xf32> to vector<2x4x4x8xf32>
    %6 = arith.mulf %3, %5 : vector<2x4x4x8xf32>
    %c0_11 = arith.constant 0 : index
    %c0_12 = arith.constant 0 : index
    %c0_13 = arith.constant 0 : index
    %c0_14 = arith.constant 0 : index
    %7 = vector.load %arg4[%c0_11, %c0_12, %c0_13, %c0_14] : memref<1x1x1x8xf32, #tpu.memory_space<vmem>>, vector<1x1x1x8xf32>
    %8 = vector.broadcast %7 : vector<1x1x1x8xf32> to vector<2x4x4x8xf32>
    %9 = arith.addf %6, %8 : vector<2x4x4x8xf32>
    %cst_15 = arith.constant 0.000000e+00 : f32
    %10 = vector.broadcast %cst_15 : f32 to vector<2x4x4x8xf32>
    %11 = arith.maximumf %9, %10 : vector<2x4x4x8xf32>
    %12 = arith.truncf %11 : vector<2x4x4x8xf32> to vector<2x4x4x8xbf16>
    %c0_16 = arith.constant 0 : index
    %c1 = arith.constant 1 : index
    %c1_17 = arith.constant 1 : index
    %c0_18 = arith.constant 0 : index
    %13 = vector.load %arg9[%c0_16, %c1, %c1_17, %c0_18] : memref<2x6x6x8xbf16, #tpu.memory_space<vmem>>, vector<2x4x4x8xbf16>
    tpu.vector_store %arg9[%c0_16, %c1, %c1_17, %c0_18], %12 {strides = array<i32>} : memref<2x6x6x8xbf16, #tpu.memory_space<vmem>>, vector<2x4x4x8xbf16>,
    %c0_19 = arith.constant 0 : index
    %c0_20 = arith.constant 0 : index
    %14 = vector.load %arg6[%c0_19, %c0_20] : memref<1x4xf32, #tpu.memory_space<vmem>>, vector<1x4xf32>
    %cst_21 = arith.constant 0.000000e+00 : f32
    %15 = vector.broadcast %cst_21 : f32 to vector<1x4xf32>
    %cst_22 = arith.constant 0.000000e+00 : f32
    %16 = vector.broadcast %cst_22 : f32 to vector<1x4xf32>
    %c0_23 = arith.constant 0 : index
    %c1_24 = arith.constant 1 : index
    %c1_25 = arith.constant 1 : index
    %c0_26 = arith.constant 0 : index
    %17 = vector.load %arg9[%c0_23, %c1_24, %c1_25, %c0_26] : memref<2x6x6x8xbf16, #tpu.memory_space<vmem>>, vector<2x4x4x8xbf16>
    %c0_27 = arith.constant 0 : index
    %c1_28 = arith.constant 1 : index
    %c0_29 = arith.constant 0 : index
    %c0_30 = arith.constant 0 : index
    %18 = vector.load %arg9[%c0_27, %c1_28, %c0_29, %c0_30] : memref<2x6x6x8xbf16, #tpu.memory_space<vmem>>, vector<2x4x4x8xbf16>
    %c0_31 = arith.constant 0 : index
    %c0_32 = arith.constant 0 : index
    %c1_33 = arith.constant 1 : index
    %c0_34 = arith.constant 0 : index
    %19 = vector.load %arg9[%c0_31, %c0_32, %c1_33, %c0_34] : memref<2x6x6x8xbf16, #tpu.memory_space<vmem>>, vector<2x4x4x8xbf16>
    %c0_35 = arith.constant 0 : index
    %c0_36 = arith.constant 0 : index
    %c0_37 = arith.constant 0 : index
    %c0_38 = arith.constant 0 : index
    %20 = vector.load %arg9[%c0_35, %c0_36, %c0_37, %c0_38] : memref<2x6x6x8xbf16, #tpu.memory_space<vmem>>, vector<2x4x4x8xbf16>
    %21 = tpu.concatenate %17, %18, %19, %20 in 3 : vector<2x4x4x8xbf16>, vector<2x4x4x8xbf16>, vector<2x4x4x8xbf16>, vector<2x4x4x8xbf16> -> vector<2x4x4x32xbf16>
    %22 = vector.shape_cast %21 : vector<2x4x4x32xbf16> to vector<32x32xbf16>
    %c0_39 = arith.constant 0 : index
    %c0_40 = arith.constant 0 : index
    %c0_41 = arith.constant 0 : index
    %23 = vector.load %arg5[%c0_39, %c0_40, %c0_41] : memref<4x32x4xbf16, #tpu.memory_space<vmem>>, vector<1x32x4xbf16>
    %24 = vector.shape_cast %23 : vector<1x32x4xbf16> to vector<32x4xbf16>
    %cst_42 = arith.constant dense<0.000000e+00> : vector<32x4xf32>
    %25 = tpu.matmul %22, %24, %cst_42 {dimension_numbers = #tpu.dot_dimension_numbers<[1], [0], [0], [1], [0, 0, 1, 1], [], []>} : vector<32x32xbf16>, vector<32x4xbf16>, vector<32x4xf32> -> vector<32x4xf32>
    %26 = vector.broadcast %14 : vector<1x4xf32> to vector<32x4xf32>
    %27 = arith.addf %25, %26 : vector<32x4xf32>
    %cst_43 = arith.constant dense<0.000000e+00> : vector<4xf32>
    %28 = vector.multi_reduction <add>, %27, %cst_43 [0] : vector<32x4xf32> to vector<4xf32>
    %29 = vector.shape_cast %28 : vector<4xf32> to vector<1x4xf32>
    %30 = arith.addf %15, %29 : vector<1x4xf32>
    %31 = arith.mulf %27, %27 : vector<32x4xf32>
    %cst_44 = arith.constant dense<0.000000e+00> : vector<4xf32>
    %32 = vector.multi_reduction <add>, %31, %cst_44 [0] : vector<32x4xf32> to vector<4xf32>
    %33 = vector.shape_cast %32 : vector<4xf32> to vector<1x4xf32>
    %34 = arith.addf %16, %33 : vector<1x4xf32>
    %35 = vector.shape_cast %27 : vector<32x4xf32> to vector<2x16x4xf32>
    %36 = arith.truncf %35 : vector<2x16x4xf32> to vector<2x16x4xbf16>
    %c0_45 = arith.constant 0 : index
    %c0_46 = arith.constant 0 : index
    %c0_47 = arith.constant 0 : index
    %c0_48 = arith.constant 0 : index
    %37 = vector.load %arg7[%c0_45, %c0_46, %c0_47, %c0_48] : memref<2x4x16x4xbf16, #tpu.memory_space<vmem>>, vector<2x1x16x4xbf16>
    %38 = vector.shape_cast %37 : vector<2x1x16x4xbf16> to vector<2x16x4xbf16>
    %39 = vector.shape_cast %36 : vector<2x16x4xbf16> to vector<2x1x16x4xbf16>
    tpu.vector_store %arg7[%c0_45, %c0_46, %c0_47, %c0_48], %39 {strides = array<i32>} : memref<2x4x16x4xbf16, #tpu.memory_space<vmem>>, vector<2x1x16x4xbf16>,
    %c0_49 = arith.constant 0 : index
    %c1_50 = arith.constant 1 : index
    %c2 = arith.constant 2 : index
    %c0_51 = arith.constant 0 : index
    %40 = vector.load %arg9[%c0_49, %c1_50, %c2, %c0_51] : memref<2x6x6x8xbf16, #tpu.memory_space<vmem>>, vector<2x4x4x8xbf16>
    %c0_52 = arith.constant 0 : index
    %c1_53 = arith.constant 1 : index
    %c1_54 = arith.constant 1 : index
    %c0_55 = arith.constant 0 : index
    %41 = vector.load %arg9[%c0_52, %c1_53, %c1_54, %c0_55] : memref<2x6x6x8xbf16, #tpu.memory_space<vmem>>, vector<2x4x4x8xbf16>
    %c0_56 = arith.constant 0 : index
    %c0_57 = arith.constant 0 : index
    %c2_58 = arith.constant 2 : index
    %c0_59 = arith.constant 0 : index
    %42 = vector.load %arg9[%c0_56, %c0_57, %c2_58, %c0_59] : memref<2x6x6x8xbf16, #tpu.memory_space<vmem>>, vector<2x4x4x8xbf16>
    %c0_60 = arith.constant 0 : index
    %c0_61 = arith.constant 0 : index
    %c1_62 = arith.constant 1 : index
    %c0_63 = arith.constant 0 : index
    %43 = vector.load %arg9[%c0_60, %c0_61, %c1_62, %c0_63] : memref<2x6x6x8xbf16, #tpu.memory_space<vmem>>, vector<2x4x4x8xbf16>
    %44 = tpu.concatenate %40, %41, %42, %43 in 3 : vector<2x4x4x8xbf16>, vector<2x4x4x8xbf16>, vector<2x4x4x8xbf16>, vector<2x4x4x8xbf16> -> vector<2x4x4x32xbf16>
    %45 = vector.shape_cast %44 : vector<2x4x4x32xbf16> to vector<32x32xbf16>
    %c1_64 = arith.constant 1 : index
    %c0_65 = arith.constant 0 : index
    %c0_66 = arith.constant 0 : index
    %46 = vector.load %arg5[%c1_64, %c0_65, %c0_66] : memref<4x32x4xbf16, #tpu.memory_space<vmem>>, vector<1x32x4xbf16>
    %47 = vector.shape_cast %46 : vector<1x32x4xbf16> to vector<32x4xbf16>
    %cst_67 = arith.constant dense<0.000000e+00> : vector<32x4xf32>
    %48 = tpu.matmul %45, %47, %cst_67 {dimension_numbers = #tpu.dot_dimension_numbers<[1], [0], [0], [1], [0, 0, 1, 1], [], []>} : vector<32x32xbf16>, vector<32x4xbf16>, vector<32x4xf32> -> vector<32x4xf32>
    %49 = vector.broadcast %14 : vector<1x4xf32> to vector<32x4xf32>
    %50 = arith.addf %48, %49 : vector<32x4xf32>
    %cst_68 = arith.constant dense<0.000000e+00> : vector<4xf32>
    %51 = vector.multi_reduction <add>, %50, %cst_68 [0] : vector<32x4xf32> to vector<4xf32>
    %52 = vector.shape_cast %51 : vector<4xf32> to vector<1x4xf32>
    %53 = arith.addf %30, %52 : vector<1x4xf32>
    %54 = arith.mulf %50, %50 : vector<32x4xf32>
    %cst_69 = arith.constant dense<0.000000e+00> : vector<4xf32>
    %55 = vector.multi_reduction <add>, %54, %cst_69 [0] : vector<32x4xf32> to vector<4xf32>
    %56 = vector.shape_cast %55 : vector<4xf32> to vector<1x4xf32>
    %57 = arith.addf %34, %56 : vector<1x4xf32>
    %58 = vector.shape_cast %50 : vector<32x4xf32> to vector<2x16x4xf32>
    %59 = arith.truncf %58 : vector<2x16x4xf32> to vector<2x16x4xbf16>
    %c0_70 = arith.constant 0 : index
    %c1_71 = arith.constant 1 : index
    %c0_72 = arith.constant 0 : index
    %c0_73 = arith.constant 0 : index
    %60 = vector.load %arg7[%c0_70, %c1_71, %c0_72, %c0_73] : memref<2x4x16x4xbf16, #tpu.memory_space<vmem>>, vector<2x1x16x4xbf16>
    %61 = vector.shape_cast %60 : vector<2x1x16x4xbf16> to vector<2x16x4xbf16>
    %62 = vector.shape_cast %59 : vector<2x16x4xbf16> to vector<2x1x16x4xbf16>
    tpu.vector_store %arg7[%c0_70, %c1_71, %c0_72, %c0_73], %62 {strides = array<i32>} : memref<2x4x16x4xbf16, #tpu.memory_space<vmem>>, vector<2x1x16x4xbf16>,
    %c0_74 = arith.constant 0 : index
    %c2_75 = arith.constant 2 : index
    %c1_76 = arith.constant 1 : index
    %c0_77 = arith.constant 0 : index
    %63 = vector.load %arg9[%c0_74, %c2_75, %c1_76, %c0_77] : memref<2x6x6x8xbf16, #tpu.memory_space<vmem>>, vector<2x4x4x8xbf16>
    %c0_78 = arith.constant 0 : index
    %c2_79 = arith.constant 2 : index
    %c0_80 = arith.constant 0 : index
    %c0_81 = arith.constant 0 : index
    %64 = vector.load %arg9[%c0_78, %c2_79, %c0_80, %c0_81] : memref<2x6x6x8xbf16, #tpu.memory_space<vmem>>, vector<2x4x4x8xbf16>
    %c0_82 = arith.constant 0 : index
    %c1_83 = arith.constant 1 : index
    %c1_84 = arith.constant 1 : index
    %c0_85 = arith.constant 0 : index
    %65 = vector.load %arg9[%c0_82, %c1_83, %c1_84, %c0_85] : memref<2x6x6x8xbf16, #tpu.memory_space<vmem>>, vector<2x4x4x8xbf16>
    %c0_86 = arith.constant 0 : index
    %c1_87 = arith.constant 1 : index
    %c0_88 = arith.constant 0 : index
    %c0_89 = arith.constant 0 : index
    %66 = vector.load %arg9[%c0_86, %c1_87, %c0_88, %c0_89] : memref<2x6x6x8xbf16, #tpu.memory_space<vmem>>, vector<2x4x4x8xbf16>
    %67 = tpu.concatenate %63, %64, %65, %66 in 3 : vector<2x4x4x8xbf16>, vector<2x4x4x8xbf16>, vector<2x4x4x8xbf16>, vector<2x4x4x8xbf16> -> vector<2x4x4x32xbf16>
    %68 = vector.shape_cast %67 : vector<2x4x4x32xbf16> to vector<32x32xbf16>
    %c2_90 = arith.constant 2 : index
    %c0_91 = arith.constant 0 : index
    %c0_92 = arith.constant 0 : index
    %69 = vector.load %arg5[%c2_90, %c0_91, %c0_92] : memref<4x32x4xbf16, #tpu.memory_space<vmem>>, vector<1x32x4xbf16>
    %70 = vector.shape_cast %69 : vector<1x32x4xbf16> to vector<32x4xbf16>
    %cst_93 = arith.constant dense<0.000000e+00> : vector<32x4xf32>
    %71 = tpu.matmul %68, %70, %cst_93 {dimension_numbers = #tpu.dot_dimension_numbers<[1], [0], [0], [1], [0, 0, 1, 1], [], []>} : vector<32x32xbf16>, vector<32x4xbf16>, vector<32x4xf32> -> vector<32x4xf32>
    %72 = vector.broadcast %14 : vector<1x4xf32> to vector<32x4xf32>
    %73 = arith.addf %71, %72 : vector<32x4xf32>
    %cst_94 = arith.constant dense<0.000000e+00> : vector<4xf32>
    %74 = vector.multi_reduction <add>, %73, %cst_94 [0] : vector<32x4xf32> to vector<4xf32>
    %75 = vector.shape_cast %74 : vector<4xf32> to vector<1x4xf32>
    %76 = arith.addf %53, %75 : vector<1x4xf32>
    %77 = arith.mulf %73, %73 : vector<32x4xf32>
    %cst_95 = arith.constant dense<0.000000e+00> : vector<4xf32>
    %78 = vector.multi_reduction <add>, %77, %cst_95 [0] : vector<32x4xf32> to vector<4xf32>
    %79 = vector.shape_cast %78 : vector<4xf32> to vector<1x4xf32>
    %80 = arith.addf %57, %79 : vector<1x4xf32>
    %81 = vector.shape_cast %73 : vector<32x4xf32> to vector<2x16x4xf32>
    %82 = arith.truncf %81 : vector<2x16x4xf32> to vector<2x16x4xbf16>
    %c0_96 = arith.constant 0 : index
    %c2_97 = arith.constant 2 : index
    %c0_98 = arith.constant 0 : index
    %c0_99 = arith.constant 0 : index
    %83 = vector.load %arg7[%c0_96, %c2_97, %c0_98, %c0_99] : memref<2x4x16x4xbf16, #tpu.memory_space<vmem>>, vector<2x1x16x4xbf16>
    %84 = vector.shape_cast %83 : vector<2x1x16x4xbf16> to vector<2x16x4xbf16>
    %85 = vector.shape_cast %82 : vector<2x16x4xbf16> to vector<2x1x16x4xbf16>
    tpu.vector_store %arg7[%c0_96, %c2_97, %c0_98, %c0_99], %85 {strides = array<i32>} : memref<2x4x16x4xbf16, #tpu.memory_space<vmem>>, vector<2x1x16x4xbf16>,
    %c0_100 = arith.constant 0 : index
    %c2_101 = arith.constant 2 : index
    %c2_102 = arith.constant 2 : index
    %c0_103 = arith.constant 0 : index
    %86 = vector.load %arg9[%c0_100, %c2_101, %c2_102, %c0_103] : memref<2x6x6x8xbf16, #tpu.memory_space<vmem>>, vector<2x4x4x8xbf16>
    %c0_104 = arith.constant 0 : index
    %c2_105 = arith.constant 2 : index
    %c1_106 = arith.constant 1 : index
    %c0_107 = arith.constant 0 : index
    %87 = vector.load %arg9[%c0_104, %c2_105, %c1_106, %c0_107] : memref<2x6x6x8xbf16, #tpu.memory_space<vmem>>, vector<2x4x4x8xbf16>
    %c0_108 = arith.constant 0 : index
    %c1_109 = arith.constant 1 : index
    %c2_110 = arith.constant 2 : index
    %c0_111 = arith.constant 0 : index
    %88 = vector.load %arg9[%c0_108, %c1_109, %c2_110, %c0_111] : memref<2x6x6x8xbf16, #tpu.memory_space<vmem>>, vector<2x4x4x8xbf16>
    %c0_112 = arith.constant 0 : index
    %c1_113 = arith.constant 1 : index
    %c1_114 = arith.constant 1 : index
    %c0_115 = arith.constant 0 : index
    %89 = vector.load %arg9[%c0_112, %c1_113, %c1_114, %c0_115] : memref<2x6x6x8xbf16, #tpu.memory_space<vmem>>, vector<2x4x4x8xbf16>
    %90 = tpu.concatenate %86, %87, %88, %89 in 3 : vector<2x4x4x8xbf16>, vector<2x4x4x8xbf16>, vector<2x4x4x8xbf16>, vector<2x4x4x8xbf16> -> vector<2x4x4x32xbf16>
    %91 = vector.shape_cast %90 : vector<2x4x4x32xbf16> to vector<32x32xbf16>
    %c3 = arith.constant 3 : index
    %c0_116 = arith.constant 0 : index
    %c0_117 = arith.constant 0 : index
    %92 = vector.load %arg5[%c3, %c0_116, %c0_117] : memref<4x32x4xbf16, #tpu.memory_space<vmem>>, vector<1x32x4xbf16>
    %93 = vector.shape_cast %92 : vector<1x32x4xbf16> to vector<32x4xbf16>
    %cst_118 = arith.constant dense<0.000000e+00> : vector<32x4xf32>
    %94 = tpu.matmul %91, %93, %cst_118 {dimension_numbers = #tpu.dot_dimension_numbers<[1], [0], [0], [1], [0, 0, 1, 1], [], []>} : vector<32x32xbf16>, vector<32x4xbf16>, vector<32x4xf32> -> vector<32x4xf32>
    %95 = vector.broadcast %14 : vector<1x4xf32> to vector<32x4xf32>
    %96 = arith.addf %94, %95 : vector<32x4xf32>
    %cst_119 = arith.constant dense<0.000000e+00> : vector<4xf32>
    %97 = vector.multi_reduction <add>, %96, %cst_119 [0] : vector<32x4xf32> to vector<4xf32>
    %98 = vector.shape_cast %97 : vector<4xf32> to vector<1x4xf32>
    %99 = arith.addf %76, %98 : vector<1x4xf32>
    %100 = arith.mulf %96, %96 : vector<32x4xf32>
    %cst_120 = arith.constant dense<0.000000e+00> : vector<4xf32>
    %101 = vector.multi_reduction <add>, %100, %cst_120 [0] : vector<32x4xf32> to vector<4xf32>
    %102 = vector.shape_cast %101 : vector<4xf32> to vector<1x4xf32>
    %103 = arith.addf %80, %102 : vector<1x4xf32>
    %104 = vector.shape_cast %96 : vector<32x4xf32> to vector<2x16x4xf32>
    %105 = arith.truncf %104 : vector<2x16x4xf32> to vector<2x16x4xbf16>
    %c0_121 = arith.constant 0 : index
    %c3_122 = arith.constant 3 : index
    %c0_123 = arith.constant 0 : index
    %c0_124 = arith.constant 0 : index
    %106 = vector.load %arg7[%c0_121, %c3_122, %c0_123, %c0_124] : memref<2x4x16x4xbf16, #tpu.memory_space<vmem>>, vector<2x1x16x4xbf16>
    %107 = vector.shape_cast %106 : vector<2x1x16x4xbf16> to vector<2x16x4xbf16>
    %108 = vector.shape_cast %105 : vector<2x16x4xbf16> to vector<2x1x16x4xbf16>
    tpu.vector_store %arg7[%c0_121, %c3_122, %c0_123, %c0_124], %108 {strides = array<i32>} : memref<2x4x16x4xbf16, #tpu.memory_space<vmem>>, vector<2x1x16x4xbf16>,
    %c0_125 = arith.constant 0 : index
    %c0_126 = arith.constant 0 : index
    %c0_127 = arith.constant 0 : index
    %109 = vector.load %arg8[%c0_125, %c0_126, %c0_127] : memref<1x2x4xf32, #tpu.memory_space<vmem>>, vector<1x1x4xf32>
    %110 = vector.shape_cast %109 : vector<1x1x4xf32> to vector<1x4xf32>
    %111 = vector.shape_cast %99 : vector<1x4xf32> to vector<1x1x4xf32>
    tpu.vector_store %arg8[%c0_125, %c0_126, %c0_127], %111 {strides = array<i32>} : memref<1x2x4xf32, #tpu.memory_space<vmem>>, vector<1x1x4xf32>,
    %c0_128 = arith.constant 0 : index
    %c1_129 = arith.constant 1 : index
    %c0_130 = arith.constant 0 : index
    %112 = vector.load %arg8[%c0_128, %c1_129, %c0_130] : memref<1x2x4xf32, #tpu.memory_space<vmem>>, vector<1x1x4xf32>
    %113 = vector.shape_cast %112 : vector<1x1x4xf32> to vector<1x4xf32>
    %114 = vector.shape_cast %103 : vector<1x4xf32> to vector<1x1x4xf32>
    tpu.vector_store %arg8[%c0_128, %c1_129, %c0_130], %114 {strides = array<i32>} : memref<1x2x4xf32, #tpu.memory_space<vmem>>, vector<1x1x4xf32>,
    return
  }
  func.func @transform_0(%arg0: i32, %arg1: i32) -> (i32, i32, i32, i32) {
    %c0_i32 = arith.constant 0 : i32
    %c0_i32_0 = arith.constant 0 : i32
    %c0_i32_1 = arith.constant 0 : i32
    %c0_i32_2 = arith.constant 0 : i32
    return %arg1, %c0_i32, %c0_i32_0, %c0_i32_1 : i32, i32, i32, i32
  }
  func.func @transform_1(%arg0: i32, %arg1: i32) -> (i32, i32, i32, i32) {
    %c0_i32 = arith.constant 0 : i32
    %c0_i32_0 = arith.constant 0 : i32
    %c0_i32_1 = arith.constant 0 : i32
    %c0_i32_2 = arith.constant 0 : i32
    %c0_i32_3 = arith.constant 0 : i32
    return %c0_i32, %c0_i32_0, %c0_i32_1, %c0_i32_2 : i32, i32, i32, i32
  }
  func.func @transform_2(%arg0: i32, %arg1: i32) -> (i32, i32, i32, i32) {
    %c0_i32 = arith.constant 0 : i32
    %c0_i32_0 = arith.constant 0 : i32
    %c0_i32_1 = arith.constant 0 : i32
    %c0_i32_2 = arith.constant 0 : i32
    %c0_i32_3 = arith.constant 0 : i32
    return %c0_i32, %c0_i32_0, %c0_i32_1, %c0_i32_2 : i32, i32, i32, i32
  }
  func.func @transform_3(%arg0: i32, %arg1: i32) -> (i32, i32, i32) {
    %c0_i32 = arith.constant 0 : i32
    %c0_i32_0 = arith.constant 0 : i32
    %c0_i32_1 = arith.constant 0 : i32
    return %c0_i32, %c0_i32_0, %arg0 : i32, i32, i32
  }
  func.func @transform_4(%arg0: i32, %arg1: i32) -> (i32, i32) {
    %c0_i32 = arith.constant 0 : i32
    %c0_i32_0 = arith.constant 0 : i32
    return %c0_i32, %arg0 : i32, i32
  }
  func.func @transform_5(%arg0: i32, %arg1: i32) -> (i32, i32, i32, i32) {
    %c0_i32 = arith.constant 0 : i32
    %c0_i32_0 = arith.constant 0 : i32
    %c0_i32_1 = arith.constant 0 : i32
    return %arg1, %c0_i32, %c0_i32_0, %arg0 : i32, i32, i32, i32
  }
  func.func @transform_6(%arg0: i32, %arg1: i32) -> (i32, i32, i32) {
    %c0_i32 = arith.constant 0 : i32
    %c0_i32_0 = arith.constant 0 : i32
    return %arg1, %c0_i32, %arg0 : i32, i32, i32
  }
}

module attributes {stable_mosaic.version = 11 : i64} {
  func.func @kernel(%arg0: i32, %arg1: i32, %arg2: memref<1x8x8x4xbf16, #tpu.memory_space<vmem>>, %arg3: memref<1x1x1x4xf32, #tpu.memory_space<vmem>>, %arg4: memref<1x1x1x4xf32, #tpu.memory_space<vmem>>, %arg5: memref<4x3x16xbf16, #tpu.memory_space<vmem>>, %arg6: memref<3x1xf32, #tpu.memory_space<vmem>>, %arg7: memref<1x4x3x64xf32, #tpu.memory_space<vmem>>, %arg8: memref<1x10x10x4xbf16, #tpu.memory_space<vmem>>) attributes {dimension_semantics = [#tpu.dimension_semantics<parallel>, #tpu.dimension_semantics<parallel>], iteration_bounds = array<i64: 1, 2>, scalar_prefetch = 0 : i64, scratch_operands = 1 : i64, tpu.core_type = #tpu.core_type<tc>, window_params = [{transform_indices = @transform_0, window_bounds = array<i64: 1, 8, 8, 4>}, {pipeline_mode = #tpu.pipeline_mode<synchronous>, transform_indices = @transform_1, window_bounds = array<i64: 1, 1, 1, 4>}, {pipeline_mode = #tpu.pipeline_mode<synchronous>, transform_indices = @transform_2, window_bounds = array<i64: 1, 1, 1, 4>}, {transform_indices = @transform_3, window_bounds = array<i64: 4, 3, 16>}, {transform_indices = @transform_4, window_bounds = array<i64: 3, 1>}, {transform_indices = @transform_5, window_bounds = array<i64: 1, 4, 3, 64>}]} {
    %cst = arith.constant 0.000000e+00 : bf16
    %0 = vector.broadcast %cst : bf16 to vector<1x10x10x4xbf16>
    %c0 = arith.constant 0 : index
    %c0_0 = arith.constant 0 : index
    %c0_1 = arith.constant 0 : index
    %c0_2 = arith.constant 0 : index
    %1 = vector.load %arg8[%c0, %c0_0, %c0_1, %c0_2] : memref<1x10x10x4xbf16, #tpu.memory_space<vmem>>, vector<1x10x10x4xbf16>
    tpu.vector_store %arg8[%c0, %c0_0, %c0_1, %c0_2], %0 {strides = array<i32>} : memref<1x10x10x4xbf16, #tpu.memory_space<vmem>>, vector<1x10x10x4xbf16>,
    %c0_3 = arith.constant 0 : index
    %c0_4 = arith.constant 0 : index
    %c0_5 = arith.constant 0 : index
    %c0_6 = arith.constant 0 : index
    %2 = vector.load %arg2[%c0_3, %c0_4, %c0_5, %c0_6] : memref<1x8x8x4xbf16, #tpu.memory_space<vmem>>, vector<1x8x8x4xbf16>
    %3 = arith.extf %2 : vector<1x8x8x4xbf16> to vector<1x8x8x4xf32>
    %c0_7 = arith.constant 0 : index
    %c0_8 = arith.constant 0 : index
    %c0_9 = arith.constant 0 : index
    %c0_10 = arith.constant 0 : index
    %4 = vector.load %arg3[%c0_7, %c0_8, %c0_9, %c0_10] : memref<1x1x1x4xf32, #tpu.memory_space<vmem>>, vector<1x1x1x4xf32>
    %5 = vector.broadcast %4 : vector<1x1x1x4xf32> to vector<1x8x8x4xf32>
    %6 = arith.mulf %3, %5 : vector<1x8x8x4xf32>
    %c0_11 = arith.constant 0 : index
    %c0_12 = arith.constant 0 : index
    %c0_13 = arith.constant 0 : index
    %c0_14 = arith.constant 0 : index
    %7 = vector.load %arg4[%c0_11, %c0_12, %c0_13, %c0_14] : memref<1x1x1x4xf32, #tpu.memory_space<vmem>>, vector<1x1x1x4xf32>
    %8 = vector.broadcast %7 : vector<1x1x1x4xf32> to vector<1x8x8x4xf32>
    %9 = arith.addf %6, %8 : vector<1x8x8x4xf32>
    %cst_15 = arith.constant 0.000000e+00 : f32
    %10 = vector.broadcast %cst_15 : f32 to vector<1x8x8x4xf32>
    %11 = arith.maximumf %9, %10 : vector<1x8x8x4xf32>
    %12 = arith.truncf %11 : vector<1x8x8x4xf32> to vector<1x8x8x4xbf16>
    %c0_16 = arith.constant 0 : index
    %c1 = arith.constant 1 : index
    %c1_17 = arith.constant 1 : index
    %c0_18 = arith.constant 0 : index
    %13 = vector.load %arg8[%c0_16, %c1, %c1_17, %c0_18] : memref<1x10x10x4xbf16, #tpu.memory_space<vmem>>, vector<1x8x8x4xbf16>
    tpu.vector_store %arg8[%c0_16, %c1, %c1_17, %c0_18], %12 {strides = array<i32>} : memref<1x10x10x4xbf16, #tpu.memory_space<vmem>>, vector<1x8x8x4xbf16>,
    %c0_19 = arith.constant 0 : index
    %c0_20 = arith.constant 0 : index
    %14 = vector.load %arg6[%c0_19, %c0_20] : memref<3x1xf32, #tpu.memory_space<vmem>>, vector<3x1xf32>
    %c0_21 = arith.constant 0 : index
    %c1_22 = arith.constant 1 : index
    %c1_23 = arith.constant 1 : index
    %c0_24 = arith.constant 0 : index
    %15 = vector.load %arg8[%c0_21, %c1_22, %c1_23, %c0_24] : memref<1x10x10x4xbf16, #tpu.memory_space<vmem>>, vector<1x8x8x4xbf16>
    %c0_25 = arith.constant 0 : index
    %c1_26 = arith.constant 1 : index
    %c0_27 = arith.constant 0 : index
    %c0_28 = arith.constant 0 : index
    %16 = vector.load %arg8[%c0_25, %c1_26, %c0_27, %c0_28] : memref<1x10x10x4xbf16, #tpu.memory_space<vmem>>, vector<1x8x8x4xbf16>
    %c0_29 = arith.constant 0 : index
    %c0_30 = arith.constant 0 : index
    %c1_31 = arith.constant 1 : index
    %c0_32 = arith.constant 0 : index
    %17 = vector.load %arg8[%c0_29, %c0_30, %c1_31, %c0_32] : memref<1x10x10x4xbf16, #tpu.memory_space<vmem>>, vector<1x8x8x4xbf16>
    %c0_33 = arith.constant 0 : index
    %c0_34 = arith.constant 0 : index
    %c0_35 = arith.constant 0 : index
    %c0_36 = arith.constant 0 : index
    %18 = vector.load %arg8[%c0_33, %c0_34, %c0_35, %c0_36] : memref<1x10x10x4xbf16, #tpu.memory_space<vmem>>, vector<1x8x8x4xbf16>
    %19 = tpu.concatenate %15, %16, %17, %18 in 3 : vector<1x8x8x4xbf16>, vector<1x8x8x4xbf16>, vector<1x8x8x4xbf16>, vector<1x8x8x4xbf16> -> vector<1x8x8x16xbf16>
    %20 = vector.shape_cast %19 : vector<1x8x8x16xbf16> to vector<64x16xbf16>
    %c0_37 = arith.constant 0 : index
    %c0_38 = arith.constant 0 : index
    %c0_39 = arith.constant 0 : index
    %21 = vector.load %arg5[%c0_37, %c0_38, %c0_39] : memref<4x3x16xbf16, #tpu.memory_space<vmem>>, vector<1x3x16xbf16>
    %22 = vector.shape_cast %21 : vector<1x3x16xbf16> to vector<3x16xbf16>
    %cst_40 = arith.constant dense<0.000000e+00> : vector<3x64xf32>
    %23 = tpu.matmul %22, %20, %cst_40 {dimension_numbers = #tpu.dot_dimension_numbers<[1], [1], [0], [0], [0, 0, 1, 0], [], []>} : vector<3x16xbf16>, vector<64x16xbf16>, vector<3x64xf32> -> vector<3x64xf32>
    %24 = vector.broadcast %14 : vector<3x1xf32> to vector<3x64xf32>
    %25 = arith.addf %23, %24 : vector<3x64xf32>
    %26 = math.tanh %25 : vector<3x64xf32>
    %c0_41 = arith.constant 0 : index
    %c0_42 = arith.constant 0 : index
    %c0_43 = arith.constant 0 : index
    %c0_44 = arith.constant 0 : index
    %27 = vector.load %arg7[%c0_41, %c0_42, %c0_43, %c0_44] : memref<1x4x3x64xf32, #tpu.memory_space<vmem>>, vector<1x1x3x64xf32>
    %28 = vector.shape_cast %27 : vector<1x1x3x64xf32> to vector<3x64xf32>
    %29 = vector.shape_cast %26 : vector<3x64xf32> to vector<1x1x3x64xf32>
    tpu.vector_store %arg7[%c0_41, %c0_42, %c0_43, %c0_44], %29 {strides = array<i32>} : memref<1x4x3x64xf32, #tpu.memory_space<vmem>>, vector<1x1x3x64xf32>,
    %c0_45 = arith.constant 0 : index
    %c1_46 = arith.constant 1 : index
    %c2 = arith.constant 2 : index
    %c0_47 = arith.constant 0 : index
    %30 = vector.load %arg8[%c0_45, %c1_46, %c2, %c0_47] : memref<1x10x10x4xbf16, #tpu.memory_space<vmem>>, vector<1x8x8x4xbf16>
    %c0_48 = arith.constant 0 : index
    %c1_49 = arith.constant 1 : index
    %c1_50 = arith.constant 1 : index
    %c0_51 = arith.constant 0 : index
    %31 = vector.load %arg8[%c0_48, %c1_49, %c1_50, %c0_51] : memref<1x10x10x4xbf16, #tpu.memory_space<vmem>>, vector<1x8x8x4xbf16>
    %c0_52 = arith.constant 0 : index
    %c0_53 = arith.constant 0 : index
    %c2_54 = arith.constant 2 : index
    %c0_55 = arith.constant 0 : index
    %32 = vector.load %arg8[%c0_52, %c0_53, %c2_54, %c0_55] : memref<1x10x10x4xbf16, #tpu.memory_space<vmem>>, vector<1x8x8x4xbf16>
    %c0_56 = arith.constant 0 : index
    %c0_57 = arith.constant 0 : index
    %c1_58 = arith.constant 1 : index
    %c0_59 = arith.constant 0 : index
    %33 = vector.load %arg8[%c0_56, %c0_57, %c1_58, %c0_59] : memref<1x10x10x4xbf16, #tpu.memory_space<vmem>>, vector<1x8x8x4xbf16>
    %34 = tpu.concatenate %30, %31, %32, %33 in 3 : vector<1x8x8x4xbf16>, vector<1x8x8x4xbf16>, vector<1x8x8x4xbf16>, vector<1x8x8x4xbf16> -> vector<1x8x8x16xbf16>
    %35 = vector.shape_cast %34 : vector<1x8x8x16xbf16> to vector<64x16xbf16>
    %c1_60 = arith.constant 1 : index
    %c0_61 = arith.constant 0 : index
    %c0_62 = arith.constant 0 : index
    %36 = vector.load %arg5[%c1_60, %c0_61, %c0_62] : memref<4x3x16xbf16, #tpu.memory_space<vmem>>, vector<1x3x16xbf16>
    %37 = vector.shape_cast %36 : vector<1x3x16xbf16> to vector<3x16xbf16>
    %cst_63 = arith.constant dense<0.000000e+00> : vector<3x64xf32>
    %38 = tpu.matmul %37, %35, %cst_63 {dimension_numbers = #tpu.dot_dimension_numbers<[1], [1], [0], [0], [0, 0, 1, 0], [], []>} : vector<3x16xbf16>, vector<64x16xbf16>, vector<3x64xf32> -> vector<3x64xf32>
    %39 = vector.broadcast %14 : vector<3x1xf32> to vector<3x64xf32>
    %40 = arith.addf %38, %39 : vector<3x64xf32>
    %41 = math.tanh %40 : vector<3x64xf32>
    %c0_64 = arith.constant 0 : index
    %c1_65 = arith.constant 1 : index
    %c0_66 = arith.constant 0 : index
    %c0_67 = arith.constant 0 : index
    %42 = vector.load %arg7[%c0_64, %c1_65, %c0_66, %c0_67] : memref<1x4x3x64xf32, #tpu.memory_space<vmem>>, vector<1x1x3x64xf32>
    %43 = vector.shape_cast %42 : vector<1x1x3x64xf32> to vector<3x64xf32>
    %44 = vector.shape_cast %41 : vector<3x64xf32> to vector<1x1x3x64xf32>
    tpu.vector_store %arg7[%c0_64, %c1_65, %c0_66, %c0_67], %44 {strides = array<i32>} : memref<1x4x3x64xf32, #tpu.memory_space<vmem>>, vector<1x1x3x64xf32>,
    %c0_68 = arith.constant 0 : index
    %c2_69 = arith.constant 2 : index
    %c1_70 = arith.constant 1 : index
    %c0_71 = arith.constant 0 : index
    %45 = vector.load %arg8[%c0_68, %c2_69, %c1_70, %c0_71] : memref<1x10x10x4xbf16, #tpu.memory_space<vmem>>, vector<1x8x8x4xbf16>
    %c0_72 = arith.constant 0 : index
    %c2_73 = arith.constant 2 : index
    %c0_74 = arith.constant 0 : index
    %c0_75 = arith.constant 0 : index
    %46 = vector.load %arg8[%c0_72, %c2_73, %c0_74, %c0_75] : memref<1x10x10x4xbf16, #tpu.memory_space<vmem>>, vector<1x8x8x4xbf16>
    %c0_76 = arith.constant 0 : index
    %c1_77 = arith.constant 1 : index
    %c1_78 = arith.constant 1 : index
    %c0_79 = arith.constant 0 : index
    %47 = vector.load %arg8[%c0_76, %c1_77, %c1_78, %c0_79] : memref<1x10x10x4xbf16, #tpu.memory_space<vmem>>, vector<1x8x8x4xbf16>
    %c0_80 = arith.constant 0 : index
    %c1_81 = arith.constant 1 : index
    %c0_82 = arith.constant 0 : index
    %c0_83 = arith.constant 0 : index
    %48 = vector.load %arg8[%c0_80, %c1_81, %c0_82, %c0_83] : memref<1x10x10x4xbf16, #tpu.memory_space<vmem>>, vector<1x8x8x4xbf16>
    %49 = tpu.concatenate %45, %46, %47, %48 in 3 : vector<1x8x8x4xbf16>, vector<1x8x8x4xbf16>, vector<1x8x8x4xbf16>, vector<1x8x8x4xbf16> -> vector<1x8x8x16xbf16>
    %50 = vector.shape_cast %49 : vector<1x8x8x16xbf16> to vector<64x16xbf16>
    %c2_84 = arith.constant 2 : index
    %c0_85 = arith.constant 0 : index
    %c0_86 = arith.constant 0 : index
    %51 = vector.load %arg5[%c2_84, %c0_85, %c0_86] : memref<4x3x16xbf16, #tpu.memory_space<vmem>>, vector<1x3x16xbf16>
    %52 = vector.shape_cast %51 : vector<1x3x16xbf16> to vector<3x16xbf16>
    %cst_87 = arith.constant dense<0.000000e+00> : vector<3x64xf32>
    %53 = tpu.matmul %52, %50, %cst_87 {dimension_numbers = #tpu.dot_dimension_numbers<[1], [1], [0], [0], [0, 0, 1, 0], [], []>} : vector<3x16xbf16>, vector<64x16xbf16>, vector<3x64xf32> -> vector<3x64xf32>
    %54 = vector.broadcast %14 : vector<3x1xf32> to vector<3x64xf32>
    %55 = arith.addf %53, %54 : vector<3x64xf32>
    %56 = math.tanh %55 : vector<3x64xf32>
    %c0_88 = arith.constant 0 : index
    %c2_89 = arith.constant 2 : index
    %c0_90 = arith.constant 0 : index
    %c0_91 = arith.constant 0 : index
    %57 = vector.load %arg7[%c0_88, %c2_89, %c0_90, %c0_91] : memref<1x4x3x64xf32, #tpu.memory_space<vmem>>, vector<1x1x3x64xf32>
    %58 = vector.shape_cast %57 : vector<1x1x3x64xf32> to vector<3x64xf32>
    %59 = vector.shape_cast %56 : vector<3x64xf32> to vector<1x1x3x64xf32>
    tpu.vector_store %arg7[%c0_88, %c2_89, %c0_90, %c0_91], %59 {strides = array<i32>} : memref<1x4x3x64xf32, #tpu.memory_space<vmem>>, vector<1x1x3x64xf32>,
    %c0_92 = arith.constant 0 : index
    %c2_93 = arith.constant 2 : index
    %c2_94 = arith.constant 2 : index
    %c0_95 = arith.constant 0 : index
    %60 = vector.load %arg8[%c0_92, %c2_93, %c2_94, %c0_95] : memref<1x10x10x4xbf16, #tpu.memory_space<vmem>>, vector<1x8x8x4xbf16>
    %c0_96 = arith.constant 0 : index
    %c2_97 = arith.constant 2 : index
    %c1_98 = arith.constant 1 : index
    %c0_99 = arith.constant 0 : index
    %61 = vector.load %arg8[%c0_96, %c2_97, %c1_98, %c0_99] : memref<1x10x10x4xbf16, #tpu.memory_space<vmem>>, vector<1x8x8x4xbf16>
    %c0_100 = arith.constant 0 : index
    %c1_101 = arith.constant 1 : index
    %c2_102 = arith.constant 2 : index
    %c0_103 = arith.constant 0 : index
    %62 = vector.load %arg8[%c0_100, %c1_101, %c2_102, %c0_103] : memref<1x10x10x4xbf16, #tpu.memory_space<vmem>>, vector<1x8x8x4xbf16>
    %c0_104 = arith.constant 0 : index
    %c1_105 = arith.constant 1 : index
    %c1_106 = arith.constant 1 : index
    %c0_107 = arith.constant 0 : index
    %63 = vector.load %arg8[%c0_104, %c1_105, %c1_106, %c0_107] : memref<1x10x10x4xbf16, #tpu.memory_space<vmem>>, vector<1x8x8x4xbf16>
    %64 = tpu.concatenate %60, %61, %62, %63 in 3 : vector<1x8x8x4xbf16>, vector<1x8x8x4xbf16>, vector<1x8x8x4xbf16>, vector<1x8x8x4xbf16> -> vector<1x8x8x16xbf16>
    %65 = vector.shape_cast %64 : vector<1x8x8x16xbf16> to vector<64x16xbf16>
    %c3 = arith.constant 3 : index
    %c0_108 = arith.constant 0 : index
    %c0_109 = arith.constant 0 : index
    %66 = vector.load %arg5[%c3, %c0_108, %c0_109] : memref<4x3x16xbf16, #tpu.memory_space<vmem>>, vector<1x3x16xbf16>
    %67 = vector.shape_cast %66 : vector<1x3x16xbf16> to vector<3x16xbf16>
    %cst_110 = arith.constant dense<0.000000e+00> : vector<3x64xf32>
    %68 = tpu.matmul %67, %65, %cst_110 {dimension_numbers = #tpu.dot_dimension_numbers<[1], [1], [0], [0], [0, 0, 1, 0], [], []>} : vector<3x16xbf16>, vector<64x16xbf16>, vector<3x64xf32> -> vector<3x64xf32>
    %69 = vector.broadcast %14 : vector<3x1xf32> to vector<3x64xf32>
    %70 = arith.addf %68, %69 : vector<3x64xf32>
    %71 = math.tanh %70 : vector<3x64xf32>
    %c0_111 = arith.constant 0 : index
    %c3_112 = arith.constant 3 : index
    %c0_113 = arith.constant 0 : index
    %c0_114 = arith.constant 0 : index
    %72 = vector.load %arg7[%c0_111, %c3_112, %c0_113, %c0_114] : memref<1x4x3x64xf32, #tpu.memory_space<vmem>>, vector<1x1x3x64xf32>
    %73 = vector.shape_cast %72 : vector<1x1x3x64xf32> to vector<3x64xf32>
    %74 = vector.shape_cast %71 : vector<3x64xf32> to vector<1x1x3x64xf32>
    tpu.vector_store %arg7[%c0_111, %c3_112, %c0_113, %c0_114], %74 {strides = array<i32>} : memref<1x4x3x64xf32, #tpu.memory_space<vmem>>, vector<1x1x3x64xf32>,
    return
  }
  func.func @transform_0(%arg0: i32, %arg1: i32) -> (i32, i32, i32, i32) {
    %c0_i32 = arith.constant 0 : i32
    %c0_i32_0 = arith.constant 0 : i32
    %c0_i32_1 = arith.constant 0 : i32
    %c0_i32_2 = arith.constant 0 : i32
    return %arg1, %c0_i32, %c0_i32_0, %c0_i32_1 : i32, i32, i32, i32
  }
  func.func @transform_1(%arg0: i32, %arg1: i32) -> (i32, i32, i32, i32) {
    %c0_i32 = arith.constant 0 : i32
    %c0_i32_0 = arith.constant 0 : i32
    %c0_i32_1 = arith.constant 0 : i32
    %c0_i32_2 = arith.constant 0 : i32
    %c0_i32_3 = arith.constant 0 : i32
    return %c0_i32, %c0_i32_0, %c0_i32_1, %c0_i32_2 : i32, i32, i32, i32
  }
  func.func @transform_2(%arg0: i32, %arg1: i32) -> (i32, i32, i32, i32) {
    %c0_i32 = arith.constant 0 : i32
    %c0_i32_0 = arith.constant 0 : i32
    %c0_i32_1 = arith.constant 0 : i32
    %c0_i32_2 = arith.constant 0 : i32
    %c0_i32_3 = arith.constant 0 : i32
    return %c0_i32, %c0_i32_0, %c0_i32_1, %c0_i32_2 : i32, i32, i32, i32
  }
  func.func @transform_3(%arg0: i32, %arg1: i32) -> (i32, i32, i32) {
    %c0_i32 = arith.constant 0 : i32
    %c0_i32_0 = arith.constant 0 : i32
    %c0_i32_1 = arith.constant 0 : i32
    return %c0_i32, %arg0, %c0_i32_0 : i32, i32, i32
  }
  func.func @transform_4(%arg0: i32, %arg1: i32) -> (i32, i32) {
    %c0_i32 = arith.constant 0 : i32
    %c0_i32_0 = arith.constant 0 : i32
    return %arg0, %c0_i32 : i32, i32
  }
  func.func @transform_5(%arg0: i32, %arg1: i32) -> (i32, i32, i32, i32) {
    %c0_i32 = arith.constant 0 : i32
    %c0_i32_0 = arith.constant 0 : i32
    %c0_i32_1 = arith.constant 0 : i32
    return %arg1, %c0_i32, %arg0, %c0_i32_0 : i32, i32, i32, i32
  }
}

</mosaic_0001>

<bundles_post_ra>
// kernel: tile.6
= control target key start
LH: loop header
LB: loop body
LE: loop exit
PB: predicated region body
PF: predicated region fallthrough
CT: control target
= control target key end

     0   :  { %s28_s0 = inlined_call_operand.vmem [shape: f32[8], index: 0, kind: input, shape index: {}]   ;;  %s29_s1 = inlined_call_operand.vmem [shape: f32[16,8], index: 1, kind: output, shape index: {}]  }
   0x1   :  { %v4_v0 = vld [vmem:[%s28_s0] ss:$0 sm:$0xff] }
   0x2   :  { %5 = vst [vmem:[%s29_s1] sm:$0xff] %v4_v0  ;;  %8 = vst [vmem:[%s29_s1 + $0x8] sm:$0xff] %v4_v0 }

// kernel: tile.7
= control target key start
LH: loop header
LB: loop body
LE: loop exit
PB: predicated region body
PF: predicated region fallthrough
CT: control target
= control target key end

     0   :  { %s131_s10 = smov 120   ;;  %s132_s11 = smov 104   ;;  %vm3_vm0 = vcmask 64512   ;;  %vm9_vm1 = vcmask 1048512   ;;  %vm15_vm2 = vcmask 982912   ;;  %vm21_vm3 = vcmask 917312   ;;  %s207_s0 = inlined_call_operand.vmem [shape: f32[16,8], index: 0, kind: input, shape index: {}]   ;;  %s208_s1 = inlined_call_operand.vmem [shape: f32[1,128], index: 1, kind: output, shape index: {}]  }
   0x1   :  { %v101_v0 = vld [vmem:[%s207_s0 + $0xf] sm:$0x1]   ;;  %v103_v1 = vld [vmem:[%s207_s0 + $0xd] sm:$0x1]   ;;  %v102_v2 = vld [vmem:[%s207_s0 + $0xe] sm:$0x1]  }
   0x2   :  { %7 = vrot.lane.b32.xlu0 %v101_v0, %s131_s10  ;;  %19 = vrot.lane.b32.xlu1 %v103_v1, %s132_s11  ;;  %v104_v3 = vld [vmem:[%s207_s0 + $0xc] sm:$0x1]   ;;  %s133_s16 = smov 112   ;;  %s134_s17 = smov 96   ;;  %v105_v4 = vld [vmem:[%s207_s0 + $0xb] sm:$0x1]  }
   0x3   :  { %v106_v5 = vld [vmem:[%s207_s0 + $0xa] sm:$0x1]   ;;  %v2_v6 = vld [vmem:[%s207_s0] sm:$0x1]   ;;  %s135_s24 = smov 88   ;;  %s136_s25 = smov 80  }
   0x4   :  { %4 = vst.msk [vmem:[#allocation0] sm:$0x1] %vm3_vm0, %v2_v6   ;;  %v107_v7 = vld [vmem:[%s207_s0 + $0x9] sm:$0x1]   ;;  %v108_v8 = vld [vmem:[%s207_s0 + $0x8] sm:$0x1]  }
   0x5   :  { %s137_s30 = smov 72   ;;  %s138_s2 = smov 64   ;;  %v109_v9 = vld [vmem:[%s207_s0 + $0x7] sm:$0x1]   ;;  %v110_v10 = vld [vmem:[%s207_s0 + $0x6] sm:$0x1]  }
   0x6   :  { %13 = vrot.lane.b32.xlu0 %v102_v2, %s133_s16  ;;  %25 = vrot.lane.b32.xlu1 %v104_v3, %s134_s17  ;;  %s139_s7 = smov 56   ;;  %s140_s8 = smov 48   ;;  %v111_v11 = vld [vmem:[%s207_s0 + $0x5] sm:$0x1]   ;;  %v112_v12 = vld [vmem:[%s207_s0 + $0x4] sm:$0x1]  }
   0x7   :  { %s141_s13 = smov 40   ;;  %s142_s14 = smov 32   ;;  %v113_v13 = vld [vmem:[%s207_s0 + $0x3] sm:$0x1]   ;;  %v114_v14 = vld [vmem:[%s207_s0 + $0x2] sm:$0x1]  }
   0x8   :  { %s143_s19 = smov 24   ;;  %s144_s20 = smov 16   ;;  %v115_v15 = vld [vmem:[%s207_s0 + $0x1] sm:$0x1]   ;;  %vm27_vm4 = vcmask 851712   ;;  %vm33_vm5 = vcmask 786112  }
   0x9   :  { %s145_s0 = smov 8   ;;  %vm39_vm6 = vcmask 720512   ;;  %vm45_vm7 = vcmask 654912   ;;  %vm51_vm8 = vcmask 589312   ;;  %vm57_vm9 = vcmask 523712  }
   0xa   :  { %31 = vrot.lane.b32.xlu0 %v105_v4, %s135_s24  ;;  %37 = vrot.lane.b32.xlu1 %v106_v5, %s136_s25  ;;  %vm63_vm10 = vcmask 458112   ;;  %vm69_vm11 = vcmask 392512   ;;  %vm75_vm12 = vcmask 326912   ;;  %vm81_vm13 = vcmask 261312  }
   0xb   :  { %vm87_vm14 = vcmask 195712   ;;  %vm93_vm15 = vcmask 130112  }
   0xe   :  { %43 = vrot.lane.b32.xlu0 %v107_v7, %s137_s30  ;;  %49 = vrot.lane.b32.xlu1 %v108_v8, %s138_s2 }
  0x12   :  { %55 = vrot.lane.b32.xlu0 %v109_v9, %s139_s7  ;;  %61 = vrot.lane.b32.xlu1 %v110_v10, %s140_s8 }
  0x16   :  { %67 = vrot.lane.b32.xlu0 %v111_v11, %s141_s13  ;;  %73 = vrot.lane.b32.xlu1 %v112_v12, %s142_s14 }
  0x1a   :  { %79 = vrot.lane.b32.xlu0 %v113_v13, %s143_s19  ;;  %85 = vrot.lane.b32.xlu1 %v114_v14, %s144_s20 }
  0x1e   :  { %91 = vrot.lane.b32.xlu0 %v115_v15, %s145_s0 }
  0x74   :  { %v8_v16 = vpop.permute.xlu0 %7   ;;  %v20_v17 = vpop.permute.xlu1 %19  }
  0x75   :  { %10 = vst.msk [vmem:[#allocation0] sm:$0x1] %vm9_vm1, %v8_v16  }
  0x78   :  { %v14_v18 = vpop.permute.xlu0 %13   ;;  %v26_v19 = vpop.permute.xlu1 %25  }
  0x79   :  { %16 = vst.msk [vmem:[#allocation0] sm:$0x1] %vm15_vm2, %v14_v18  }
  0x7a   :  { %22 = vst.msk [vmem:[#allocation0] sm:$0x1] %vm21_vm3, %v20_v17  }
  0x7b   :  { %28 = vst.msk [vmem:[#allocation0] sm:$0x1] %vm27_vm4, %v26_v19  }
  0x7c   :  { %v32_v20 = vpop.permute.xlu0 %31   ;;  %v38_v21 = vpop.permute.xlu1 %37  }
  0x7d   :  { %34 = vst.msk [vmem:[#allocation0] sm:$0x1] %vm33_vm5, %v32_v20  }
  0x7e   :  { %40 = vst.msk [vmem:[#allocation0] sm:$0x1] %vm39_vm6, %v38_v21  }
  0x80   :  { %v44_v22 = vpop.permute.xlu0 %43   ;;  %v50_v23 = vpop.permute.xlu1 %49  }
  0x81   :  { %46 = vst.msk [vmem:[#allocation0] sm:$0x1] %vm45_vm7, %v44_v22  }
  0x82   :  { %52 = vst.msk [vmem:[#allocation0] sm:$0x1] %vm51_vm8, %v50_v23  }
  0x84   :  { %v56_v24 = vpop.permute.xlu0 %55   ;;  %v62_v25 = vpop.permute.xlu1 %61  }
  0x85   :  { %58 = vst.msk [vmem:[#allocation0] sm:$0x1] %vm57_vm9, %v56_v24  }
  0x86   :  { %64 = vst.msk [vmem:[#allocation0] sm:$0x1] %vm63_vm10, %v62_v25  }
  0x88   :  { %v68_v26 = vpop.permute.xlu0 %67   ;;  %v74_v27 = vpop.permute.xlu1 %73  }
  0x89   :  { %70 = vst.msk [vmem:[#allocation0] sm:$0x1] %vm69_vm11, %v68_v26  }
  0x8a   :  { %76 = vst.msk [vmem:[#allocation0] sm:$0x1] %vm75_vm12, %v74_v27  }
  0x8c   :  { %v80_v28 = vpop.permute.xlu0 %79   ;;  %v86_v29 = vpop.permute.xlu1 %85  }
  0x8d   :  { %82 = vst.msk [vmem:[#allocation0] sm:$0x1] %vm81_vm13, %v80_v28  }
  0x8e   :  { %88 = vst.msk [vmem:[#allocation0] sm:$0x1] %vm87_vm14, %v86_v29  }
  0x90   :  { %v92_v30 = vpop.permute.xlu0 %91  }
  0x91   :  { %94 = vst.msk [vmem:[#allocation0] sm:$0x1] %vm93_vm15, %v92_v30  }
  0x98   :  { %v98_v31 = vld [vmem:[#allocation0] sm:$0x1] }
  0x99   :  { %100 = vst [vmem:[%s208_s1] sm:$0x1] %v98_v31 }

// kernel: squeeze.4
= control target key start
LH: loop header
LB: loop body
LE: loop exit
PB: predicated region body
PF: predicated region fallthrough
CT: control target
= control target key end

     0   :  { %s130_s8 = smov 104   ;;  %s131_s9 = smov 112   ;;  %vm7_vm0 = vcmask 64512   ;;  %s221_s0 = inlined_call_operand.vmem [shape: f32[128], index: 0, kind: input, shape index: {}]   ;;  %s222_s1 = inlined_call_operand.vmem [shape: f32[16,8], index: 1, kind: output, shape index: {}]  }
   0x1   :  { %v4_v0 = vld [vmem:[%s221_s0] sm:$0x1]  ;;  %s129_s0 = smov 120   ;;  %s132_s10 = smov 96  }
   0x2   :  { %5 = vst [vmem:[#allocation0] sm:$0x1] %v4_v0  ;;  %s133_s11 = smov 88   ;;  %s134_s12 = smov 80  }
   0x3   :  { %s135_s13 = smov 72   ;;  %s136_s14 = smov 64  }
   0x4   :  { %s137_s17 = smov 56   ;;  %s138_s18 = smov 48  }
   0x5   :  { %s139_s19 = smov 40   ;;  %s140_s20 = smov 32  }
   0x6   :  { %s141_s21 = smov 24   ;;  %s142_s22 = smov 16  }
   0x7   :  { %s143_s23 = smov 8  }
   0x9   :  { %v9_v1 = vld [vmem:[#allocation0] sm:$0x1]  }
   0xa   :  { %v21_v2 = vld [vmem:[#allocation0] sm:$0x1]   ;;  %10 = vrot.lane.b32.xlu0 %v9_v1, %s129_s0 }
   0xb   :  { %22 = vrot.lane.b32.xlu1 %v21_v2, %s130_s8  ;;  %v15_v3 = vld [vmem:[#allocation0] sm:$0x1]  }
   0xc   :  { %v27_v4 = vld [vmem:[#allocation0] sm:$0x1]  }
   0xd   :  { %v33_v5 = vld [vmem:[#allocation0] sm:$0x1]  }
   0xe   :  { %16 = vrot.lane.b32.xlu0 %v15_v3, %s131_s9  ;;  %v39_v6 = vld [vmem:[#allocation0] sm:$0x1]  }
   0xf   :  { %28 = vrot.lane.b32.xlu1 %v27_v4, %s132_s10  ;;  %v45_v7 = vld [vmem:[#allocation0] sm:$0x1]  }
  0x10   :  { %v51_v8 = vld [vmem:[#allocation0] sm:$0x1]  }
  0x11   :  { %v57_v9 = vld [vmem:[#allocation0] sm:$0x1]  }
  0x12   :  { %34 = vrot.lane.b32.xlu0 %v33_v5, %s133_s11  ;;  %v63_v10 = vld [vmem:[#allocation0] sm:$0x1]  }
  0x13   :  { %40 = vrot.lane.b32.xlu1 %v39_v6, %s134_s12  ;;  %v6_v11 = vld [vmem:[#allocation0] sm:$0x1]  }
  0x14   :  { %8 = vst.msk [vmem:[%s222_s1] sm:$0x1] %vm7_vm0, %v6_v11   ;;  %v69_v12 = vld [vmem:[#allocation0] sm:$0x1]  }
  0x15   :  { %v75_v13 = vld [vmem:[#allocation0] sm:$0x1]  }
  0x16   :  { %46 = vrot.lane.b32.xlu0 %v45_v7, %s135_s13  ;;  %v81_v14 = vld [vmem:[#allocation0] sm:$0x1]  }
  0x17   :  { %52 = vrot.lane.b32.xlu1 %v51_v8, %s136_s14  ;;  %v87_v15 = vld [vmem:[#allocation0] sm:$0x1]  }
  0x18   :  { %v93_v16 = vld [vmem:[#allocation0] sm:$0x1]  }
  0x1a   :  { %58 = vrot.lane.b32.xlu0 %v57_v9, %s137_s17 }
  0x1b   :  { %64 = vrot.lane.b32.xlu1 %v63_v10, %s138_s18 }
  0x1e   :  { %70 = vrot.lane.b32.xlu0 %v69_v12, %s139_s19 }
  0x1f   :  { %76 = vrot.lane.b32.xlu1 %v75_v13, %s140_s20 }
  0x22   :  { %82 = vrot.lane.b32.xlu0 %v81_v14, %s141_s21 }
  0x23   :  { %88 = vrot.lane.b32.xlu1 %v87_v15, %s142_s22 }
  0x26   :  { %94 = vrot.lane.b32.xlu0 %v93_v16, %s143_s23 }
  0x7c   :  { %v11_v17 = vpop.permute.xlu0 %10  }
  0x7d   :  { %v23_v18 = vpop.permute.xlu1 %22   ;;  %99 = vst.msk [vmem:[%s222_s1 + $0x1] sm:$0x1] %vm7_vm0, %v11_v17  }
  0x7e   :  { %101 = vst.msk [vmem:[%s222_s1 + $0x3] sm:$0x1] %vm7_vm0, %v23_v18  }
  0x80   :  { %v17_v19 = vpop.permute.xlu0 %16  }
  0x81   :  { %v29_v20 = vpop.permute.xlu1 %28   ;;  %100 = vst.msk [vmem:[%s222_s1 + $0x2] sm:$0x1] %vm7_vm0, %v17_v19  }
  0x82   :  { %102 = vst.msk [vmem:[%s222_s1 + $0x4] sm:$0x1] %vm7_vm0, %v29_v20  }
  0x84   :  { %v35_v21 = vpop.permute.xlu0 %34  }
  0x85   :  { %v41_v22 = vpop.permute.xlu1 %40   ;;  %103 = vst.msk [vmem:[%s222_s1 + $0x5] sm:$0x1] %vm7_vm0, %v35_v21  }
  0x86   :  { %104 = vst.msk [vmem:[%s222_s1 + $0x6] sm:$0x1] %vm7_vm0, %v41_v22  }
  0x88   :  { %v47_v23 = vpop.permute.xlu0 %46  }
  0x89   :  { %v53_v24 = vpop.permute.xlu1 %52   ;;  %105 = vst.msk [vmem:[%s222_s1 + $0x7] sm:$0x1] %vm7_vm0, %v47_v23  }
  0x8a   :  { %106 = vst.msk [vmem:[%s222_s1 + $0x8] sm:$0x1] %vm7_vm0, %v53_v24  }
  0x8c   :  { %v59_v25 = vpop.permute.xlu0 %58  }
  0x8d   :  { %v65_v26 = vpop.permute.xlu1 %64   ;;  %107 = vst.msk [vmem:[%s222_s1 + $0x9] sm:$0x1] %vm7_vm0, %v59_v25  }
  0x8e   :  { %108 = vst.msk [vmem:[%s222_s1 + $0xa] sm:$0x1] %vm7_vm0, %v65_v26  }
  0x90   :  { %v71_v27 = vpop.permute.xlu0 %70  }
  0x91   :  { %v77_v28 = vpop.permute.xlu1 %76   ;;  %109 = vst.msk [vmem:[%s222_s1 + $0xb] sm:$0x1] %vm7_vm0, %v71_v27  }
  0x92   :  { %110 = vst.msk [vmem:[%s222_s1 + $0xc] sm:$0x1] %vm7_vm0, %v77_v28  }
  0x94   :  { %v83_v29 = vpop.permute.xlu0 %82  }
  0x95   :  { %v89_v30 = vpop.permute.xlu1 %88   ;;  %111 = vst.msk [vmem:[%s222_s1 + $0xd] sm:$0x1] %vm7_vm0, %v83_v29  }
  0x96   :  { %112 = vst.msk [vmem:[%s222_s1 + $0xe] sm:$0x1] %vm7_vm0, %v89_v30  }
  0x98   :  { %v95_v31 = vpop.permute.xlu0 %94  }
  0x99   :  { %113 = vst.msk [vmem:[%s222_s1 + $0xf] sm:$0x1] %vm7_vm0, %v95_v31  }

// kernel: _lambda_.3
= control target key start
LH: loop header
LB: loop body
LE: loop exit
PB: predicated region body
PF: predicated region fallthrough
CT: control target
= control target key end

     0   :  { %vm30_vm0 = vcmask 1043456   ;;  %v114_v0 = vmov 0.0   ;;  %vm115_vm1 = vmmov 0   ;;  %vm26_vm2 = vcmask 64512   ;;  %s159_s1 = inlined_call_operand.vmem [shape: bf16[8,128], index: 1, kind: input, shape index: {}]   ;;  %s160_s0 = inlined_call_operand.vmem [shape: bf16[2,8], index: 0, kind: input, shape index: {}]   ;;  %s161_s2 = inlined_call_operand.vmem [shape: f32[1,128], index: 2, kind: input, shape index: {}]   ;;  %s162_s3 = inlined_call_operand.vmem [shape: bf16[2,128], index: 3, kind: output, shape index: {0}]   ;;  %s163_s4 = inlined_call_operand.vmem [shape: f32[2,128], index: 4, kind: output, shape index: {1}]  }
   0x1   :  { %106 = vmatprep.subr.bf16.mxu0 %v114_v0  ;;  %v18_v1 = vld [vmem:[%s159_s1] sm:$0xf]  ;;  %108 = vmatprep.mubr.msk.bf16.mxu0 %vm115_vm1, %v114_v0  ;;  %vm76_vm3 = vcmask 1041408  }
   0x2   :  { %v32_v2 = vsel %vm30_vm0, %v18_v1, 0  ;;  %v17_v3 = vld [vmem:[%s160_s0] sm:$0x1] }
   0x3   :  { %107 = vmatpush3.bf16.msra.mxu0 %v32_v2  ;;  %v102_v4 = vld [vmem:[%s161_s2] ss:$0 sm:$0xff] }
   0x6   :  { %109 = vmatmul.mubr.msk.bf16.vlgmr.msra.gmra.mrb[0].mxu0 %vm26_vm2, %v17_v3 }
  0xd9   :  { %v68_v5 = vpop.f32.mrb[0].mxu0 }
  0xda   :  { %v69_v6 = vadd.f32 %v102_v4, %v68_v5  ;;  %v110_v7 = vpop.f32.mrb[1].mxu0 }
  0xdb   :  { %v71_v8 = vpop.f32.mrb[2].mxu0 }
  0xdc   :  { %v74_v9 = vpack.c.bf16 %v69_v6, %v69_v6  ;;  %v77_v10 = vsel %vm76_vm3, %v69_v6, 0.0  ;;  %v85_v11 = vmul.f32 %v69_v6, %v69_v6  ;;  %v111_v12 = vpop.f32.mrb[3].mxu0 }
  0xdd   :  { %v78_v13 = vrot.slane %v77_v10, 4 }
  0xde   :  { %75 = vst [vmem:[%s162_s3] sm:$0x1] %v74_v9  ;;  %v86_v14 = vsel %vm76_vm3, %v85_v11, 0.0 }
  0xdf   :  { %v79_v15 = vadd.f32 %v78_v13, %v77_v10  ;;  %v87_v16 = vrot.slane %v86_v14, 4 }
  0xe1   :  { %v80_v17 = vrot.slane %v79_v15, 2  ;;  %v88_v18 = vadd.f32 %v87_v16, %v86_v14 }
  0xe3   :  { %v81_v19 = vadd.f32 %v80_v17, %v79_v15  ;;  %v89_v20 = vrot.slane %v88_v18, 2 }
  0xe5   :  { %v82_v21 = vrot.slane %v81_v19, 1  ;;  %v90_v22 = vadd.f32 %v89_v20, %v88_v18 }
  0xe7   :  { %v83_v23 = vadd.f32 %v82_v21, %v81_v19  ;;  %v91_v24 = vrot.slane %v90_v22, 1 }
  0xe9   :  { %84 = vst [vmem:[%s163_s4] sm:$0x1] %v83_v23  ;;  %v92_v25 = vadd.f32 %v91_v24, %v90_v22 }
  0xeb   :  { %93 = vst [vmem:[%s163_s4 + $0x1] sm:$0x1] %v92_v25 }

// kernel: _lambda_.4
= control target key start
LH: loop header
LB: loop body
LE: loop exit
PB: predicated region body
PF: predicated region fallthrough
CT: control target
= control target key end

     0   :  { %vm23_vm0 = vcmask 59392   ;;  %v3103_v0 = vmov 0   ;;  %s3104_s15 = smov 16   ;;  %vm188_vm1 = vsmask.f32 2306  ;;  %s3106_s16 = smov 8   ;;  %s3933_s0 = inlined_call_operand.vmem [shape: bf16[2,4,4,8], index: 0, kind: input, shape index: {}]   ;;  %s3934_s1 = inlined_call_operand.vmem [shape: f32[1,1,1,8], index: 1, kind: input, shape index: {}]   ;;  %s3935_s2 = inlined_call_operand.vmem [shape: f32[1,1,1,8], index: 2, kind: input, shape index: {}]   ;;  %s3936_s3 = inlined_call_operand.vmem [shape: bf16[4,32,4], index: 3, kind: input, shape index: {}]   ;;  %s3937_s4 = inlined_call_operand.vmem [shape: f32[1,4], index: 4, kind: input, shape index: {}]   ;;  %s3938_s5 = inlined_call_operand.vmem [shape: bf16[2,4,16,4], index: 5, kind: output, shape index: {0}]   ;;  %s3939_s6 = inlined_call_operand.vmem [shape: f32[1,2,4], index: 6, kind: output, shape index: {1}]  }
   0x1   :  { %24 = vst.msk [vmem:[#allocation2] sm:$0x7] %vm23_vm0, %v3103_v0  ;;  %25 = vst.msk [vmem:[#allocation2 + $0x4] sm:$0x7] %vm23_vm0, %v3103_v0  ;;  %v37_v1 = vld [vmem:[%s3933_s0 + $0x2] sm:$0x3] }
   0x2   :  { %26 = vst.msk [vmem:[#allocation2 + $0x8] sm:$0x7] %vm23_vm0, %v3103_v0  ;;  %27 = vst.msk [vmem:[#allocation2 + $0xc] sm:$0x7] %vm23_vm0, %v3103_v0  ;;  %v2743_v2 = vld [vmem:[%s3934_s1] ss:$0 sm:$0xff]  ;;  %v45_v3 = vunpack.c.l.bf16 %v37_v1 }
   0x3   :  { %28 = vst.msk [vmem:[#allocation2 + $0x10] sm:$0x7] %vm23_vm0, %v3103_v0  ;;  %29 = vst.msk [vmem:[#allocation2 + $0x14] sm:$0x7] %vm23_vm0, %v3103_v0  ;;  %v2744_v4 = vld [vmem:[%s3935_s2] ss:$0 sm:$0xff] }
   0x4   :  { %30 = vst.msk [vmem:[#allocation2 + $0x18] sm:$0x7] %vm23_vm0, %v3103_v0  ;;  %31 = vst.msk [vmem:[#allocation2 + $0x1c] sm:$0x7] %vm23_vm0, %v3103_v0  ;;  %v36_v5 = vld [vmem:[%s3933_s0] sm:$0x3]  ;;  %v60_v12 = vmul.f32 %v2743_v2, %v45_v3 }
   0x5   :  { %32 = vst.msk [vmem:[#allocation2 + $0x20] sm:$0x7] %vm23_vm0, %v3103_v0  ;;  %33 = vst.msk [vmem:[#allocation2 + $0x24] sm:$0x7] %vm23_vm0, %v3103_v0  ;;  %v41_v6 = vld [vmem:[%s3933_s0 + $0xa] sm:$0x3]  ;;  %v44_v7 = vunpack.c.l.bf16 %v36_v5 }
   0x6   :  { %34 = vst.msk [vmem:[#allocation2 + $0x28] sm:$0x7] %vm23_vm0, %v3103_v0  ;;  %35 = vst.msk [vmem:[#allocation2 + $0x2c] sm:$0x7] %vm23_vm0, %v3103_v0  ;;  %v49_v8 = vunpack.c.l.bf16 %v41_v6  ;;  %v38_v9 = vld [vmem:[%s3933_s0 + $0x4] sm:$0x3]  ;;  %v75_v22 = vadd.f32 %v2744_v4, %v60_v12 }
   0x7   :  { %v40_v10 = vld [vmem:[%s3933_s0 + $0x8] sm:$0x3]  ;;  %v42_v11 = vld [vmem:[%s3933_s0 + $0xc] sm:$0x3]  ;;  %v46_v13 = vunpack.c.l.bf16 %v38_v9  ;;  %v39_v16 = vld [vmem:[%s3933_s0 + $0x6] sm:$0x3]  ;;  %v59_v18 = vmul.f32 %v2743_v2, %v44_v7 }
   0x8   :  { %v48_v14 = vunpack.c.l.bf16 %v40_v10  ;;  %v50_v15 = vunpack.c.l.bf16 %v42_v11  ;;  %v43_v17 = vld [vmem:[%s3933_s0 + $0xe] sm:$0x3]  ;;  %v64_v19 = vmul.f32 %v2743_v2, %v49_v8  ;;  %v47_v20 = vunpack.c.l.bf16 %v39_v16  ;;  %v2999_v30 = vld [vmem:[#allocation2] ss:$0 sps:$4 sm:$0x77]   ;;  %vm3189_vm2 = vmand %vm23_vm0, %vm188_vm1  ;;  %s3105_s0 = smov 24  }
   0x9   :  { %v51_v21 = vunpack.c.l.bf16 %v43_v17  ;;  %v61_v23 = vmul.f32 %v2743_v2, %v46_v13  ;;  %v74_v26 = vadd.f32 %v2744_v4, %v59_v18  ;;  %v83_v31 = vmax.f32 %v75_v22, 0.0  ;;  %367 = vrot.lane.b32.xlu0 %v2999_v30, %s3104_s15  ;;  %v3001_v35 = vld [vmem:[#allocation2] ss:$0 sps:$4 sm:$0x33]   ;;  %v193_v56 = vld [vmem:[#allocation2 + $0x8] sm:$0x7] }
   0xa   :  { %v63_v24 = vmul.f32 %v2743_v2, %v48_v14  ;;  %v65_v25 = vmul.f32 %v2743_v2, %v50_v15  ;;  %v79_v27 = vadd.f32 %v2744_v4, %v64_v19  ;;  %v62_v28 = vmul.f32 %v2743_v2, %v47_v20  ;;  %v190_v63 = vld [vmem:[#allocation2 + $0x4] sm:$0x7]  ;;  %v196_v8 = vld [vmem:[#allocation2 + $0xc] sm:$0x7] }
   0xb   :  { %v66_v29 = vmul.f32 %v2743_v2, %v51_v21  ;;  %v3000_v32 = vld [vmem:[#allocation2 + $0x18] ss:$0 sps:$4 sm:$0x77]   ;;  %v82_v33 = vmax.f32 %v74_v26, 0.0  ;;  %v76_v34 = vadd.f32 %v2744_v4, %v61_v23  ;;  %v2923_v36 = vpack.c.bf16 %v83_v31, %v83_v31  ;;  %v202_v22 = vld [vmem:[#allocation2 + $0x1c] sm:$0x7] }
   0xc   :  { %v87_v37 = vmax.f32 %v79_v27, 0.0  ;;  %v78_v38 = vadd.f32 %v2744_v4, %v63_v24  ;;  %v80_v39 = vadd.f32 %v2744_v4, %v65_v25  ;;  %v77_v41 = vadd.f32 %v2744_v4, %v62_v28  ;;  %v208_v23 = vld [vmem:[#allocation2 + $0x24] sm:$0x7] }
   0xd   :  { %v2922_v40 = vpack.c.bf16 %v82_v33, %v82_v33  ;;  %v81_v42 = vadd.f32 %v2744_v4, %v66_v29  ;;  %v408_v43 = vshrl.u32 %v3001_v35, 16  ;;  %v411_v44 = vshll.u32 %v3001_v35, 16  ;;  %375 = vrot.lane.b32.xlu0 %v3000_v32, %s3104_s15  ;;  %v205_v4 = vld [vmem:[#allocation2 + $0x20] sm:$0x7]  ;;  %v199_v33 = vld [vmem:[#allocation2 + $0x10] sm:$0x7] }
   0xe   :  { %v130_v45 = vshrl.u32 %v2923_v36, 16  ;;  %v133_v46 = vshll.u32 %v2923_v36, 16  ;;  %v2927_v49 = vpack.c.bf16 %v87_v37, %v87_v37  ;;  %v84_v50 = vmax.f32 %v76_v34, 0.0 }
   0xf   :  { %v123_v47 = vshrl.u32 %v2922_v40, 16  ;;  %v126_v48 = vshll.u32 %v2922_v40, 16  ;;  %v410_v51 = vrot.slane %v408_v43, 7  ;;  %v86_v53 = vmax.f32 %v78_v38, 0.0  ;;  %v211_v38 = vld [vmem:[#allocation2 + $0x28] sm:$0x7] }
  0x10   :  { %v132_v52 = vrot.slane %v130_v45, 7  ;;  %v88_v54 = vmax.f32 %v80_v39, 0.0  ;;  %v158_v58 = vshrl.u32 %v2927_v49, 16  ;;  %v161_v59 = vshll.u32 %v2927_v49, 16 }
  0x11   :  { %v125_v57 = vrot.slane %v123_v47, 7  ;;  %v2924_v60 = vpack.c.bf16 %v84_v50, %v84_v50  ;;  %v413_v61 = vor.u32 %v411_v44, %v410_v51  ;;  %v2926_v0 = vpack.c.bf16 %v86_v53, %v86_v53 }
  0x12   :  { %v135_v62 = vor.u32 %v133_v46, %v132_v52  ;;  %v2928_v1 = vpack.c.bf16 %v88_v54, %v88_v54  ;;  %v160_v3 = vrot.slane %v158_v58, 7  ;;  %v85_v18 = vmax.f32 %v77_v41, 0.0 }
  0x13   :  { %v128_v2 = vor.u32 %v126_v48, %v125_v57  ;;  %v137_v5 = vshrl.u32 %v2924_v60, 16  ;;  %v140_v6 = vshll.u32 %v2924_v60, 16  ;;  %463 = vrot.lane.b32.xlu0 %v413_v61, %s3105_s0  ;;  %v151_v9 = vshrl.u32 %v2926_v0, 16 }
  0x14   :  { %v194_v7 = vsel %vm3189_vm2, %v135_v62, %v193_v56  ;;  %v154_v10 = vshll.u32 %v2926_v0, 16  ;;  %v165_v11 = vshrl.u32 %v2928_v1, 16  ;;  %v163_v13 = vor.u32 %v161_v59, %v160_v3  ;;  %v3017_v0 = vld [vmem:[#allocation2 + $0x18] ss:$0 sps:$4 sm:$0x33]  }
  0x15   :  { %195 = vst [vmem:[#allocation2 + $0x8] sm:$0x7] %v194_v7  ;;  %v191_v12 = vsel %vm3189_vm2, %v128_v2, %v190_v63  ;;  %v139_v14 = vrot.slane %v137_v5, 7  ;;  %v168_v15 = vshll.u32 %v2928_v1, 16  ;;  %v153_v16 = vrot.slane %v151_v9, 7 }
  0x16   :  { %192 = vst [vmem:[#allocation2 + $0x4] sm:$0x7] %v191_v12  ;;  %v167_v17 = vrot.slane %v165_v11, 7  ;;  %v89_v19 = vmax.f32 %v81_v42, 0.0  ;;  %v206_v20 = vsel %vm3189_vm2, %v163_v13, %v205_v4  ;;  %v2925_v26 = vpack.c.bf16 %v85_v18, %v85_v18 }
  0x17   :  { %v142_v21 = vor.u32 %v140_v6, %v139_v14  ;;  %207 = vst [vmem:[#allocation2 + $0x20] sm:$0x7] %v206_v20  ;;  %v156_v24 = vor.u32 %v154_v10, %v153_v16  ;;  %vm479_vm3 = vcmask 64512   ;;  %vm504_vm4 = vcmask 130048  }
  0x18   :  { %v170_v25 = vor.u32 %v168_v15, %v167_v17  ;;  %v2929_v27 = vpack.c.bf16 %v89_v19, %v89_v19  ;;  %v144_v31 = vshrl.u32 %v2925_v26, 16  ;;  %v147_v32 = vshll.u32 %v2925_v26, 16 }
  0x19   :  { %v197_v28 = vsel %vm3189_vm2, %v142_v21, %v196_v8  ;;  %v203_v29 = vsel %vm3189_vm2, %v156_v24, %v202_v22  ;;  %v436_v19 = vshrl.u32 %v3017_v0, 16  ;;  %vm521_vm5 = vcmask 195584  }
  0x1a   :  { %198 = vst [vmem:[#allocation2 + $0xc] sm:$0x7] %v197_v28  ;;  %v209_v30 = vsel %vm3189_vm2, %v170_v25, %v208_v23  ;;  %204 = vst [vmem:[#allocation2 + $0x1c] sm:$0x7] %v203_v29  ;;  %v172_v34 = vshrl.u32 %v2929_v27, 16  ;;  %v175_v35 = vshll.u32 %v2929_v27, 16 }
  0x1b   :  { %210 = vst [vmem:[#allocation2 + $0x24] sm:$0x7] %v209_v30  ;;  %v146_v37 = vrot.slane %v144_v31, 7  ;;  %v439_v29 = vshll.u32 %v3017_v0, 16  ;;  %v438_v30 = vrot.slane %v436_v19, 7  ;;  %vm785_vm13 = vcmask 261120  }
  0x1c   :  { %v3002_v36 = vld [vmem:[#allocation2 + $0x8] ss:$0 sps:$4 sm:$0x77]   ;;  %v174_v40 = vrot.slane %v172_v34, 7  ;;  %vm610_vm6 = vsmask.f32 1280 }
  0x1d   :  { %v3003_v39 = vld [vmem:[#allocation2 + $0x4] ss:$0 sps:$4 sm:$0x77]   ;;  %371 = vrot.lane.b32.xlu0 %v3002_v36, %s3104_s15  ;;  %v149_v42 = vor.u32 %v147_v32, %v146_v37  ;;  %v3009_v53 = vld [vmem:[#allocation2 + $0x8] ss:$0 sps:$4 sm:$0x33]  }
  0x1e   :  { %v3007_v41 = vld [vmem:[#allocation2 + $0x4] ss:$0 sps:$4 sm:$0x33]   ;;  %369 = vrot.lane.b32.xlu1 %v3003_v39, %s3104_s15  ;;  %v3004_v43 = vld [vmem:[#allocation2 + $0x20] ss:$0 sps:$4 sm:$0x77]   ;;  %v177_v44 = vor.u32 %v175_v35, %v174_v40 }
  0x1f   :  { %v272_v45 = vshrl.u32 %v3007_v41, 16  ;;  %v275_v46 = vshll.u32 %v3007_v41, 16  ;;  %v200_v47 = vsel %vm3189_vm2, %v149_v42, %v199_v33  ;;  %v279_v57 = vshrl.u32 %v3009_v53, 16  ;;  %v3014_v9 = vld [vmem:[#allocation2 + $0x20] ss:$0 sps:$4 sm:$0x33]  }
  0x20   :  { %201 = vst [vmem:[#allocation2 + $0x10] sm:$0x7] %v200_v47  ;;  %v212_v49 = vsel %vm3189_vm2, %v177_v44, %v211_v38  ;;  %v282_v58 = vshll.u32 %v3009_v53, 16  ;;  %v3015_v13 = vld [vmem:[#allocation2 + $0x8] ss:$0 sps:$4 sm:$0x33]  }
  0x21   :  { %v3005_v48 = vld [vmem:[#allocation2 + $0xc] ss:$0 sps:$4 sm:$0x77]   ;;  %379 = vrot.lane.b32.xlu0 %v3004_v43, %s3104_s15  ;;  %v274_v50 = vrot.slane %v272_v45, 7  ;;  %213 = vst [vmem:[#allocation2 + $0x28] sm:$0x7] %v212_v49  ;;  %v441_v45 = vor.u32 %v439_v29, %v438_v30 }
  0x22   :  { %373 = vrot.lane.b32.xlu1 %v3005_v48, %s3104_s15  ;;  %v3006_v51 = vld [vmem:[#allocation2 + $0x1c] ss:$0 sps:$4 sm:$0x77]   ;;  %v3008_v54 = vld [vmem:[#allocation2 + $0x24] ss:$0 sps:$4 sm:$0x77]  }
  0x23   :  { %v277_v52 = vor.u32 %v275_v46, %v274_v50  ;;  %v3010_v56 = vld [vmem:[#allocation2 + $0xc] ss:$0 sps:$4 sm:$0x33]   ;;  %v3011_v59 = vld [vmem:[#allocation2 + $0x1c] ss:$0 sps:$4 sm:$0x33]  }
  0x24   :  { %v286_v55 = vshrl.u32 %v3010_v56, 16  ;;  %v289_v60 = vshll.u32 %v3010_v56, 16  ;;  %v281_v61 = vrot.slane %v279_v57, 7  ;;  %v300_v62 = vshrl.u32 %v3011_v59, 16 }
  0x25   :  { %327 = vrot.lane.b32.xlu0 %v277_v52, %s3106_s16  ;;  %v303_v63 = vshll.u32 %v3011_v59, 16  ;;  %v3013_v5 = vld [vmem:[#allocation2 + $0x24] ss:$0 sps:$4 sm:$0x33]   ;;  %v307_v15 = vshrl.u32 %v3014_v9, 16  ;;  %v422_v18 = vshrl.u32 %v3015_v13, 16 }
  0x26   :  { %377 = vrot.lane.b32.xlu1 %v3006_v51, %s3104_s15  ;;  %v288_v1 = vrot.slane %v286_v55, 7  ;;  %v284_v3 = vor.u32 %v282_v58, %v281_v61  ;;  %v302_v4 = vrot.slane %v300_v62, 7  ;;  %v314_v11 = vshrl.u32 %v3013_v5, 16  ;;  %v3018_v20 = vld [vmem:[#allocation2 + $0x4] ss:$0 sps:$4 sm:$0x33]  }
  0x27   :  { %v3012_v2 = vld [vmem:[#allocation2 + $0x10] ss:$0 sps:$4 sm:$0x33]   ;;  %v317_v12 = vshll.u32 %v3013_v5, 16  ;;  %v309_v22 = vrot.slane %v307_v15, 7  ;;  %v310_v23 = vshll.u32 %v3014_v9, 16 }
  0x28   :  { %v291_v6 = vor.u32 %v289_v60, %v288_v1  ;;  %v293_v7 = vshrl.u32 %v3012_v2, 16  ;;  %v296_v8 = vshll.u32 %v3012_v2, 16  ;;  %v305_v10 = vor.u32 %v303_v63, %v302_v4  ;;  %v3016_v16 = vld [vmem:[#allocation2 + $0x28] ss:$0 sps:$4 sm:$0x33]  }
  0x29   :  { %329 = vrot.lane.b32.xlu0 %v284_v3, %s3106_s16  ;;  %v316_v17 = vrot.slane %v314_v11, 7  ;;  %v321_v24 = vshrl.u32 %v3016_v16, 16  ;;  %v424_v26 = vrot.slane %v422_v18, 7  ;;  %v425_v27 = vshll.u32 %v3015_v13, 16 }
  0x2a   :  { %381 = vrot.lane.b32.xlu1 %v3008_v54, %s3104_s15  ;;  %v295_v14 = vrot.slane %v293_v7, 7  ;;  %v3019_v28 = vld [vmem:[#allocation2 + $0x20] ss:$0 sps:$4 sm:$0x33]   ;;  %v312_v32 = vor.u32 %v310_v23, %v309_v22  ;;  %v324_v34 = vshll.u32 %v3016_v16, 16  ;;  %v415_v35 = vshrl.u32 %v3018_v20, 16 }
  0x2b   :  { %v319_v25 = vor.u32 %v317_v12, %v316_v17  ;;  %v3020_v31 = vld [vmem:[#allocation2 + $0xc] ss:$0 sps:$4 sm:$0x33]   ;;  %v323_v33 = vrot.slane %v321_v24, 7  ;;  %v427_v36 = vor.u32 %v425_v27, %v424_v26  ;;  %v450_v37 = vshrl.u32 %v3019_v28, 16 }
  0x2c   :  { %v298_v21 = vor.u32 %v296_v8, %v295_v14  ;;  %v3021_v38 = vld [vmem:[#allocation2 + $0x4] ss:$0 sps:$4 sm:$0x77]   ;;  %v418_v39 = vshll.u32 %v3018_v20, 16  ;;  %v429_v40 = vshrl.u32 %v3020_v31, 16  ;;  %v417_v43 = vrot.slane %v415_v35, 7 }
  0x2d   :  { %335 = vrot.lane.b32.xlu0 %v305_v10, %s3106_s16  ;;  %v3022_v41 = vld [vmem:[#allocation2 + $0x1c] ss:$0 sps:$4 sm:$0x33]   ;;  %v326_v42 = vor.u32 %v324_v34, %v323_v33  ;;  %v3023_v44 = vld [vmem:[#allocation2 + $0xc] ss:$0 sps:$4 sm:$0x77]  }
  0x2e   :  { %331 = vrot.lane.b32.xlu1 %v291_v6, %s3106_s16  ;;  %v452_v46 = vrot.slane %v450_v37, 7  ;;  %v453_v47 = vshll.u32 %v3019_v28, 16  ;;  %v952_v48 = vshrl.u32 %v3021_v38, 16  ;;  %v431_v49 = vrot.slane %v429_v40, 7  ;;  %v3088_v28 = vld [vmem:[%s3936_s3] sm:$0xff]  }
  0x2f   :  { %v432_v50 = vshll.u32 %v3020_v31, 16  ;;  %v443_v51 = vshrl.u32 %v3022_v41, 16  ;;  %v420_v52 = vor.u32 %v418_v39, %v417_v43  ;;  %v966_v53 = vshrl.u32 %v3023_v44, 16  ;;  %v3024_v54 = vld [vmem:[#allocation2 + $0x24] ss:$0 sps:$4 sm:$0x33]   ;;  %2962 = vmatprep.subr.bf16.mxu0 %v3088_v28 }
  0x30   :  { %v455_v56 = vor.u32 %v453_v47, %v452_v46  ;;  %v954_v57 = vrot.slane %v952_v48, 7  ;;  %v955_v58 = vshll.u32 %v3021_v38, 16  ;;  %v3025_v59 = vld [vmem:[#allocation2 + $0x1c] ss:$0 sps:$4 sm:$0x77]   ;;  %v446_v60 = vshll.u32 %v3022_v41, 16  ;;  %2963 = vmatpush3.bf16.msra.mxu0 %v3088_v28 }
  0x31   :  { %339 = vrot.lane.b32.xlu0 %v319_v25, %s3106_s16  ;;  %v445_v55 = vrot.slane %v443_v51, 7  ;;  %v434_v61 = vor.u32 %v432_v50, %v431_v49  ;;  %v968_v62 = vrot.slane %v966_v53, 7  ;;  %v969_v63 = vshll.u32 %v3023_v44, 16  ;;  %v3026_v1 = vld [vmem:[#allocation2 + $0x8] ss:$0 sps:$4 sm:$0x77]  }
  0x32   :  { %333 = vrot.lane.b32.xlu1 %v298_v21, %s3106_s16  ;;  %v457_v0 = vshrl.u32 %v3024_v54, 16  ;;  %v957_v2 = vor.u32 %v955_v58, %v954_v57  ;;  %v980_v3 = vshrl.u32 %v3025_v59, 16  ;;  %v3027_v4 = vld [vmem:[#allocation2 + $0x24] ss:$0 sps:$4 sm:$0x77]   ;;  %v460_v8 = vshll.u32 %v3024_v54, 16 }
  0x33   :  { %v3028_v5 = vld [vmem:[#allocation2 + $0x10] ss:$0 sps:$4 sm:$0x77]   ;;  %v448_v6 = vor.u32 %v446_v60, %v445_v55  ;;  %v959_v9 = vshrl.u32 %v3026_v1, 16  ;;  %v971_v10 = vor.u32 %v969_v63, %v968_v62  ;;  %v983_v12 = vshll.u32 %v3025_v59, 16 }
  0x34   :  { %v459_v7 = vrot.slane %v457_v0, 7  ;;  %v982_v11 = vrot.slane %v980_v3, 7  ;;  %v994_v13 = vshrl.u32 %v3027_v4, 16  ;;  %v962_v14 = vshll.u32 %v3026_v1, 16 }
  0x35   :  { %467 = vrot.lane.b32.xlu0 %v427_v36, %s3105_s0  ;;  %v973_v15 = vshrl.u32 %v3028_v5, 16  ;;  %v961_v17 = vrot.slane %v959_v9, 7  ;;  %v3030_v18 = vld [vmem:[#allocation2 + $0x20] ss:$0 sps:$4 sm:$0x77]   ;;  %v997_v21 = vshll.u32 %v3027_v4, 16 }
  0x36   :  { %337 = vrot.lane.b32.xlu1 %v312_v32, %s3106_s16  ;;  %v462_v16 = vor.u32 %v460_v8, %v459_v7  ;;  %v985_v19 = vor.u32 %v983_v12, %v982_v11  ;;  %v996_v20 = vrot.slane %v994_v13, 7  ;;  %v976_v23 = vshll.u32 %v3028_v5, 16  ;;  %v3032_v26 = vld [vmem:[#allocation2 + $0x28] ss:$0 sps:$4 sm:$0x77]  }
  0x37   :  { %v975_v22 = vrot.slane %v973_v15, 7  ;;  %v964_v24 = vor.u32 %v962_v14, %v961_v17  ;;  %v987_v25 = vshrl.u32 %v3030_v18, 16  ;;  %v990_v31 = vshll.u32 %v3030_v18, 16  ;;  %v3029_v33 = vld [vmem:[#allocation2] ss:$0 sps:$4 sm:$0x66]  }
  0x38   :  { %v999_v27 = vor.u32 %v997_v21, %v996_v20  ;;  %v1001_v32 = vshrl.u32 %v3032_v26, 16  ;;  %v3037_v34 = vld [vmem:[#allocation2] ss:$0 sps:$4 sm:$0x77]   ;;  %v1004_v37 = vshll.u32 %v3032_v26, 16  ;;  %vm1287_vm14 = vcmask 1040384  }
  0x39   :  { %471 = vrot.lane.b32.xlu0 %v441_v45, %s3105_s0  ;;  %v978_v29 = vor.u32 %v976_v23, %v975_v22  ;;  %v989_v30 = vrot.slane %v987_v25, 7  ;;  %v3031_v38 = vld [vmem:[#allocation2 + $0x8] ss:$0 sps:$4 sm:$0x66]   ;;  %v1088_v39 = vshrl.u32 %v3037_v34, 16  ;;  %v1091_v48 = vshll.u32 %v3037_v34, 16 }
  0x3a   :  { %341 = vrot.lane.b32.xlu1 %v326_v42, %s3106_s16  ;;  %v1003_v36 = vrot.slane %v1001_v32, 7  ;;  %v3039_v41 = vld [vmem:[#allocation2 + $0x8] ss:$0 sps:$4 sm:$0x77]   ;;  %vm611_vm7 = vsmask.f32 3336 }
  0x3b   :  { %v992_v35 = vor.u32 %v990_v31, %v989_v30  ;;  %v3033_v42 = vld [vmem:[#allocation2 + $0x18] ss:$0 sps:$4 sm:$0x66]   ;;  %v3034_v43 = vld [vmem:[#allocation2 + $0x4] ss:$0 sps:$4 sm:$0x66]   ;;  %vm3419_vm10 = vmor %vm610_vm6, %vm611_vm7 }
  0x3c   :  { %v1006_v40 = vor.u32 %v1004_v37, %v1003_v36  ;;  %v1090_v44 = vrot.slane %v1088_v39, 7  ;;  %v3091_v45 = vld [vmem:[%s3936_s3 + $0x8] sm:$0xff]   ;;  %v3035_v46 = vld [vmem:[#allocation2 + $0x20] ss:$0 sps:$4 sm:$0x66]   ;;  %v1102_v47 = vshrl.u32 %v3039_v41, 16 }
  0x3d   :  { %475 = vrot.lane.b32.xlu0 %v455_v56, %s3105_s0  ;;  %v3041_v49 = vld [vmem:[#allocation2 + $0x8] ss:$0 sps:$4 sm:$0x33]   ;;  %2964 = vmatprep.subr.bf16.mxu0 %v3091_v45  ;;  %v3036_v50 = vld [vmem:[#allocation2 + $0xc] ss:$0 sps:$4 sm:$0x66]  }
  0x3e   :  { %465 = vrot.lane.b32.xlu1 %v420_v52, %s3105_s0  ;;  %2965 = vmatpush3.bf16.msra.mxu0 %v3091_v45  ;;  %v1105_v51 = vshll.u32 %v3039_v41, 16  ;;  %v1104_v52 = vrot.slane %v1102_v47, 7  ;;  %v3042_v53 = vld [vmem:[#allocation2 + $0x4] ss:$0 sps:$4 sm:$0x77]   ;;  %v1093_v54 = vor.u32 %v1091_v48, %v1090_v44  ;;  %v1543_v56 = vshrl.u32 %v3041_v49, 16 }
  0x3f   :  { %v3043_v57 = vld [vmem:[#allocation2 + $0x10] ss:$0 sps:$4 sm:$0x33]   ;;  %v3045_v58 = vld [vmem:[#allocation2 + $0x18] ss:$0 sps:$4 sm:$0x77]  }
  0x40   :  { %v3038_v59 = vld [vmem:[#allocation2 + $0x1c] ss:$0 sps:$4 sm:$0x66]   ;;  %v1095_v55 = vshrl.u32 %v3042_v53, 16  ;;  %v1545_v62 = vrot.slane %v1543_v56, 7  ;;  %v1546_v63 = vshll.u32 %v3041_v49, 16 }
  0x41   :  { %1007 = vrot.lane.b32.xlu0 %v957_v2, %s3106_s16  ;;  %v3044_v60 = vld [vmem:[#allocation2 + $0xc] ss:$0 sps:$4 sm:$0x77]   ;;  %v1557_v0 = vshrl.u32 %v3043_v57, 16  ;;  %v1098_v2 = vshll.u32 %v3042_v53, 16  ;;  %v1116_v3 = vshrl.u32 %v3045_v58, 16 }
  0x42   :  { %469 = vrot.lane.b32.xlu1 %v434_v61, %s3105_s0  ;;  %v1107_v61 = vor.u32 %v1105_v51, %v1104_v52  ;;  %v3040_v1 = vld [vmem:[#allocation2 + $0x24] ss:$0 sps:$4 sm:$0x66]   ;;  %v1097_v4 = vrot.slane %v1095_v55, 7  ;;  %v1560_v5 = vshll.u32 %v3043_v57, 16  ;;  %v1548_v8 = vor.u32 %v1546_v63, %v1545_v62 }
  0x43   :  { %v3046_v7 = vld [vmem:[#allocation2 + $0xc] ss:$0 sps:$4 sm:$0x33]   ;;  %v1559_v9 = vrot.slane %v1557_v0, 7  ;;  %v1112_v14 = vshll.u32 %v3044_v60, 16  ;;  %v1118_v17 = vrot.slane %v1116_v3, 7 }
  0x44   :  { %v3048_v11 = vld [vmem:[#allocation2 + $0x14] ss:$0 sps:$4 sm:$0x33]   ;;  %v1100_v12 = vor.u32 %v1098_v2, %v1097_v4  ;;  %v1550_v15 = vshrl.u32 %v3046_v7, 16  ;;  %v1119_v18 = vshll.u32 %v3045_v58, 16  ;;  %v1553_v25 = vshll.u32 %v3046_v7, 16 }
  0x45   :  { %1011 = vrot.lane.b32.xlu0 %v971_v10, %s3106_s16  ;;  %v3047_v10 = vld [vmem:[#allocation2 + $0x20] ss:$0 sps:$4 sm:$0x77]   ;;  %v1564_v21 = vshrl.u32 %v3048_v11, 16  ;;  %v1567_v31 = vshll.u32 %v3048_v11, 16  ;;  %vm1288_vm15 = vcmask 1042434  }
  0x46   :  { %473 = vrot.lane.b32.xlu1 %v448_v6, %s3105_s0  ;;  %v1109_v6 = vshrl.u32 %v3044_v60, 16  ;;  %v3049_v20 = vld [vmem:[#allocation2 + $0x20] ss:$0 sps:$4 sm:$0x33]   ;;  %v1121_v26 = vor.u32 %v1119_v18, %v1118_v17  ;;  %v1133_v28 = vshll.u32 %v3047_v10, 16  ;;  %v3097_v60 = vld [vmem:[%s3936_s3 + $0x10] sm:$0xff]   ;;  %v549_v18 = vlaneseq  ;;  %vm1289_vm0 = vmor %vm1287_vm14, %vm1288_vm15 }
  0x47   :  { %v3050_v22 = vld [vmem:[#allocation2 + $0x1c] ss:$0 sps:$4 sm:$0x77]   ;;  %v3051_v30 = vld [vmem:[#allocation2 + $0x28] ss:$0 sps:$4 sm:$0x33]   ;;  %2970 = vmatprep.subr.bf16.mxu1 %v3097_v60 }
  0x48   :  { %v1111_v13 = vrot.slane %v1109_v6, 7  ;;  %v3052_v32 = vld [vmem:[#allocation2 + $0x24] ss:$0 sps:$4 sm:$0x77]   ;;  %v1566_v34 = vrot.slane %v1564_v21, 7  ;;  %v1585_v39 = vshrl.u32 %v3051_v30, 16  ;;  %2971 = vmatpush3.bf16.msra.mxu1 %v3097_v60 }
  0x49   :  { %1015 = vrot.lane.b32.xlu0 %v985_v19, %s3106_s16  ;;  %v1130_v19 = vshrl.u32 %v3047_v10, 16  ;;  %v3054_v41 = vld [vmem:[#allocation2 + $0x24] ss:$0 sps:$4 sm:$0x33]   ;;  %v1137_v44 = vshrl.u32 %v3052_v32, 16  ;;  %v1588_v47 = vshll.u32 %v3051_v30, 16 }
  0x4a   :  { %477 = vrot.lane.b32.xlu1 %v462_v16, %s3105_s0  ;;  %v1562_v16 = vor.u32 %v1560_v5, %v1559_v9  ;;  %v1114_v23 = vor.u32 %v1112_v14, %v1111_v13  ;;  %v3056_v48 = vld [vmem:[#allocation2 + $0x2c] ss:$0 sps:$4 sm:$0x33]   ;;  %v1140_v51 = vshll.u32 %v3052_v32, 16  ;;  %v1578_v52 = vshrl.u32 %v3054_v41, 16 }
  0x4b   :  { %v1581_v58 = vshll.u32 %v3054_v41, 16  ;;  %v3053_v55 = vld [vmem:[#allocation2 + $0x4] ss:$0 sps:$4 sm:$0x77]   ;;  %vm613_vm8 = vsmask.f32 5392 }
  0x4c   :  { %v1580_v57 = vrot.slane %v1578_v52, 7  ;;  %v3061_v62 = vld [vmem:[#allocation2 + $0x4] ss:$0 sps:$4 sm:$0x33]   ;;  %vm615_vm9 = vsmask.f32 7448  ;;  %vm3442_vm11 = vmor %vm3419_vm10, %vm613_vm8 }
  0x4d   :  { %1019 = vrot.lane.b32.xlu0 %v999_v27, %s3106_s16  ;;  %v1132_v27 = vrot.slane %v1130_v19, 7  ;;  %v3055_v2 = vld [vmem:[#allocation2 + $0xc] ss:$0 sps:$4 sm:$0x77]   ;;  %v1679_v6 = vshrl.u32 %v3061_v62, 16  ;;  %vm3467_vm12 = vmor %vm3442_vm11, %vm615_vm9  ;;  %vm1290_vm1 = vcmask 1044484  }
  0x4e   :  { %1009 = vrot.lane.b32.xlu1 %v964_v24, %s3106_s16  ;;  %v1552_v24 = vrot.slane %v1550_v15, 7  ;;  %v1583_v63 = vor.u32 %v1581_v58, %v1580_v57  ;;  %v3057_v5 = vld [vmem:[#allocation2 + $0x1c] ss:$0 sps:$4 sm:$0x77]   ;;  %vm1291_vm2 = vmor %vm1289_vm0, %vm1290_vm1  ;;  %vm1292_vm6 = vcmask 1046534  }
  0x4f   :  { %v1135_v36 = vor.u32 %v1133_v28, %v1132_v27  ;;  %v3063_v7 = vld [vmem:[#allocation2 + $0xc] ss:$0 sps:$4 sm:$0x33]   ;;  %v3059_v10 = vld [vmem:[#allocation2 + $0x24] ss:$0 sps:$4 sm:$0x77]   ;;  %vm3607_vm7 = vmor %vm1291_vm2, %vm1292_vm6 }
  0x50   :  { %v1681_v11 = vrot.slane %v1679_v6, 7  ;;  %v3065_v13 = vld [vmem:[#allocation2 + $0x1c] ss:$0 sps:$4 sm:$0x33]   ;;  %v1693_v14 = vshrl.u32 %v3063_v7, 16 }
  0x51   :  { %1047 = vrot.lane.b32.xlu0 %v3029_v33, %s3104_s15  ;;  %v1555_v33 = vor.u32 %v1553_v25, %v1552_v24  ;;  %v3066_v15 = vld [vmem:[#allocation2 + $0x8] ss:$0 sps:$4 sm:$0x33]   ;;  %v3060_v17 = vld [vmem:[#allocation2 + $0x10] ss:$0 sps:$4 sm:$0x77]  }
  0x52   :  { %1013 = vrot.lane.b32.xlu1 %v978_v29, %s3106_s16  ;;  %v1571_v29 = vshrl.u32 %v3049_v20, 16  ;;  %v1695_v21 = vrot.slane %v1693_v14, 7  ;;  %v1686_v25 = vshrl.u32 %v3066_v15, 16  ;;  %v3068_v27 = vld [vmem:[#allocation2 + $0x10] ss:$0 sps:$4 sm:$0x33]  }
  0x53   :  { %v3290_v28 = vld [vmem:[#allocation2 + $0x8] ss:$0 sps:$4 sm:$0x77]   ;;  %v3062_v30 = vld [vmem:[#allocation2 + $0x20] ss:$0 sps:$4 sm:$0x77]  }
  0x54   :  { %v1573_v37 = vrot.slane %v1571_v29, 7  ;;  %v3292_v29 = vld [vmem:[#allocation2 + $0x20] ss:$0 sps:$4 sm:$0x33]  }
  0x55   :  { %1051 = vrot.lane.b32.xlu0 %v3031_v38, %s3104_s15  ;;  %v1574_v38 = vshll.u32 %v3049_v20, 16  ;;  %v3335_v14 = vld [vmem:[#allocation2 + $0x24] ss:$0 sps:$4 sm:$0x77]  }
  0x56   :  { %1017 = vrot.lane.b32.xlu1 %v992_v35, %s3106_s16  ;;  %v1123_v35 = vshrl.u32 %v3050_v22, 16 }
  0x57   :  { %v1576_v45 = vor.u32 %v1574_v38, %v1573_v37  ;;  %v3064_v38 = vld [vmem:[#allocation2 + $0x28] ss:$0 sps:$4 sm:$0x77]  }
  0x59   :  { %1055 = vrot.lane.b32.xlu0 %v3033_v42, %s3104_s15  ;;  %v1569_v42 = vor.u32 %v1567_v31, %v1566_v34  ;;  %v550_v31 = vshrl.u32 %v549_v18, 7 }
  0x5a   :  { %1021 = vrot.lane.b32.xlu1 %v1006_v40, %s3106_s16  ;;  %v1126_v40 = vshll.u32 %v3050_v22, 16  ;;  %v1696_v22 = vshll.u32 %v3063_v7, 16 }
  0x5d   :  { %1059 = vrot.lane.b32.xlu0 %v3035_v46, %s3104_s15  ;;  %v1587_v46 = vrot.slane %v1585_v39, 7  ;;  %v1688_v39 = vrot.slane %v1686_v25, 7  ;;  %v3345_v25 = vld [vmem:[#allocation2 + $0x4] ss:$0 sps:$4 sm:$0x77]  }
  0x5e   :  { %1049 = vrot.lane.b32.xlu1 %v3034_v43, %s3104_s15  ;;  %v1125_v43 = vrot.slane %v1123_v35, 7  ;;  %v1710_v35 = vshll.u32 %v3065_v13, 16 }
  0x5f   :  { %v1590_v53 = vor.u32 %v1588_v47, %v1587_v46  ;;  %v2206_v46 = vshrl.u32 %v3290_v28, 16  ;;  %v1714_v47 = vshrl.u32 %v3292_v29, 16 }
  0x60   :  { %v1128_v49 = vor.u32 %v1126_v40, %v1125_v43  ;;  %v3107_v43 = vmov 1983009808  }
  0x61   :  { %1143 = vrot.lane.b32.xlu0 %v1093_v54, %s3105_s0 }
  0x62   :  { %1053 = vrot.lane.b32.xlu1 %v3036_v50, %s3104_s15  ;;  %v1139_v50 = vrot.slane %v1137_v44, 7  ;;  %v547_v44 = vunpack.c.l.s4 %v3107_v43  ;;  %v217_v43 = vld [vmem:[#allocation2 + $0xc] sm:$0x7] }
  0x64   :  { %v1142_v56 = vor.u32 %v1140_v51, %v1139_v50  ;;  %v3307_v50 = vld [vmem:[#allocation2 + $0x20] ss:$0 sps:$4 sm:$0x77]   ;;  %v3309_v51 = vld [vmem:[#allocation2 + $0xc] ss:$0 sps:$4 sm:$0x77]   ;;  %v548_v57 = vunpack.c.0.s8 %v547_v44 }
  0x65   :  { %1147 = vrot.lane.b32.xlu0 %v1107_v61, %s3105_s0  ;;  %v3098_v61 = vld [vmem:[%s3936_s3 + $0x18] sm:$0xff]  }
  0x66   :  { %1057 = vrot.lane.b32.xlu1 %v3038_v59, %s3104_s15  ;;  %v1592_v59 = vshrl.u32 %v3056_v48, 16  ;;  %2972 = vmatprep.subr.bf16.mxu1 %v3098_v61 }
  0x67   :  { %2973 = vmatpush3.bf16.msra.mxu1 %v3098_v61 }
  0x68   :  { %v1594_v0 = vrot.slane %v1592_v59, 7  ;;  %v1703_v59 = vshll.u32 %v3068_v27, 16 }
  0x69   :  { %1598 = vrot.lane.b32.xlu0 %v1548_v8, %s3106_s16  ;;  %v3058_v8 = vld [vmem:[#allocation2 + $0x8] ss:$0 sps:$4 sm:$0x77]  }
  0x6a   :  { %1061 = vrot.lane.b32.xlu1 %v3040_v1, %s3104_s15  ;;  %v1595_v1 = vshll.u32 %v3056_v48, 16  ;;  %v3302_v48 = vld [vmem:[#allocation2 + $0x10] ss:$0 sps:$4 sm:$0x77]  }
  0x6c   :  { %v1597_v4 = vor.u32 %v1595_v1, %v1594_v0  ;;  %v3319_v0 = vld [vmem:[#allocation2 + $0x14] ss:$0 sps:$4 sm:$0x77]   ;;  %v2208_v1 = vrot.slane %v2206_v46, 7 }
  0x6d   :  { %1602 = vrot.lane.b32.xlu0 %v1562_v16, %s3106_s16  ;;  %v3067_v16 = vld [vmem:[#allocation2 + $0x24] ss:$0 sps:$4 sm:$0x33]  }
  0x6e   :  { %1145 = vrot.lane.b32.xlu1 %v1100_v12, %s3105_s0  ;;  %v1682_v12 = vshll.u32 %v3061_v62, 16  ;;  %v1724_v41 = vshll.u32 %v3067_v16, 16 }
  0x70   :  { %v1684_v20 = vor.u32 %v1682_v12, %v1681_v11  ;;  %v3329_v11 = vsub.s32 %v548_v57, %v550_v31  ;;  %v3350_v31 = vld [vmem:[#allocation2 + $0xc] ss:$0 sps:$4 sm:$0x77]  }
  0x71   :  { %1151 = vrot.lane.b32.xlu0 %v1121_v26, %s3105_s0  ;;  %v1721_v26 = vshrl.u32 %v3067_v16, 16 }
  0x72   :  { %1149 = vrot.lane.b32.xlu1 %v1114_v23, %s3105_s0  ;;  %v1707_v23 = vshrl.u32 %v3065_v13, 16 }
  0x73   :  { %v1723_v40 = vrot.slane %v1721_v26, 7 }
  0x74   :  { %v1709_v34 = vrot.slane %v1707_v23, 7 }
  0x75   :  { %1155 = vrot.lane.b32.xlu0 %v1135_v36, %s3105_s0  ;;  %v1689_v36 = vshll.u32 %v3066_v15, 16  ;;  %v1726_v62 = vor.u32 %v1724_v41, %v1723_v40  ;;  %v3337_v15 = vld [vmem:[#allocation2 + $0x2c] ss:$0 sps:$4 sm:$0x77]   ;;  %v2230_v41 = vshll.u32 %v3319_v0, 16 }
  0x76   :  { %1600 = vrot.lane.b32.xlu1 %v1555_v33, %s3106_s16  ;;  %v1698_v33 = vor.u32 %v1696_v22, %v1695_v21 }
  0x77   :  { %v1691_v61 = vor.u32 %v1689_v36, %v1688_v39  ;;  %v2241_v36 = vshrl.u32 %v3335_v14, 16 }
  0x79   :  { %1606 = vrot.lane.b32.xlu0 %v1576_v45, %s3106_s16  ;;  %v215_v45 = vld [vmem:[#allocation2 + $0x4] sm:$0x7] }
  0x7a   :  { %1604 = vrot.lane.b32.xlu1 %v1569_v42, %s3106_s16  ;;  %v1700_v42 = vshrl.u32 %v3068_v27, 16 }
  0x7b   :  { %v3264_v54 = vpop.permute.xlu0 %367 }
  0x7c   :  { %v1702_v58 = vrot.slane %v1700_v42, 7 }
  0x7d   :  { %1610 = vrot.lane.b32.xlu0 %v1590_v53, %s3106_s16  ;;  %v1712_v53 = vor.u32 %v1710_v35, %v1709_v34  ;;  %v2216_v35 = vshll.u32 %v3309_v51, 16 }
  0x7e   :  { %1153 = vrot.lane.b32.xlu1 %v1128_v49, %s3105_s0  ;;  %v3305_v49 = vld [vmem:[#allocation2 + $0x28] ss:$0 sps:$4 sm:$0x33]   ;;  %v1705_v16 = vor.u32 %v1703_v59, %v1702_v58  ;;  %v2258_v58 = vshll.u32 %v3337_v15, 16 }
  0x7f   :  { %v3276_v3 = vpop.permute.xlu0 %375  ;;  %v1728_v7 = vshrl.u32 %v3305_v49, 16  ;;  %v1731_v23 = vshll.u32 %v3305_v49, 16  ;;  %v2356_v49 = vshrl.u32 %v3350_v31, 16 }
  0x81   :  { %1638 = vrot.lane.b32.xlu0 %v3053_v55, %s3104_s15  ;;  %v2209_v55 = vshll.u32 %v3290_v28, 16  ;;  %v1730_v28 = vrot.slane %v1728_v7, 7  ;;  %v2359_v7 = vshll.u32 %v3350_v31, 16  ;;  %v3407_v31 = vld [vmem:[%s3936_s3 + $0x20] sm:$0xff]  }
  0x82   :  { %1157 = vrot.lane.b32.xlu1 %v1142_v56, %s3105_s0  ;;  %2978 = vmatprep.subr.bf16.mxu0 %v3407_v31 }
  0x83   :  { %v2211_v21 = vor.u32 %v2209_v55, %v2208_v1 }
  0x85   :  { %1642 = vrot.lane.b32.xlu0 %v3055_v2, %s3104_s15  ;;  %v3280_v9 = vpop.permute.xlu0 %463  ;;  %v1716_v2 = vrot.slane %v1714_v47, 7  ;;  %v1733_v47 = vor.u32 %v1731_v23, %v1730_v28 }
  0x86   :  { %1608 = vrot.lane.b32.xlu1 %v1583_v63, %s3106_s16  ;;  %v3317_v63 = vld [vmem:[#allocation2 + $0x28] ss:$0 sps:$4 sm:$0x77]  }
  0x87   :  { %v2248_v18 = vshrl.u32 %v3317_v63, 16 }
  0x89   :  { %1646 = vrot.lane.b32.xlu0 %v3057_v5, %s3104_s15  ;;  %v2220_v5 = vshrl.u32 %v3302_v48, 16  ;;  %v2250_v39 = vrot.slane %v2248_v18, 7 }
  0x8a   :  { %1612 = vrot.lane.b32.xlu1 %v1597_v4, %s3106_s16  ;;  %v1717_v4 = vshll.u32 %v3292_v29, 16 }
  0x8c   :  { %v1719_v22 = vor.u32 %v1717_v4, %v1716_v2  ;;  %v2345_v2 = vshll.u32 %v3345_v25, 16 }
  0x8d   :  { %1650 = vrot.lane.b32.xlu0 %v3059_v10, %s3104_s15  ;;  %v2213_v10 = vshrl.u32 %v3309_v51, 16 }
  0x8e   :  { %1640 = vrot.lane.b32.xlu1 %v3058_v8, %s3104_s15  ;;  %v2234_v8 = vshrl.u32 %v3307_v50, 16 }
  0x8f   :  { %v3286_v19 = vpop.permute.xlu0 %371  ;;  %v2215_v34 = vrot.slane %v2213_v10, 7  ;;  %v216_v10 = vld [vmem:[#allocation2 + $0x8] sm:$0x7] }
  0x90   :  { %v3288_v24 = vpop.permute.xlu1 %369  ;;  %v2236_v29 = vrot.slane %v2234_v8, 7 }
  0x91   :  { %1734 = vrot.lane.b32.xlu0 %v1684_v20, %s3105_s0  ;;  %v2227_v20 = vshrl.u32 %v3319_v0, 16  ;;  %v2218_v55 = vor.u32 %v2216_v35, %v2215_v34  ;;  %v219_v0 = vld [vmem:[#allocation2 + $0x1c] sm:$0x7] }
  0x92   :  { %1644 = vrot.lane.b32.xlu1 %v3060_v17, %s3104_s15  ;;  %v2223_v17 = vshll.u32 %v3302_v48, 16 }
  0x93   :  { %v3296_v32 = vpop.permute.xlu0 %379  ;;  %v2229_v40 = vrot.slane %v2227_v20, 7  ;;  %v221_v20 = vld [vmem:[#allocation2 + $0x24] sm:$0x7] }
  0x94   :  { %v3298_v37 = vpop.permute.xlu1 %373 }
  0x95   :  { %1738 = vrot.lane.b32.xlu0 %v1698_v33, %s3105_s0 }
  0x96   :  { %1648 = vrot.lane.b32.xlu1 %v3062_v30, %s3104_s15  ;;  %v2237_v30 = vshll.u32 %v3307_v50, 16  ;;  %v3366_v50 = vld [vmem:[#allocation2 + $0x1c] ss:$0 sps:$4 sm:$0x77]  }
  0x97   :  { %v328_v52 = vpop.permute.xlu0 %327  ;;  %v2370_v8 = vshrl.u32 %v3366_v50, 16 }
  0x98   :  { %v3312_v56 = vpop.permute.xlu1 %377  ;;  %v482_v60 = vsel %vm479_vm3, %v215_v45, %v328_v52  ;;  %v2342_v45 = vshrl.u32 %v3345_v25, 16  ;;  %v2239_v48 = vor.u32 %v2237_v30, %v2236_v29  ;;  %v2243_v52 = vrot.slane %v2241_v36, 7  ;;  %v3397_v25 = vld [vmem:[#allocation2 + $0x24] ss:$0 sps:$4 sm:$0x77]  }
  0x99   :  { %1742 = vrot.lane.b32.xlu0 %v1712_v53, %s3105_s0  ;;  %v506_v12 = vsel %vm504_vm4, %v482_v60, %v3264_v54  ;;  %v2222_v54 = vrot.slane %v2220_v5, 7  ;;  %v2244_v53 = vshll.u32 %v3335_v14, 16  ;;  %v2358_v5 = vrot.slane %v2356_v49, 7 }
  0x9a   :  { %1652 = vrot.lane.b32.xlu1 %v3064_v38, %s3104_s15  ;;  %v523_v26 = vsel %vm521_vm5, %v506_v12, %v3280_v9  ;;  %v2255_v38 = vshrl.u32 %v3337_v15, 16  ;;  %v2251_v9 = vshll.u32 %v3317_v63, 16  ;;  %v2344_v1 = vrot.slane %v2342_v45, 7 }
  0x9b   :  { %v3333_v13 = vpop.permute.xlu0 %329  ;;  %v3359_v42 = vrot.slane %v523_v26, %v3329_v11  ;;  %v2225_v44 = vor.u32 %v2223_v17, %v2222_v54  ;;  %v3384_v15 = vor.u32 %v2244_v53, %v2243_v52  ;;  %v3388_v17 = vld [vmem:[#allocation2 + $0x8] ss:$0 sps:$4 sm:$0x77]   ;;  %v3401_v28 = vor.u32 %v2359_v7, %v2358_v5  ;;  %v220_v53 = vld [vmem:[#allocation2 + $0x20] sm:$0x7] }
  0x9c   :  { %v3324_v6 = vpop.permute.xlu1 %381  ;;  %v2257_v57 = vrot.slane %v2255_v38, 7  ;;  %v2253_v60 = vor.u32 %v2251_v9, %v2250_v39  ;;  %v2372_v29 = vrot.slane %v2370_v8, 7  ;;  %v2373_v30 = vshll.u32 %v3366_v50, 16  ;;  %v3079_v5 = vld [vmem:[#allocation2 + $0xc] ss:$0 sps:$4 sm:$0x66]  }
  0x9d   :  { %1746 = vrot.lane.b32.xlu0 %v1726_v62, %s3105_s0  ;;  %v618_v62 = vshrl.u32 %v3359_v42, 16  ;;  %v621_v63 = vshll.u32 %v3359_v42, 16  ;;  %v2349_v39 = vshrl.u32 %v3388_v17, 16  ;;  %v485_v9 = vsel %vm479_vm3, %v216_v10, %v3333_v13  ;;  %v3077_v13 = vld [vmem:[#allocation2 + $0x4] ss:$0 sps:$4 sm:$0x66]  }
  0x9e   :  { %1736 = vrot.lane.b32.xlu1 %v1691_v61, %s3105_s0  ;;  %v3372_v61 = vor.u32 %v2230_v41, %v2229_v40  ;;  %v2387_v52 = vshll.u32 %v3397_v25, 16 }
  0x9f   :  { %v336_v33 = vpop.permute.xlu0 %335  ;;  %v623_v54 = vrot.slane %v621_v63, 7 }
  0xa0   :  { %v332_v27 = vpop.permute.xlu1 %331  ;;  %v494_v18 = vsel %vm479_vm3, %v219_v0, %v336_v33  ;;  %v218_v33 = vld [vmem:[#allocation2 + $0x10] sm:$0x7] }
  0xa1   :  { %2261 = vrot.lane.b32.xlu0 %v2211_v21, %s3106_s16  ;;  %v488_v59 = vsel %vm479_vm3, %v217_v43, %v332_v27  ;;  %v3399_v27 = vor.u32 %v2345_v2, %v2344_v1  ;;  %v514_v36 = vsel %vm504_vm4, %v494_v18, %v3276_v3  ;;  %v2352_v3 = vshll.u32 %v3388_v17, 16 }
  0xa2   :  { %1740 = vrot.lane.b32.xlu1 %v1705_v16, %s3105_s0  ;;  %v510_v12 = vsel %vm504_vm4, %v488_v59, %v3286_v19  ;;  %v3386_v16 = vor.u32 %v2258_v58, %v2257_v57  ;;  %v553_v19 = vcombine.high %v3359_v42, %v3359_v42  ;;  %v222_v59 = vld [vmem:[#allocation2 + $0x28] sm:$0x7] }
  0xa3   :  { %v340_v51 = vpop.permute.xlu0 %339 }
  0xa4   :  { %v3363_v46 = vpop.permute.xlu1 %333  ;;  %v500_v40 = vsel %vm479_vm3, %v221_v20, %v340_v51  ;;  %v627_v45 = vshll.u32 %v553_v19, 16  ;;  %v3432_v51 = vor.u32 %v2373_v30, %v2372_v29 }
  0xa5   :  { %2265 = vrot.lane.b32.xlu0 %v2225_v44, %s3106_s16 }
  0xa6   :  { %1744 = vrot.lane.b32.xlu1 %v1719_v22, %s3105_s0  ;;  %v620_v22 = vrot.slane %v618_v62, 6  ;;  %v629_v8 = vrot.slane %v627_v45, 7 }
  0xa7   :  { %v468_v14 = vpop.permute.xlu0 %467 }
  0xa8   :  { %v3378_v4 = vpop.permute.xlu1 %337  ;;  %v527_v21 = vsel %vm521_vm5, %v510_v12, %v468_v14  ;;  %v624_v44 = vor.u32 %v623_v54, %v620_v22 }
  0xa9   :  { %v568_v23 = vrot.slane %v527_v21, %v3329_v11  ;;  %2269 = vrot.lane.b32.xlu0 %v2239_v48, %s3106_s16  ;;  %v491_v48 = vsel %vm479_vm3, %v218_v33, %v3363_v46  ;;  %v497_v10 = vsel %vm479_vm3, %v220_v53, %v3378_v4 }
  0xaa   :  { %1748 = vrot.lane.b32.xlu1 %v1733_v47, %s3105_s0  ;;  %v2384_v47 = vshrl.u32 %v3397_v25, 16  ;;  %v625_v7 = vrot.slane %v624_v44, 2  ;;  %v3100_v25 = vld [vmem:[%s3936_s3 + $0x28] sm:$0xff]  }
  0xab   :  { %v646_v34 = vshrl.u32 %v568_v23, 16  ;;  %v649_v35 = vshll.u32 %v568_v23, 16  ;;  %v472_v38 = vpop.permute.xlu0 %471  ;;  %v569_v49 = vcombine.high %v568_v23, %v568_v23 }
  0xac   :  { %v342_v26 = vpop.permute.xlu1 %341  ;;  %v531_v41 = vsel %vm521_vm5, %v514_v36, %v472_v38  ;;  %v3481_v36 = vsel %vm3467_vm12, %v625_v7, %v629_v8 }
  0xad   :  { %v3426_v43 = vrot.slane %v531_v41, %v3329_v11  ;;  %2273 = vrot.lane.b32.xlu0 %v2253_v60, %s3106_s16  ;;  %v648_v57 = vrot.slane %v646_v34, 6  ;;  %v651_v58 = vrot.slane %v649_v35, 7  ;;  %v518_v60 = vsel %vm504_vm4, %v500_v40, %v3296_v32  ;;  %v3081_v35 = vld [vmem:[#allocation2 + $0x1c] ss:$0 sps:$4 sm:$0x66]  }
  0xae   :  { %2263 = vrot.lane.b32.xlu1 %v2218_v55, %s3106_s16  ;;  %v508_v55 = vsel %vm504_vm4, %v485_v9, %v3288_v24  ;;  %v512_v32 = vsel %vm504_vm4, %v491_v48, %v3298_v37  ;;  %v3458_v12 = vshll.u32 %v569_v49, 16  ;;  %v503_v14 = vsel %vm479_vm3, %v222_v59, %v342_v26 }
  0xaf   :  { %v476_v62 = vpop.permute.xlu0 %475  ;;  %v674_v63 = vshrl.u32 %v3426_v43, 16  ;;  %v677_v0 = vshll.u32 %v3426_v43, 16  ;;  %v652_v37 = vor.u32 %v651_v58, %v648_v57  ;;  %v585_v38 = vcombine.high %v3426_v43, %v3426_v43 }
  0xb0   :  { %v466_v50 = vpop.permute.xlu1 %465  ;;  %v535_v2 = vsel %vm521_vm5, %v518_v60, %v476_v62  ;;  %v516_v40 = vsel %vm504_vm4, %v497_v10, %v3312_v56  ;;  %v3082_v56 = vld [vmem:[#allocation2 + $0x8] ss:$0 sps:$4 sm:$0x66]  }
  0xb1   :  { %v525_v1 = vsel %vm521_vm5, %v508_v55, %v466_v50  ;;  %2301 = vrot.lane.b32.xlu0 %v3077_v13, %s3104_s15  ;;  %v3462_v18 = vrot.slane %v535_v2, %v3329_v11  ;;  %v676_v54 = vrot.slane %v674_v63, 6  ;;  %v679_v23 = vrot.slane %v677_v0, 7  ;;  %v3083_v55 = vld [vmem:[#allocation2 + $0x24] ss:$0 sps:$4 sm:$0x66]  }
  0xb2   :  { %2267 = vrot.lane.b32.xlu1 %v3372_v61, %s3106_s16  ;;  %v560_v24 = vrot.slane %v525_v1, %v3329_v11  ;;  %v653_v42 = vrot.slane %v652_v37, 2  ;;  %v657_v13 = vrot.slane %v3458_v12, 7  ;;  %v3497_v60 = vshll.u32 %v585_v38, 16  ;;  %v3084_v12 = vld [vmem:[#allocation2 + $0x10] ss:$0 sps:$4 sm:$0x66]  }
  0xb3   :  { %v3471_v4 = vpop.permute.xlu0 %1007  ;;  %v702_v26 = vshrl.u32 %v3462_v18, 16  ;;  %v705_v29 = vshll.u32 %v3462_v18, 16  ;;  %v680_v49 = vor.u32 %v679_v23, %v676_v54  ;;  %v601_v46 = vcombine.high %v3462_v18, %v3462_v18 }
  0xb4   :  { %v470_v61 = vpop.permute.xlu1 %469  ;;  %v561_v21 = vcombine.high %v560_v24, %v560_v24  ;;  %v632_v19 = vshrl.u32 %v560_v24, 16  ;;  %v635_v22 = vshll.u32 %v560_v24, 16 }
  0xb5   :  { %v529_v34 = vsel %vm521_vm5, %v512_v32, %v470_v61  ;;  %2305 = vrot.lane.b32.xlu0 %v3079_v5, %s3104_s15  ;;  %v704_v50 = vrot.slane %v702_v26, 6  ;;  %v707_v53 = vrot.slane %v705_v29, 7  ;;  %v3086_v26 = vld [vmem:[#allocation2 + $0x20] ss:$0 sps:$4 sm:$0x66]   ;;  %v711_v38 = vshll.u32 %v601_v46, 16 }
  0xb6   :  { %2271 = vrot.lane.b32.xlu1 %v3384_v15, %s3106_s16  ;;  %v634_v30 = vrot.slane %v632_v19, 6  ;;  %v637_v33 = vrot.slane %v635_v22, 7  ;;  %v641_v9 = vshll.u32 %v561_v21, 16  ;;  %v520_v15 = vsel %vm504_vm4, %v503_v14, %v3324_v6 }
  0xb7   :  { %v576_v45 = vrot.slane %v529_v34, %v3329_v11  ;;  %v3491_v48 = vpop.permute.xlu0 %1011  ;;  %v681_v14 = vrot.slane %v680_v49, 2  ;;  %v708_v18 = vor.u32 %v707_v53, %v704_v50 }
  0xb8   :  { %v474_v41 = vpop.permute.xlu1 %473  ;;  %v638_v44 = vor.u32 %v637_v33, %v634_v30  ;;  %v643_v62 = vrot.slane %v641_v9, 7 }
  0xb9   :  { %v533_v43 = vsel %vm521_vm5, %v516_v40, %v474_v41  ;;  %v577_v58 = vcombine.high %v576_v45, %v576_v45  ;;  %v660_v6 = vshrl.u32 %v576_v45, 16  ;;  %v663_v59 = vshll.u32 %v576_v45, 16  ;;  %2309 = vrot.lane.b32.xlu0 %v3081_v35, %s3104_s15 }
  0xba   :  { %2275 = vrot.lane.b32.xlu1 %v3386_v16, %s3106_s16  ;;  %v639_v57 = vrot.slane %v638_v44, 2  ;;  %v592_v63 = vrot.slane %v533_v43, %v3329_v11  ;;  %v658_v41 = vsel %vm3467_vm12, %v653_v42, %v657_v13  ;;  %v685_v42 = vrot.slane %v3497_v60, 7 }
  0xbb   :  { %v662_v1 = vrot.slane %v660_v6, 6  ;;  %v665_v2 = vrot.slane %v663_v59, 7  ;;  %v669_v16 = vshll.u32 %v577_v58, 16  ;;  %v3503_v32 = vpop.permute.xlu0 %1015  ;;  %v2351_v58 = vrot.slane %v2349_v39, 7 }
  0xbc   :  { %v478_v0 = vpop.permute.xlu1 %477  ;;  %v593_v5 = vcombine.high %v592_v63, %v592_v63  ;;  %v688_v7 = vshrl.u32 %v592_v63, 16  ;;  %v691_v8 = vshll.u32 %v592_v63, 16  ;;  %v644_v37 = vsel %vm3467_vm12, %v639_v57, %v643_v62  ;;  %v3095_v63 = vld [vmem:[#allocation2 + $0x20] ss:$0 sps:$4 sm:$0x77]  }
  0xbd   :  { %v537_v24 = vsel %vm521_vm5, %v520_v15, %v478_v0  ;;  %v666_v61 = vor.u32 %v665_v2, %v662_v1  ;;  %2313 = vrot.lane.b32.xlu0 %v3083_v55, %s3104_s15  ;;  %v671_v30 = vrot.slane %v669_v16, 7  ;;  %v3094_v15 = vld [vmem:[#allocation2 + $0x10] ss:$0 sps:$4 sm:$0x77]   ;;  %v739_v50 = vcombine.low %v3481_v36, %v644_v37 }
  0xbe   :  { %v608_v10 = vrot.slane %v537_v24, %v3329_v11  ;;  %2303 = vrot.lane.b32.xlu1 %v3082_v56, %s3104_s15  ;;  %v690_v21 = vrot.slane %v688_v7, 6  ;;  %v693_v19 = vrot.slane %v691_v8, 7  ;;  %v697_v22 = vshll.u32 %v593_v5, 16 }
  0xbf   :  { %v667_v29 = vrot.slane %v666_v61, 2  ;;  %v3512_v35 = vpop.permute.xlu0 %1019  ;;  %v709_v13 = vrot.slane %v708_v18, 2  ;;  %v2386_v55 = vrot.slane %v2384_v47, 7  ;;  %v747_v36 = vrot.slane %v739_v50, %v3329_v11  ;;  %v3096_v61 = vld [vmem:[#allocation2 + $0x28] ss:$0 sps:$4 sm:$0x77]  }
  0xc0   :  { %v609_v54 = vcombine.high %v608_v10, %v608_v10  ;;  %v3510_v23 = vpop.permute.xlu1 %1009  ;;  %v716_v33 = vshrl.u32 %v608_v10, 16  ;;  %v719_v34 = vshll.u32 %v608_v10, 16  ;;  %v694_v9 = vor.u32 %v693_v19, %v690_v21 }
  0xc1   :  { %2397 = vrot.lane.b32.xlu0 %v3399_v27, %s3105_s0  ;;  %v672_v49 = vsel %vm3467_vm12, %v667_v29, %v671_v30  ;;  %v699_v43 = vrot.slane %v697_v22, 7  ;;  %v3089_v27 = vld [vmem:[#allocation2 + $0x28] ss:$0 sps:$4 sm:$0x66]   ;;  %v2363_v39 = vshrl.u32 %v3094_v15, 16  ;;  %v713_v60 = vrot.slane %v711_v38, 7 }
  0xc2   :  { %v725_v40 = vshll.u32 %v609_v54, 16  ;;  %2307 = vrot.lane.b32.xlu1 %v3084_v12, %s3104_s15  ;;  %v718_v44 = vrot.slane %v716_v33, 6  ;;  %v721_v45 = vrot.slane %v719_v34, 7  ;;  %v695_v53 = vrot.slane %v694_v9, 2 }
  0xc3   :  { %v740_v57 = vcombine.low %v658_v41, %v672_v49  ;;  %v3527_v59 = vpop.permute.xlu0 %1047  ;;  %v686_v47 = vsel %vm3467_vm12, %v681_v14, %v685_v42  ;;  %v714_v7 = vsel %vm3467_vm12, %v709_v13, %v713_v60  ;;  %v2366_v10 = vshll.u32 %v3094_v15, 16  ;;  %v895_v15 = vld [vmem:[#allocation2 + $0x4] sm:$0x6] }
  0xc4   :  { %v3522_v56 = vpop.permute.xlu1 %1013  ;;  %v722_v6 = vor.u32 %v721_v45, %v718_v44  ;;  %v700_v46 = vsel %vm3467_vm12, %v695_v53, %v699_v43  ;;  %v727_v1 = vrot.slane %v725_v40, 7  ;;  %v2365_v14 = vrot.slane %v2363_v39, 7  ;;  %v3574_v44 = vld [vmem:[%s3936_s3 + $0x30] sm:$0xff]  }
  0xc5   :  { %v754_v62 = vrot.slane %v740_v57, %v3329_v11  ;;  %2401 = vrot.lane.b32.xlu0 %v3401_v28, %s3105_s0  ;;  %v756_v24 = vcombine.low %v686_v47, %v700_v46  ;;  %v2354_v28 = vor.u32 %v2352_v3, %v2351_v58  ;;  %v2377_v18 = vshrl.u32 %v3095_v63, 16  ;;  %2986 = vmatprep.subr.bf16.mxu1 %v3574_v44  ;;  %v896_v57 = vld [vmem:[#allocation2 + $0x8] sm:$0x6] }
  0xc6   :  { %2311 = vrot.lane.b32.xlu1 %v3086_v26, %s3104_s15  ;;  %v723_v0 = vrot.slane %v722_v6, 2  ;;  %v2389_v37 = vor.u32 %v2387_v52, %v2386_v55  ;;  %v2380_v17 = vshll.u32 %v3095_v63, 16  ;;  %v2368_v26 = vor.u32 %v2366_v10, %v2365_v14  ;;  %v901_v14 = vld [vmem:[#allocation2 + $0x24] sm:$0x6] }
  0xc7   :  { %v755_v2 = vcombine.low %v747_v36, %v754_v62  ;;  %v1052_v5 = vpop.permute.xlu0 %1051  ;;  %v764_v19 = vrot.slane %v756_v24, %v3329_v11  ;;  %v2379_v29 = vrot.slane %v2377_v18, 7  ;;  %v2391_v30 = vshrl.u32 %v3096_v61, 16 }
  0xc8   :  { %v3540_v16 = vpop.permute.xlu1 %1017  ;;  %v728_v8 = vsel %vm3467_vm12, %v723_v0, %v727_v1  ;;  %v2394_v38 = vshll.u32 %v3096_v61, 16  ;;  %v1161_v50 = vsel %vm479_vm3, %v895_v15, %v3471_v4  ;;  %v1164_v4 = vsel %vm479_vm3, %v896_v57, %v3510_v23 }
  0xc9   :  { %2966 = vmatprep.mubr.msk.bf16.mxu0 %vm785_vm13, %v755_v2  ;;  %v757_v12 = vcombine.low %v714_v7, %v728_v8  ;;  %2405 = vrot.lane.b32.xlu0 %v3432_v51, %s3105_s0  ;;  %v2382_v33 = vor.u32 %v2380_v17, %v2379_v29  ;;  %v2393_v34 = vrot.slane %v2391_v30, 7  ;;  %v1184_v53 = vsel %vm504_vm4, %v1161_v50, %v3527_v59  ;;  %v898_v59 = vld [vmem:[#allocation2 + $0x10] sm:$0x6]  ;;  %v899_v7 = vld [vmem:[#allocation2 + $0x1c] sm:$0x6] }
  0xca   :  { %2315 = vrot.lane.b32.xlu1 %v3089_v27, %s3104_s15  ;;  %v1170_v23 = vsel %vm479_vm3, %v898_v59, %v3522_v56 }
  0xcb   :  { %v771_v22 = vrot.slane %v757_v12, %v3329_v11  ;;  %v3558_v54 = vpop.permute.xlu0 %1055  ;;  %v2396_v41 = vor.u32 %v2394_v38, %v2393_v34  ;;  %v900_v34 = vld [vmem:[#allocation2 + $0x20] sm:$0x6] }
  0xcc   :  { %v3554_v21 = vpop.permute.xlu1 %1021  ;;  %v1176_v50 = vsel %vm479_vm3, %v900_v34, %v3540_v16 }
  0xcd   :  { %v772_v3 = vcombine.low %v764_v19, %v771_v22  ;;  %2409 = vrot.lane.b32.xlu0 %v2389_v37, %s3105_s0  ;;  %v1173_v37 = vsel %vm479_vm3, %v899_v7, %v3503_v32 }
  0xce   :  { %2399 = vrot.lane.b32.xlu1 %v2354_v28, %s3105_s0 }
  0xcf   :  { %2967 = vmatmul.mubr.msk.bf16.vlgmr.msra.gmra.mrb[0].mxu0 %vm785_vm13, %v772_v3  ;;  %v3566_v52 = vpop.permute.xlu0 %1059 }
  0xd0   :  { %v1050_v51 = vpop.permute.xlu1 %1049  ;;  %2979 = vmatpush3.bf16.msra.mxu0 %v3407_v31  ;;  %v897_v31 = vld [vmem:[#allocation2 + $0xc] sm:$0x6] }
  0xd1   :  { %2980 = vmatprep.subr.bf16.mxu0 %v3100_v25  ;;  %v1167_v43 = vsel %vm479_vm3, %v897_v31, %v3491_v48  ;;  %v1186_v48 = vsel %vm504_vm4, %v1164_v4, %v1050_v51 }
  0xd2   :  { %2403 = vrot.lane.b32.xlu1 %v2368_v26, %s3105_s0  ;;  %v1188_v13 = vsel %vm504_vm4, %v1167_v43, %v1052_v5  ;;  %v1192_v26 = vsel %vm504_vm4, %v1173_v37, %v3558_v54 }
  0xd3   :  { %v1144_v40 = vpop.permute.xlu0 %1143 }
  0xd4   :  { %v1054_v9 = vpop.permute.xlu1 %1053  ;;  %2981 = vmatpush3.bf16.msra.mxu0 %v3100_v25  ;;  %v1200_v58 = vsel %vm521_vm5, %v1184_v53, %v1144_v40  ;;  %v1179_v25 = vsel %vm479_vm3, %v901_v14, %v3512_v35 }
  0xd5   :  { %v1229_v55 = vrot.slane %v1200_v58, %v3329_v11  ;;  %v1190_v0 = vsel %vm504_vm4, %v1170_v23, %v1054_v9  ;;  %v1196_v38 = vsel %vm504_vm4, %v1179_v25, %v3566_v52  ;;  %v902_v52 = vld [vmem:[#allocation2 + $0x28] sm:$0x6] }
  0xd6   :  { %2407 = vrot.lane.b32.xlu1 %v2382_v33, %s3105_s0  ;;  %v1182_v16 = vsel %vm479_vm3, %v902_v52, %v3554_v21 }
  0xd7   :  { %v1148_v49 = vpop.permute.xlu0 %1147  ;;  %v1230_v60 = vcombine.high %v1229_v55, %v1229_v55  ;;  %v2810_v19 = vrot.slane %v1229_v55, 9 }
  0xd8   :  { %v3576_v45 = vpop.permute.xlu1 %1057  ;;  %v1204_v27 = vsel %vm521_vm5, %v1188_v13, %v1148_v49 }
  0xd9   :  { %v1245_v62 = vrot.slane %v1204_v27, %v3329_v11  ;;  %v1296_v28 = vrot.slane %v1230_v60, 7  ;;  %v1194_v53 = vsel %vm504_vm4, %v1176_v50, %v3576_v45  ;;  %v1490_v50 = vld [vmem:[#allocation2 + $0x20] sm:$0x7] }
  0xda   :  { %2411 = vrot.lane.b32.xlu1 %v2396_v41, %s3105_s0 }
  0xdb   :  { %v3590_v6 = vpop.permute.xlu0 %1598  ;;  %v1246_v2 = vcombine.high %v1245_v62, %v1245_v62  ;;  %v2812_v51 = vrot.slane %v1245_v62, 9  ;;  %v1297_v32 = vsel %vm3607_vm7, %v2810_v19, %v1296_v28 }
  0xdc   :  { %v3587_v42 = vpop.permute.xlu1 %1061 }
  0xdd   :  { %v1304_v22 = vrot.slane %v1246_v2, 7  ;;  %v1198_v45 = vsel %vm504_vm4, %v1182_v16, %v3587_v42 }
  0xdf   :  { %v3599_v39 = vpop.permute.xlu0 %1602  ;;  %v1305_v35 = vsel %vm3607_vm7, %v2812_v51, %v1304_v22 }
  0xe0   :  { %v1146_v36 = vpop.permute.xlu1 %1145 }
  0xe1   :  { %v1202_v46 = vsel %vm521_vm5, %v1186_v48, %v1146_v36 }
  0xe2   :  { %v1237_v63 = vrot.slane %v1202_v46, %v3329_v11 }
  0xe3   :  { %v1152_v5 = vpop.permute.xlu0 %1151 }
  0xe4   :  { %v1238_v1 = vcombine.high %v1237_v63, %v1237_v63  ;;  %v1150_v47 = vpop.permute.xlu1 %1149  ;;  %v2811_v12 = vrot.slane %v1237_v63, 9  ;;  %v1208_v33 = vsel %vm521_vm5, %v1192_v26, %v1152_v5 }
  0xe5   :  { %v1206_v24 = vsel %vm521_vm5, %v1190_v0, %v1150_v47  ;;  %v1261_v31 = vrot.slane %v1208_v33, %v3329_v11  ;;  %v3102_v33 = vld [vmem:[%s3936_s3 + $0x38] sm:$0xff]  }
  0xe6   :  { %v1300_v8 = vrot.slane %v1238_v1, 7  ;;  %v1253_v10 = vrot.slane %v1206_v24, %v3329_v11 }
  0xe7   :  { %v1156_v17 = vpop.permute.xlu0 %1155  ;;  %v1262_v55 = vcombine.high %v1261_v31, %v1261_v31  ;;  %v2814_v2 = vrot.slane %v1261_v31, 9 }
  0xe8   :  { %v1254_v18 = vcombine.high %v1253_v10, %v1253_v10  ;;  %v3611_v61 = vpop.permute.xlu1 %1600  ;;  %v1301_v3 = vsel %vm3607_vm7, %v2811_v12, %v1300_v8  ;;  %v2813_v29 = vrot.slane %v1253_v10, 9  ;;  %v1212_v41 = vsel %vm521_vm5, %v1196_v38, %v1156_v17  ;;  %v1488_v38 = vld [vmem:[#allocation2 + $0x10] sm:$0x7] }
  0xe9   :  { %v1331_v40 = vcombine.low %v1297_v32, %v1301_v3  ;;  %v1277_v43 = vrot.slane %v1212_v41, %v3329_v11  ;;  %v1312_v60 = vrot.slane %v1262_v55, 7  ;;  %v1758_v31 = vsel %vm479_vm3, %v1488_v38, %v3599_v39 }
  0xea   :  { %v1308_v30 = vrot.slane %v1254_v18, 7 }
  0xeb   :  { %v3631_v15 = vpop.permute.xlu0 %1606  ;;  %v1339_v58 = vrot.slane %v1331_v40, %v3329_v11  ;;  %v1278_v36 = vcombine.high %v1277_v43, %v1277_v43  ;;  %v1313_v8 = vsel %vm3607_vm7, %v2814_v2, %v1312_v60  ;;  %v2816_v10 = vrot.slane %v1277_v43, 9 }
  0xec   :  { %v3626_v9 = vpop.permute.xlu1 %1604  ;;  %v1309_v54 = vsel %vm3607_vm7, %v2813_v29, %v1308_v30  ;;  %v1486_v30 = vld [vmem:[#allocation2 + $0x8] sm:$0x7] }
  0xed   :  { %v1332_v49 = vcombine.low %v1305_v35, %v1309_v54  ;;  %v1320_v24 = vrot.slane %v1278_v36, 7  ;;  %v1752_v32 = vsel %vm479_vm3, %v1486_v30, %v3590_v6 }
  0xef   :  { %v1346_v13 = vrot.slane %v1332_v49, %v3329_v11  ;;  %v3644_v4 = vpop.permute.xlu0 %1610  ;;  %v1321_v18 = vsel %vm3607_vm7, %v2816_v10, %v1320_v24 }
  0xf0   :  { %v1154_v57 = vpop.permute.xlu1 %1153 }
  0xf1   :  { %v1210_v27 = vsel %vm521_vm5, %v1194_v53, %v1154_v57  ;;  %v1347_v48 = vcombine.low %v1339_v58, %v1346_v13  ;;  %v1487_v58 = vld [vmem:[#allocation2 + $0xc] sm:$0x7]  ;;  %v1489_v13 = vld [vmem:[#allocation2 + $0x14] sm:$0x7] }
  0xf2   :  { %v1269_v59 = vrot.slane %v1210_v27, %v3329_v11  ;;  %v1764_v27 = vsel %vm479_vm3, %v1490_v50, %v3631_v15  ;;  %v1761_v15 = vsel %vm479_vm3, %v1489_v13, %v3626_v9 }
  0xf3   :  { %2974 = vmatprep.mubr.msk.bf16.mxu1 %vm785_vm13, %v1347_v48  ;;  %v1639_v23 = vpop.permute.xlu0 %1638 }
  0xf4   :  { %v1270_v62 = vcombine.high %v1269_v59, %v1269_v59  ;;  %v1158_v46 = vpop.permute.xlu1 %1157  ;;  %v2815_v0 = vrot.slane %v1269_v59, 9  ;;  %v1775_v54 = vsel %vm504_vm4, %v1752_v32, %v1639_v23  ;;  %v1492_v59 = vld [vmem:[#allocation2 + $0x28] sm:$0x7] }
  0xf5   :  { %v1214_v63 = vsel %vm521_vm5, %v1198_v45, %v1158_v46 }
  0xf6   :  { %v1316_v1 = vrot.slane %v1270_v62, 7  ;;  %v1285_v47 = vrot.slane %v1214_v63, %v3329_v11  ;;  %v1755_v63 = vsel %vm479_vm3, %v1487_v58, %v3611_v61 }
  0xf7   :  { %v1643_v7 = vpop.permute.xlu0 %1642 }
  0xf8   :  { %v1317_v21 = vsel %vm3607_vm7, %v2815_v0, %v1316_v1  ;;  %v1286_v5 = vcombine.high %v1285_v47, %v1285_v47  ;;  %v3656_v42 = vpop.permute.xlu1 %1608  ;;  %v2817_v28 = vrot.slane %v1285_v47, 9  ;;  %v1779_v6 = vsel %vm504_vm4, %v1758_v31, %v1643_v7  ;;  %v1491_v1 = vld [vmem:[#allocation2 + $0x24] sm:$0x7]  ;;  %v1493_v47 = vld [vmem:[#allocation2 + $0x2c] sm:$0x7] }
  0xf9   :  { %v1348_v14 = vcombine.low %v1313_v8, %v1317_v21  ;;  %v1770_v0 = vsel %vm479_vm3, %v1492_v59, %v3644_v4  ;;  %v1767_v4 = vsel %vm479_vm3, %v1491_v1, %v3656_v42 }
  0xfa   :  { %v1324_v12 = vrot.slane %v1286_v5, 7 }
  0xfb   :  { %v1647_v17 = vpop.permute.xlu0 %1646  ;;  %v1356_v3 = vrot.slane %v1348_v14, %v3329_v11 }
  0xfc   :  { %v1325_v37 = vsel %vm3607_vm7, %v2817_v28, %v1324_v12  ;;  %v3664_v19 = vpop.permute.xlu1 %1612  ;;  %v1783_v39 = vsel %vm504_vm4, %v1764_v27, %v1647_v17 }
  0xfd   :  { %v1349_v22 = vcombine.low %v1321_v18, %v1325_v37  ;;  %v1773_v18 = vsel %vm479_vm3, %v1493_v47, %v3664_v19 }
  0xff   :  { %v1363_v26 = vrot.slane %v1349_v22, %v3329_v11  ;;  %v1651_v25 = vpop.permute.xlu0 %1650 }
 0x100   :  { %v1641_v29 = vpop.permute.xlu1 %1640  ;;  %v1787_v5 = vsel %vm504_vm4, %v1770_v0, %v1651_v25 }
 0x101   :  { %v1364_v51 = vcombine.low %v1356_v3, %v1363_v26  ;;  %v1777_v2 = vsel %vm504_vm4, %v1755_v63, %v1641_v29 }
 0x103   :  { %2975 = vmatmul.mubr.msk.bf16.vlgmr.msra.gmra.mrb[0].mxu1 %vm785_vm13, %v1364_v51  ;;  %v1735_v40 = vpop.permute.xlu0 %1734 }
 0x104   :  { %v1645_v34 = vpop.permute.xlu1 %1644  ;;  %2987 = vmatpush3.bf16.msra.mxu1 %v3574_v44  ;;  %v1791_v41 = vsel %vm521_vm5, %v1775_v54, %v1735_v40 }
 0x105   :  { %2988 = vmatprep.subr.bf16.mxu1 %v3102_v33  ;;  %v1820_v35 = vrot.slane %v1791_v41, %v3329_v11  ;;  %v1781_v17 = vsel %vm504_vm4, %v1761_v15, %v1645_v34 }
 0x107   :  { %v1879_v52 = vshrl.u32 %v1820_v35, 16  ;;  %v1882_v53 = vshll.u32 %v1820_v35, 16  ;;  %v1739_v44 = vpop.permute.xlu0 %1738  ;;  %v1821_v23 = vcombine.high %v1820_v35, %v1820_v35 }
 0x108   :  { %v1649_v49 = vpop.permute.xlu1 %1648  ;;  %2989 = vmatpush3.bf16.msra.mxu1 %v3102_v33  ;;  %v1795_v43 = vsel %vm521_vm5, %v1779_v6, %v1739_v44 }
 0x109   :  { %v1836_v57 = vrot.slane %v1795_v43, %v3329_v11  ;;  %v1881_v48 = vrot.slane %v1879_v52, 6  ;;  %v1884_v16 = vrot.slane %v1882_v53, 7  ;;  %v1888_v37 = vshll.u32 %v1821_v23, 16 }
 0x10a   :  { %v1785_v3 = vsel %vm504_vm4, %v1767_v4, %v1649_v49 }
 0x10b   :  { %v1907_v45 = vshrl.u32 %v1836_v57, 16  ;;  %v1743_v36 = vpop.permute.xlu0 %1742  ;;  %v1910_v62 = vshll.u32 %v1836_v57, 16  ;;  %v1837_v24 = vcombine.high %v1836_v57, %v1836_v57  ;;  %v1885_v7 = vor.u32 %v1884_v16, %v1881_v48 }
 0x10c   :  { %v1653_v55 = vpop.permute.xlu1 %1652  ;;  %v1799_v46 = vsel %vm521_vm5, %v1783_v39, %v1743_v36  ;;  %v1890_v41 = vrot.slane %v1888_v37, 7 }
 0x10d   :  { %v1852_v60 = vrot.slane %v1799_v46, %v3329_v11  ;;  %v1909_v8 = vrot.slane %v1907_v45, 6  ;;  %v1912_v61 = vrot.slane %v1910_v62, 7  ;;  %v3705_v26 = vshll.u32 %v1837_v24, 16 }
 0x10e   :  { %v1886_v25 = vrot.slane %v1885_v7, 2  ;;  %v1789_v34 = vsel %vm504_vm4, %v1773_v18, %v1653_v55 }
 0x10f   :  { %v1747_v10 = vpop.permute.xlu0 %1746  ;;  %v1935_v28 = vshrl.u32 %v1852_v60, 16  ;;  %v1938_v12 = vshll.u32 %v1852_v60, 16  ;;  %v1913_v51 = vor.u32 %v1912_v61, %v1909_v8  ;;  %v1853_v33 = vcombine.high %v1852_v60, %v1852_v60 }
 0x110   :  { %v1737_v21 = vpop.permute.xlu1 %1736  ;;  %v1803_v9 = vsel %vm521_vm5, %v1787_v5, %v1747_v10  ;;  %v1918_v49 = vrot.slane %v3705_v26, 7  ;;  %v1891_v13 = vsel %vm3467_vm12, %v1886_v25, %v1890_v41 }
 0x111   :  { %v1793_v14 = vsel %vm521_vm5, %v1777_v2, %v1737_v21  ;;  %v1868_v29 = vrot.slane %v1803_v9, %v3329_v11  ;;  %v1937_v38 = vrot.slane %v1935_v28, 6  ;;  %v1940_v19 = vrot.slane %v1938_v12, 7 }
 0x112   :  { %v1828_v22 = vrot.slane %v1793_v14, %v3329_v11  ;;  %v1914_v44 = vrot.slane %v1913_v51, 2  ;;  %v1944_v43 = vshll.u32 %v1853_v33, 16 }
 0x113   :  { %v3708_v42 = vpop.permute.xlu0 %2261  ;;  %v1963_v6 = vshrl.u32 %v1868_v29, 16  ;;  %v1966_v52 = vshll.u32 %v1868_v29, 16  ;;  %v1941_v27 = vor.u32 %v1940_v19, %v1937_v38  ;;  %v1869_v46 = vcombine.high %v1868_v29, %v1868_v29 }
 0x114   :  { %v1741_v30 = vpop.permute.xlu1 %1740  ;;  %v1893_v32 = vshrl.u32 %v1828_v22, 16  ;;  %v1829_v54 = vcombine.high %v1828_v22, %v1828_v22  ;;  %v1896_v40 = vshll.u32 %v1828_v22, 16  ;;  %v1919_v51 = vsel %vm3467_vm12, %v1914_v44, %v1918_v49 }
 0x115   :  { %v1797_v31 = vsel %vm521_vm5, %v1781_v17, %v1741_v30  ;;  %v1965_v63 = vrot.slane %v1963_v6, 6  ;;  %v1968_v23 = vrot.slane %v1966_v52, 7  ;;  %v1942_v8 = vrot.slane %v1941_v27, 2 }
 0x116   :  { %v1895_v35 = vrot.slane %v1893_v32, 6  ;;  %v1898_v50 = vrot.slane %v1896_v40, 7  ;;  %v1844_v57 = vrot.slane %v1797_v31, %v3329_v11  ;;  %v1902_v59 = vshll.u32 %v1829_v54, 16 }
 0x117   :  { %v3714_v58 = vpop.permute.xlu0 %2265  ;;  %v1969_v12 = vor.u32 %v1968_v23, %v1965_v63  ;;  %v1972_v29 = vshll.u32 %v1869_v46, 16  ;;  %v1946_v31 = vrot.slane %v1944_v43, 7 }
 0x118   :  { %v1745_v53 = vpop.permute.xlu1 %1744  ;;  %v1899_v55 = vor.u32 %v1898_v50, %v1895_v35  ;;  %v1845_v48 = vcombine.high %v1844_v57, %v1844_v57  ;;  %v1921_v16 = vshrl.u32 %v1844_v57, 16  ;;  %v1924_v45 = vshll.u32 %v1844_v57, 16 }
 0x119   :  { %v1801_v39 = vsel %vm521_vm5, %v1785_v3, %v1745_v53  ;;  %v1904_v24 = vrot.slane %v1902_v59, 7  ;;  %v1970_v50 = vrot.slane %v1969_v12, 2  ;;  %v1947_v57 = vsel %vm3467_vm12, %v1942_v8, %v1946_v31 }
 0x11a   :  { %v1860_v36 = vrot.slane %v1801_v39, %v3329_v11  ;;  %v1900_v62 = vrot.slane %v1899_v55, 2  ;;  %v1923_v15 = vrot.slane %v1921_v16, 6  ;;  %v1926_v0 = vrot.slane %v1924_v45, 7 }
 0x11b   :  { %v1930_v1 = vshll.u32 %v1845_v48, 16  ;;  %v3720_v2 = vpop.permute.xlu0 %2269 }
 0x11c   :  { %v1749_v60 = vpop.permute.xlu1 %1748  ;;  %v1861_v47 = vcombine.high %v1860_v36, %v1860_v36  ;;  %v1949_v21 = vshrl.u32 %v1860_v36, 16  ;;  %v1952_v5 = vshll.u32 %v1860_v36, 16  ;;  %v1927_v61 = vor.u32 %v1926_v0, %v1923_v15 }
 0x11d   :  { %v1805_v7 = vsel %vm521_vm5, %v1789_v34, %v1749_v60  ;;  %v1905_v18 = vsel %vm3467_vm12, %v1900_v62, %v1904_v24  ;;  %v1932_v22 = vrot.slane %v1930_v1, 7 }
 0x11e   :  { %v1958_v10 = vshll.u32 %v1861_v47, 16  ;;  %v1876_v28 = vrot.slane %v1805_v7, %v3329_v11  ;;  %v1951_v14 = vrot.slane %v1949_v21, 6  ;;  %v1954_v9 = vrot.slane %v1952_v5, 7  ;;  %v2149_v47 = vld [vmem:[#allocation2 + $0x8] sm:$0x6] }
 0x11f   :  { %v1928_v37 = vrot.slane %v1927_v61, 2  ;;  %v3728_v26 = vpop.permute.xlu0 %2273  ;;  %v1995_v19 = vcombine.low %v1891_v13, %v1905_v18  ;;  %v1974_v13 = vrot.slane %v1972_v29, 7  ;;  %v2415_v20 = vsel %vm479_vm3, %v2149_v47, %v3708_v42  ;;  %v2151_v21 = vld [vmem:[#allocation2 + $0x10] sm:$0x6]  ;;  %v2153_v42 = vld [vmem:[#allocation2 + $0x20] sm:$0x6] }
 0x120   :  { %v3724_v4 = vpop.permute.xlu1 %2263  ;;  %v1877_v17 = vcombine.high %v1876_v28, %v1876_v28  ;;  %v1977_v3 = vshrl.u32 %v1876_v28, 16  ;;  %v1955_v30 = vor.u32 %v1954_v9, %v1951_v14  ;;  %v1980_v25 = vshll.u32 %v1876_v28, 16  ;;  %v2150_v28 = vld [vmem:[#allocation2 + $0xc] sm:$0x6] }
 0x121   :  { %v1960_v33 = vrot.slane %v1958_v10, 7  ;;  %v1933_v38 = vsel %vm3467_vm12, %v1928_v37, %v1932_v22  ;;  %v2003_v49 = vrot.slane %v1995_v19, %v3329_v11  ;;  %v1975_v16 = vsel %vm3467_vm12, %v1970_v50, %v1974_v13 }
 0x122   :  { %v1979_v32 = vrot.slane %v1977_v3, 6  ;;  %v1956_v54 = vrot.slane %v1955_v30, 2  ;;  %v1982_v40 = vrot.slane %v1980_v25, 7  ;;  %v1986_v41 = vshll.u32 %v1877_v17, 16  ;;  %v2155_v17 = vld [vmem:[#allocation2 + $0x28] sm:$0x6] }
 0x123   :  { %v1996_v35 = vcombine.low %v1919_v51, %v1933_v38  ;;  %v2302_v6 = vpop.permute.xlu0 %2301  ;;  %v2421_v10 = vsel %vm479_vm3, %v2151_v21, %v3714_v58  ;;  %v2418_v22 = vsel %vm479_vm3, %v2150_v28, %v3724_v4  ;;  %v2152_v3 = vld [vmem:[#allocation2 + $0x14] sm:$0x6]  ;;  %v2427_v25 = vsel %vm479_vm3, %v2153_v42, %v3720_v2 }
 0x124   :  { %v2268_v34 = vpop.permute.xlu1 %2267  ;;  %v1961_v52 = vsel %vm3467_vm12, %v1956_v54, %v1960_v33  ;;  %v1983_v53 = vor.u32 %v1982_v40, %v1979_v32  ;;  %v1988_v55 = vrot.slane %v1986_v41, 7  ;;  %v2438_v7 = vsel %vm504_vm4, %v2415_v20, %v2302_v6  ;;  %v2154_v32 = vld [vmem:[#allocation2 + $0x24] sm:$0x6] }
 0x125   :  { %v2010_v44 = vrot.slane %v1996_v35, %v3329_v11  ;;  %v2012_v48 = vcombine.low %v1947_v57, %v1961_v52  ;;  %v2433_v4 = vsel %vm479_vm3, %v2155_v17, %v3728_v26  ;;  %v2424_v40 = vsel %vm479_vm3, %v2152_v3, %v2268_v34  ;;  %v2156_v57 = vld [vmem:[#allocation2 + $0x2c] sm:$0x6] }
 0x126   :  { %v1984_v27 = vrot.slane %v1983_v53, 2 }
 0x127   :  { %v2011_v59 = vcombine.low %v2003_v49, %v2010_v44  ;;  %v2306_v43 = vpop.permute.xlu0 %2305  ;;  %v2020_v63 = vrot.slane %v2012_v48, %v3329_v11 }
 0x128   :  { %v2272_v39 = vpop.permute.xlu1 %2271  ;;  %v1989_v45 = vsel %vm3467_vm12, %v1984_v27, %v1988_v55  ;;  %v2442_v12 = vsel %vm504_vm4, %v2421_v10, %v2306_v43 }
 0x129   :  { %2982 = vmatprep.mubr.msk.bf16.mxu0 %vm785_vm13, %v2011_v59  ;;  %v2013_v36 = vcombine.low %v1975_v16, %v1989_v45  ;;  %v2430_v52 = vsel %vm479_vm3, %v2154_v32, %v2272_v39 }
 0x12b   :  { %v2310_v46 = vpop.permute.xlu0 %2309  ;;  %v2027_v23 = vrot.slane %v2013_v36, %v3329_v11 }
 0x12c   :  { %v3745_v62 = vpop.permute.xlu1 %2275  ;;  %v2446_v38 = vsel %vm504_vm4, %v2427_v25, %v2310_v46 }
 0x12d   :  { %v2028_v60 = vcombine.low %v2020_v63, %v2027_v23  ;;  %v2436_v36 = vsel %vm479_vm3, %v2156_v57, %v3745_v62  ;;  %vm890_vm3 = vcmask 27648  }
 0x12f   :  { %2983 = vmatmul.mubr.msk.bf16.vlgmr.msra.gmra.mrb[4].mxu0 %vm785_vm13, %v2028_v60  ;;  %v2314_v0 = vpop.permute.xlu0 %2313 }
 0x130   :  { %v2304_v15 = vpop.permute.xlu1 %2303  ;;  %v2450_v35 = vsel %vm504_vm4, %v2433_v4, %v2314_v0 }
 0x131   :  { %v2440_v29 = vsel %vm504_vm4, %v2418_v22, %v2304_v15 }
 0x133   :  { %v2398_v24 = vpop.permute.xlu0 %2397 }
 0x134   :  { %v2308_v1 = vpop.permute.xlu1 %2307  ;;  %v2454_v61 = vsel %vm521_vm5, %v2438_v7, %v2398_v24 }
 0x135   :  { %v2483_v9 = vrot.slane %v2454_v61, %v3329_v11  ;;  %v2444_v2 = vsel %vm504_vm4, %v2424_v40, %v2308_v1  ;;  %v3813_v40 = vld [vmem:[%s3937_s4] ss:$0 sm:$0xff] }
 0x137   :  { %v2402_v8 = vpop.permute.xlu0 %2401  ;;  %v2484_v51 = vcombine.high %v2483_v9, %v2483_v9  ;;  %v2898_v55 = vrot.slane %v2483_v9, 9 }
 0x138   :  { %v2312_v5 = vpop.permute.xlu1 %2311  ;;  %v2458_v18 = vsel %vm521_vm5, %v2442_v12, %v2402_v8 }
 0x139   :  { %v2499_v30 = vrot.slane %v2458_v18, %v3329_v11  ;;  %v2543_v53 = vrot.slane %v2484_v51, 7  ;;  %v2448_v59 = vsel %vm504_vm4, %v2430_v52, %v2312_v5 }
 0x13b   :  { %v2406_v37 = vpop.permute.xlu0 %2405  ;;  %v2500_v31 = vcombine.high %v2499_v30, %v2499_v30  ;;  %v2544_v46 = vsel %vm3607_vm7, %v2898_v55, %v2543_v53  ;;  %v2900_v63 = vrot.slane %v2499_v30, 9 }
 0x13c   :  { %v2316_v14 = vpop.permute.xlu1 %2315  ;;  %v2462_v41 = vsel %vm521_vm5, %v2446_v38, %v2406_v37 }
 0x13d   :  { %v2515_v26 = vrot.slane %v2462_v41, %v3329_v11  ;;  %v2551_v48 = vrot.slane %v2500_v31, 7  ;;  %v2452_v47 = vsel %vm504_vm4, %v2436_v36, %v2316_v14  ;;  %vm841_vm4 = vcmask 31744  }
 0x13f   :  { %v2410_v54 = vpop.permute.xlu0 %2409  ;;  %v2516_v60 = vcombine.high %v2515_v26, %v2515_v26  ;;  %v2552_v20 = vsel %vm3607_vm7, %v2900_v63, %v2551_v48  ;;  %v2902_v37 = vrot.slane %v2515_v26, 9 }
 0x140   :  { %v2400_v58 = vpop.permute.xlu1 %2399  ;;  %v2466_v49 = vsel %vm521_vm5, %v2450_v35, %v2410_v54 }
 0x141   :  { %v2456_v33 = vsel %vm521_vm5, %v2440_v29, %v2400_v58  ;;  %v2531_v39 = vrot.slane %v2466_v49, %v3329_v11  ;;  %v2559_v10 = vrot.slane %v2516_v60, 7 }
 0x142   :  { %v2491_v19 = vrot.slane %v2456_v33, %v3329_v11 }
 0x143   :  { %v2532_v21 = vcombine.high %v2531_v39, %v2531_v39  ;;  %v2560_v29 = vsel %vm3607_vm7, %v2902_v37, %v2559_v10  ;;  %v2904_v30 = vrot.slane %v2531_v39, 9 }
 0x144   :  { %v2492_v50 = vcombine.high %v2491_v19, %v2491_v19  ;;  %v2404_v6 = vpop.permute.xlu1 %2403  ;;  %v2899_v34 = vrot.slane %v2491_v19, 9 }
 0x145   :  { %v2460_v44 = vsel %vm521_vm5, %v2444_v2, %v2404_v6  ;;  %v2567_v42 = vrot.slane %v2532_v21, 7 }
 0x146   :  { %v2547_v13 = vrot.slane %v2492_v50, 7  ;;  %v2507_v27 = vrot.slane %v2460_v44, %v3329_v11 }
 0x147   :  { %v2568_v33 = vsel %vm3607_vm7, %v2904_v30, %v2567_v42 }
 0x148   :  { %v2548_v43 = vsel %vm3607_vm7, %v2899_v34, %v2547_v13  ;;  %v2508_v16 = vcombine.high %v2507_v27, %v2507_v27  ;;  %v2408_v45 = vpop.permute.xlu1 %2407  ;;  %v2901_v15 = vrot.slane %v2507_v27, 9 }
 0x149   :  { %v2464_v23 = vsel %vm521_vm5, %v2448_v59, %v2408_v45  ;;  %v2578_v24 = vcombine.low %v2544_v46, %v2548_v43 }
 0x14a   :  { %v2555_v0 = vrot.slane %v2508_v16, 7  ;;  %v2523_v1 = vrot.slane %v2464_v23, %v3329_v11 }
 0x14b   :  { %v2586_v14 = vrot.slane %v2578_v24, %v3329_v11 }
 0x14c   :  { %v2556_v62 = vsel %vm3607_vm7, %v2901_v15, %v2555_v0  ;;  %v2524_v5 = vcombine.high %v2523_v1, %v2523_v1  ;;  %v2412_v7 = vpop.permute.xlu1 %2411  ;;  %v2903_v28 = vrot.slane %v2523_v1, 9 }
 0x14d   :  { %v2579_v8 = vcombine.low %v2552_v20, %v2556_v62  ;;  %v2468_v61 = vsel %vm521_vm5, %v2452_v47, %v2412_v7  ;;  %vm2732_vm5 = vcmask 24576  }
 0x14e   :  { %v2563_v12 = vrot.slane %v2524_v5, 7  ;;  %v2539_v9 = vrot.slane %v2468_v61, %v3329_v11 }
 0x14f   :  { %v2593_v18 = vrot.slane %v2579_v8, %v3329_v11 }
 0x150   :  { %v2564_v22 = vsel %vm3607_vm7, %v2903_v28, %v2563_v12  ;;  %v2540_v17 = vcombine.high %v2539_v9, %v2539_v9  ;;  %v2905_v58 = vrot.slane %v2539_v9, 9 }
 0x151   :  { %v2594_v3 = vcombine.low %v2586_v14, %v2593_v18  ;;  %v2595_v51 = vcombine.low %v2560_v29, %v2564_v22 }
 0x152   :  { %v2571_v25 = vrot.slane %v2540_v17, 7 }
 0x153   :  { %2990 = vmatprep.mubr.msk.bf16.mxu1 %vm785_vm13, %v2594_v3  ;;  %v2603_v19 = vrot.slane %v2595_v51, %v3329_v11 }
 0x154   :  { %v2572_v32 = vsel %vm3607_vm7, %v2905_v58, %v2571_v25 }
 0x155   :  { %v2596_v38 = vcombine.low %v2568_v33, %v2572_v32 }
 0x157   :  { %v2610_v54 = vrot.slane %v2596_v38, %v3329_v11 }
 0x159   :  { %v2611_v4 = vcombine.low %v2603_v19, %v2610_v54 }
 0x15b   :  { %2991 = vmatmul.mubr.msk.bf16.vlgmr.msra.gmra.mrb[4].mxu1 %vm785_vm13, %v2611_v4 }
 0x1a2   :  { %v2968_v41 = vpop.f32.mrb[0].mxu0 }
 0x1a3   :  { %v835_v35 = vadd.f32 %v2968_v41, %v3813_v40  ;;  %v826_v2 = vpop.f32.mrb[1].mxu0 }
 0x1a4   :  { %v827_v56 = vadd.f32 %v3813_v40, %v826_v2  ;;  %v2969_v31 = vpop.f32.mrb[2].mxu0 }
 0x1a5   :  { %v2932_v50 = vpack.c.bf16 %v835_v35, %v835_v35  ;;  %v838_v11 = vadd.f32 %v2969_v31, %v3813_v40  ;;  %v829_v6 = vpop.f32.mrb[3].mxu0  ;;  %v858_v44 = vmul.f32 %v835_v35, %v835_v35  ;;  %v845_v59 = vsel %vm841_vm4, %v835_v35, 0.0 }
 0x1a6   :  { %v856_v52 = vmul.f32 %v827_v56, %v827_v56  ;;  %v2930_v53 = vpack.c.bf16 %v827_v56, %v827_v56  ;;  %v830_v49 = vadd.f32 %v3813_v40, %v829_v6  ;;  %v842_v26 = vsel %vm841_vm4, %v827_v56, 0.0 }
 0x1a7   :  { %893 = vst.msk [vmem:[%s3938_s5 + $0x20] sm:$0xf] %vm890_vm3, %v2932_v50  ;;  %v2933_v57 = vpack.c.bf16 %v838_v11, %v838_v11  ;;  %v859_v43 = vmul.f32 %v838_v11, %v838_v11  ;;  %v863_v36 = vsel %vm841_vm4, %v858_v44, 0.0  ;;  %v847_v46 = vsel %vm841_vm4, %v838_v11, 0.0 }
 0x1a8   :  { %891 = vst.msk [vmem:[%s3938_s5] sm:$0xf] %vm890_vm3, %v2930_v53  ;;  %v843_v34 = vsel %vm841_vm4, %v830_v49, 0.0  ;;  %v857_v13 = vmul.f32 %v830_v49, %v830_v49  ;;  %v2931_v27 = vpack.c.bf16 %v830_v49, %v830_v49  ;;  %v860_v48 = vsel %vm841_vm4, %v856_v52, 0.0 }
 0x1a9   :  { %894 = vst.msk [vmem:[%s3938_s5 + $0x24] sm:$0xf] %vm890_vm3, %v2933_v57  ;;  %v844_v55 = vadd.f32 %v843_v34, %v842_v26  ;;  %v865_v60 = vsel %vm841_vm4, %v859_v43, 0.0 }
 0x1aa   :  { %v861_v39 = vsel %vm841_vm4, %v857_v13, 0.0  ;;  %892 = vst.msk [vmem:[%s3938_s5 + $0x4] sm:$0xf] %vm890_vm3, %v2931_v27 }
 0x1ab   :  { %v846_v16 = vadd.f32 %v845_v59, %v844_v55  ;;  %v862_v45 = vadd.f32 %v861_v39, %v860_v48 }
 0x1ad   :  { %v848_v63 = vadd.f32 %v847_v46, %v846_v16  ;;  %v864_v23 = vadd.f32 %v863_v36, %v862_v45 }
 0x1af   :  { %v866_v15 = vadd.f32 %v865_v60, %v864_v23  ;;  %v849_v21 = vrot.slane %v848_v63, 4 }
 0x1b1   :  { %v867_v28 = vrot.slane %v866_v15, 4  ;;  %v850_v22 = vadd.f32 %v849_v21, %v848_v63 }
 0x1b3   :  { %v868_v25 = vadd.f32 %v867_v28, %v866_v15  ;;  %v851_v19 = vrot.slane %v850_v22, 2 }
 0x1b5   :  { %v869_v35 = vrot.slane %v868_v25, 2  ;;  %v852_v31 = vadd.f32 %v851_v19, %v850_v22 }
 0x1b7   :  { %v870_v6 = vadd.f32 %v869_v35, %v868_v25  ;;  %v853_v49 = vrot.slane %v852_v31, 1 }
 0x1b9   :  { %v871_v26 = vrot.slane %v870_v6, 1  ;;  %v854_v27 = vadd.f32 %v853_v49, %v852_v31 }
 0x1bb   :  { %v872_v48 = vadd.f32 %v871_v26, %v870_v6 }
 0x1d6   :  { %v2976_v0 = vpop.f32.mrb[0].mxu1 }
 0x1d7   :  { %v1426_v1 = vadd.f32 %v2976_v0, %v3813_v40  ;;  %v1417_v47 = vpop.f32.mrb[1].mxu1 }
 0x1d8   :  { %v1418_v24 = vadd.f32 %v3813_v40, %v1417_v47  ;;  %v2977_v20 = vpop.f32.mrb[2].mxu1 }
 0x1d9   :  { %v2936_v62 = vpack.c.bf16 %v1426_v1, %v1426_v1  ;;  %v1429_v5 = vadd.f32 %v2977_v20, %v3813_v40  ;;  %v1420_v7 = vpop.f32.mrb[3].mxu1  ;;  %v1448_v12 = vmul.f32 %v1426_v1, %v1426_v1  ;;  %v1435_v3 = vsel %vm841_vm4, %v1426_v1, 0.0 }
 0x1da   :  { %v1446_v8 = vmul.f32 %v1418_v24, %v1418_v24  ;;  %v2934_v61 = vpack.c.bf16 %v1418_v24, %v1418_v24  ;;  %v1421_v10 = vadd.f32 %v3813_v40, %v1420_v7  ;;  %v1432_v14 = vsel %vm841_vm4, %v1418_v24, 0.0 }
 0x1db   :  { %2832 = vst.msk [vmem:[%s3938_s5 + $0x28] sm:$0xf] %vm890_vm3, %v2936_v62  ;;  %v2937_v9 = vpack.c.bf16 %v1429_v5, %v1429_v5  ;;  %v1449_v30 = vmul.f32 %v1429_v5, %v1429_v5  ;;  %v1453_v32 = vsel %vm841_vm4, %v1448_v12, 0.0  ;;  %v1437_v38 = vsel %vm841_vm4, %v1429_v5, 0.0 }
 0x1dc   :  { %2830 = vst.msk [vmem:[%s3938_s5 + $0x8] sm:$0xf] %vm890_vm3, %v2934_v61  ;;  %v1433_v18 = vsel %vm841_vm4, %v1421_v10, 0.0  ;;  %v1447_v37 = vmul.f32 %v1421_v10, %v1421_v10  ;;  %v2935_v42 = vpack.c.bf16 %v1421_v10, %v1421_v10  ;;  %v1450_v29 = vsel %vm841_vm4, %v1446_v8, 0.0 }
 0x1dd   :  { %2833 = vst.msk [vmem:[%s3938_s5 + $0x2c] sm:$0xf] %vm890_vm3, %v2937_v9  ;;  %v1434_v17 = vadd.f32 %v1433_v18, %v1432_v14  ;;  %v1455_v41 = vsel %vm841_vm4, %v1449_v30, 0.0 }
 0x1de   :  { %v1451_v58 = vsel %vm841_vm4, %v1447_v37, 0.0  ;;  %2831 = vst.msk [vmem:[%s3938_s5 + $0xc] sm:$0xf] %vm890_vm3, %v2935_v42 }
 0x1df   :  { %v1436_v51 = vadd.f32 %v1435_v3, %v1434_v17  ;;  %v1452_v33 = vadd.f32 %v1451_v58, %v1450_v29 }
 0x1e1   :  { %v1438_v54 = vadd.f32 %v1437_v38, %v1436_v51  ;;  %v1454_v4 = vadd.f32 %v1453_v32, %v1452_v33 }
 0x1e3   :  { %v1439_v2 = vrot.slane %v1438_v54, 4  ;;  %v1456_v56 = vadd.f32 %v1455_v41, %v1454_v4 }
 0x1e5   :  { %v1440_v50 = vadd.f32 %v1439_v2, %v1438_v54  ;;  %v1457_v11 = vrot.slane %v1456_v56, 4 }
 0x1e7   :  { %v1441_v52 = vrot.slane %v1440_v50, 2  ;;  %v1458_v53 = vadd.f32 %v1457_v11, %v1456_v56 }
 0x1e9   :  { %v1442_v44 = vadd.f32 %v1441_v52, %v1440_v50  ;;  %v1459_v57 = vrot.slane %v1458_v53, 2 }
 0x1eb   :  { %v1443_v34 = vrot.slane %v1442_v44, 1  ;;  %v1460_v13 = vadd.f32 %v1459_v57, %v1458_v53 }
 0x1ed   :  { %v1444_v55 = vadd.f32 %v1443_v34, %v1442_v44  ;;  %v1461_v59 = vrot.slane %v1460_v13, 1 }
 0x1ef   :  { %v1445_v43 = vadd.f32 %v1444_v55, %v854_v27  ;;  %v1462_v39 = vadd.f32 %v1461_v59, %v1460_v13 }
 0x1f1   :  { %v1463_v16 = vadd.f32 %v1462_v39, %v872_v48 }
 0x202   :  { %v2984_v45 = vpop.f32.mrb[4].mxu0 }
 0x203   :  { %v2090_v36 = vadd.f32 %v2984_v45, %v3813_v40  ;;  %v2081_v46 = vpop.f32.mrb[5].mxu0 }
 0x204   :  { %v2082_v63 = vadd.f32 %v3813_v40, %v2081_v46  ;;  %v2985_v23 = vpop.f32.mrb[6].mxu0 }
 0x205   :  { %v2940_v60 = vpack.c.bf16 %v2090_v36, %v2090_v36  ;;  %v2093_v15 = vadd.f32 %v2985_v23, %v3813_v40  ;;  %v2084_v0 = vpop.f32.mrb[7].mxu0  ;;  %v2112_v20 = vmul.f32 %v2090_v36, %v2090_v36  ;;  %v2099_v10 = vsel %vm841_vm4, %v2090_v36, 0.0 }
 0x206   :  { %v2110_v1 = vmul.f32 %v2082_v63, %v2082_v63  ;;  %v2938_v47 = vpack.c.bf16 %v2082_v63, %v2082_v63  ;;  %v2085_v24 = vadd.f32 %v3813_v40, %v2084_v0  ;;  %v2096_v62 = vsel %vm841_vm4, %v2082_v63, 0.0 }
 0x207   :  { %2872 = vst.msk [vmem:[%s3938_s5 + $0x30] sm:$0xf] %vm890_vm3, %v2940_v60  ;;  %v2941_v21 = vpack.c.bf16 %v2093_v15, %v2093_v15  ;;  %v2113_v12 = vmul.f32 %v2093_v15, %v2093_v15  ;;  %v2117_v37 = vsel %vm841_vm4, %v2112_v20, 0.0  ;;  %v2101_v42 = vsel %vm841_vm4, %v2093_v15, 0.0 }
 0x208   :  { %2870 = vst.msk [vmem:[%s3938_s5 + $0x10] sm:$0xf] %vm890_vm3, %v2938_v47  ;;  %v2097_v5 = vsel %vm841_vm4, %v2085_v24, 0.0  ;;  %v2111_v7 = vmul.f32 %v2085_v24, %v2085_v24  ;;  %v2939_v8 = vpack.c.bf16 %v2085_v24, %v2085_v24  ;;  %v2114_v28 = vsel %vm841_vm4, %v2110_v1, 0.0 }
 0x209   :  { %2873 = vst.msk [vmem:[%s3938_s5 + $0x34] sm:$0xf] %vm890_vm3, %v2941_v21  ;;  %v2098_v61 = vadd.f32 %v2097_v5, %v2096_v62  ;;  %v2119_v3 = vsel %vm841_vm4, %v2113_v12, 0.0 }
 0x20a   :  { %v2115_v9 = vsel %vm841_vm4, %v2111_v7, 0.0  ;;  %2871 = vst.msk [vmem:[%s3938_s5 + $0x14] sm:$0xf] %vm890_vm3, %v2939_v8 }
 0x20b   :  { %v2100_v14 = vadd.f32 %v2099_v10, %v2098_v61  ;;  %v2116_v18 = vadd.f32 %v2115_v9, %v2114_v28 }
 0x20d   :  { %v2102_v22 = vadd.f32 %v2101_v42, %v2100_v14  ;;  %v2118_v17 = vadd.f32 %v2117_v37, %v2116_v18 }
 0x20f   :  { %v2103_v29 = vrot.slane %v2102_v22, 4  ;;  %v2120_v30 = vadd.f32 %v2119_v3, %v2118_v17 }
 0x211   :  { %v2104_v58 = vadd.f32 %v2103_v29, %v2102_v22  ;;  %v2121_v25 = vrot.slane %v2120_v30, 4 }
 0x213   :  { %v2105_v51 = vrot.slane %v2104_v58, 2  ;;  %v2122_v33 = vadd.f32 %v2121_v25, %v2120_v30 }
 0x215   :  { %v2106_v32 = vadd.f32 %v2105_v51, %v2104_v58  ;;  %v2123_v38 = vrot.slane %v2122_v33, 2 }
 0x217   :  { %v2107_v19 = vrot.slane %v2106_v32, 1  ;;  %v2124_v54 = vadd.f32 %v2123_v38, %v2122_v33 }
 0x219   :  { %v2108_v4 = vadd.f32 %v2107_v19, %v2106_v32  ;;  %v2125_v41 = vrot.slane %v2124_v54, 1 }
 0x21b   :  { %v2109_v35 = vadd.f32 %v2108_v4, %v1445_v43  ;;  %v2126_v2 = vadd.f32 %v2125_v41, %v2124_v54 }
 0x21d   :  { %v2127_v56 = vadd.f32 %v2126_v2, %v1463_v16 }
 0x22e   :  { %v2992_v31 = vpop.f32.mrb[4].mxu1 }
 0x22f   :  { %v2673_v50 = vadd.f32 %v2992_v31, %v3813_v40  ;;  %v2664_v11 = vpop.f32.mrb[5].mxu1 }
 0x230   :  { %v2665_v6 = vadd.f32 %v3813_v40, %v2664_v11  ;;  %v2993_v52 = vpop.f32.mrb[6].mxu1 }
 0x231   :  { %v2944_v53 = vpack.c.bf16 %v2673_v50, %v2673_v50  ;;  %v2676_v49 = vadd.f32 %v2993_v52, %v3813_v40  ;;  %v2667_v44 = vpop.f32.mrb[7].mxu1  ;;  %v2695_v13 = vmul.f32 %v2673_v50, %v2673_v50  ;;  %v2682_v39 = vsel %vm841_vm4, %v2673_v50, 0.0 }
 0x232   :  { %v2693_v57 = vmul.f32 %v2665_v6, %v2665_v6  ;;  %v2942_v26 = vpack.c.bf16 %v2665_v6, %v2665_v6  ;;  %v2668_v34 = vadd.f32 %v3813_v40, %v2667_v44  ;;  %v2679_v55 = vsel %vm841_vm4, %v2665_v6, 0.0 }
 0x233   :  { %2920 = vst.msk [vmem:[%s3938_s5 + $0x38] sm:$0xf] %vm890_vm3, %v2944_v53  ;;  %v2945_v27 = vpack.c.bf16 %v2676_v49, %v2676_v49  ;;  %v2696_v45 = vmul.f32 %v2676_v49, %v2676_v49  ;;  %v2700_v23 = vsel %vm841_vm4, %v2695_v13, 0.0  ;;  %v2684_v60 = vsel %vm841_vm4, %v2676_v49, 0.0 }
 0x234   :  { %2918 = vst.msk [vmem:[%s3938_s5 + $0x18] sm:$0xf] %vm890_vm3, %v2942_v26  ;;  %v2680_v59 = vsel %vm841_vm4, %v2668_v34, 0.0  ;;  %v2694_v48 = vmul.f32 %v2668_v34, %v2668_v34  ;;  %v2943_v43 = vpack.c.bf16 %v2668_v34, %v2668_v34  ;;  %v2697_v16 = vsel %vm841_vm4, %v2693_v57, 0.0 }
 0x235   :  { %2921 = vst.msk [vmem:[%s3938_s5 + $0x3c] sm:$0xf] %vm890_vm3, %v2945_v27  ;;  %v2681_v40 = vadd.f32 %v2680_v59, %v2679_v55  ;;  %v2702_v1 = vsel %vm841_vm4, %v2696_v45, 0.0 }
 0x236   :  { %v2698_v36 = vsel %vm841_vm4, %v2694_v48, 0.0  ;;  %2919 = vst.msk [vmem:[%s3938_s5 + $0x1c] sm:$0xf] %vm890_vm3, %v2943_v43 }
 0x237   :  { %v2683_v46 = vadd.f32 %v2682_v39, %v2681_v40  ;;  %v2699_v63 = vadd.f32 %v2698_v36, %v2697_v16 }
 0x239   :  { %v2685_v15 = vadd.f32 %v2684_v60, %v2683_v46  ;;  %v2701_v0 = vadd.f32 %v2700_v23, %v2699_v63 }
 0x23b   :  { %v2686_v47 = vrot.slane %v2685_v15, 4  ;;  %v2703_v24 = vadd.f32 %v2702_v1, %v2701_v0 }
 0x23d   :  { %v2687_v20 = vadd.f32 %v2686_v47, %v2685_v15  ;;  %v2704_v21 = vrot.slane %v2703_v24, 4 }
 0x23f   :  { %v2688_v62 = vrot.slane %v2687_v20, 2  ;;  %v2705_v5 = vadd.f32 %v2704_v21, %v2703_v24 }
 0x241   :  { %v2689_v7 = vadd.f32 %v2688_v62, %v2687_v20  ;;  %v2706_v8 = vrot.slane %v2705_v5, 2 }
 0x243   :  { %v2690_v61 = vrot.slane %v2689_v7, 1  ;;  %v2707_v10 = vadd.f32 %v2706_v8, %v2705_v5 }
 0x245   :  { %v2691_v28 = vadd.f32 %v2690_v61, %v2689_v7  ;;  %v2708_v12 = vrot.slane %v2707_v10, 1 }
 0x247   :  { %v2692_v9 = vadd.f32 %v2691_v28, %v2109_v35  ;;  %v2709_v14 = vadd.f32 %v2708_v12, %v2707_v10 }
 0x249   :  { %v2710_v18 = vadd.f32 %v2709_v14, %v2127_v56  ;;  %2733 = vst.msk [vmem:[%s3939_s6] sm:$0x1] %vm2732_vm5, %v2692_v9 }
 0x24b   :  { %2734 = vst.msk [vmem:[%s3939_s6 + $0x1] sm:$0x1] %vm2732_vm5, %v2710_v18 }

// kernel: _lambda_.5
= control target key start
LH: loop header
LB: loop body
LE: loop exit
PB: predicated region body
PF: predicated region fallthrough
CT: control target
= control target key end

     0   :  { %s3451_s18 = smov 0   ;;  %s3453_s19 = smov 0   ;;  %s4268_s0 = inlined_call_operand.vmem [shape: bf16[2,8,8,4], index: 0, kind: input, shape index: {}]   ;;  %s4269_s1 = inlined_call_operand.vmem [shape: f32[1,1,1,4], index: 1, kind: input, shape index: {}]   ;;  %s4270_s2 = inlined_call_operand.vmem [shape: f32[1,1,1,4], index: 2, kind: input, shape index: {}]   ;;  %s4271_s3 = inlined_call_operand.vmem [shape: bf16[4,3,16], index: 3, kind: input, shape index: {}]   ;;  %s4272_s4 = inlined_call_operand.vmem [shape: f32[3,1], index: 4, kind: input, shape index: {}]   ;;  %s4273_s5 = inlined_call_operand.vmem [shape: f32[2,4,3,64], index: 5, kind: output, shape index: {}]  }
   0x1   :  { %s3455_s20 = smov 0  }
   0x2 LB: > { %s24_s21 = sadd.s32 1, %s3409_s19  ;;  %p2861_p0 = scmp.ge.s32.totalorder %s3413_s20, 1  ;;  %s3413_s20 = sphi %s3455_s20, %s15_s20   ;;  %s3409_s19 = sphi %s3453_s19, %s4294_s19   ;;  %s3405_s18 = sphi %s3451_s18, %s4293_s18  }
   0x3   : > { %p25_p1 = scmp.ge.s32.totalorder %s24_s21, 2  ;;  %p219_p2 = scmp.lt.s32.totalorder %s3413_s20, 3 }
   0x5   : > { %s4296_s21 = smov (%p25_p1, %s24_s21), 0  ;;  %p220_p3 = pnand %p2861_p0, %p219_p2 }
   0x6   : > { %vm280_vm0 = vcmask (!%p220_p3), 27648   ;;  %vm282_vm1 = vcmask (!%p220_p3), 24576   ;;  %v3415_v0 = vmov (!%p220_p3), 0   ;;  %p258_p4 = scmp.lt.s32.totalorder (!%p220_p3), %s3405_s18, 1  ;;  %v3504_v1 = vld [vmem:[%s4269_s1] ss:$0 sm:$0xff] (!%p220_p3) }
   0x7   : > { %223 = sbr.rel (%p220_p3) target bundleno = 587 (0x24b), region = 40  ;;  %281 = vst.msk [vmem:[#allocation2] sm:$0xf] (!%p220_p3), %vm280_vm0, %v3415_v0  ;;  %284 = vst.msk [vmem:[#allocation2 + $0x8] sm:$0xf] (!%p220_p3), %vm280_vm0, %v3415_v0  ;;  %3239 = vset.pattern.permute.xlu0 (!%p220_p3), %v3415_v0  ;;  %s3416_s30 = smov (!%p220_p3), 8  }
   0x8   : > { %283 = vst.msk [vmem:[#allocation2 + $0x4] sm:$0x1] (!%p220_p3), %vm282_vm1, %v3415_v0  ;;  %285 = vst.msk [vmem:[#allocation2 + $0xc] sm:$0x1] (!%p220_p3), %vm282_vm1, %v3415_v0  ;;  %v3512_v16 = vld [vmem:[%s4270_s2] ss:$0 sm:$0xff] (!%p220_p3) }
   0x9   : > { %286 = vst.msk [vmem:[#allocation2 + $0x10] sm:$0xf] (!%p220_p3), %vm280_vm0, %v3415_v0  ;;  %288 = vst.msk [vmem:[#allocation2 + $0x18] sm:$0xf] (!%p220_p3), %vm280_vm0, %v3415_v0  ;;  %vm470_vm2 = vsmask.f32 (!%p220_p3), 7938 }
   0xa   : > { %287 = vst.msk [vmem:[#allocation2 + $0x14] sm:$0x1] (!%p220_p3), %vm282_vm1, %v3415_v0  ;;  %289 = vst.msk [vmem:[#allocation2 + $0x1c] sm:$0x1] (!%p220_p3), %vm282_vm1, %v3415_v0  ;;  %vm476_vm3 = vsmask.f32 (!%p220_p3), 256 }
   0xb   : > { %290 = vst.msk [vmem:[#allocation2 + $0x20] sm:$0xf] (!%p220_p3), %vm280_vm0, %v3415_v0  ;;  %292 = vst.msk [vmem:[#allocation2 + $0x28] sm:$0xf] (!%p220_p3), %vm280_vm0, %v3415_v0  ;;  %s3417_s6 = smov (!%p220_p3), 12   ;;  %s3418_s7 = smov (!%p220_p3), 4  }
   0xc   : > { %291 = vst.msk [vmem:[#allocation2 + $0x24] sm:$0x1] (!%p220_p3), %vm282_vm1, %v3415_v0  ;;  %293 = vst.msk [vmem:[#allocation2 + $0x2c] sm:$0x1] (!%p220_p3), %vm282_vm1, %v3415_v0  ;;  %vm3420_vm6 = vmmov (!%p220_p3), 0   ;;  %vm812_vm7 = vcmask (!%p220_p3), 31744  }
   0xd   : > { %294 = vst.msk [vmem:[#allocation2 + $0x30] sm:$0xf] (!%p220_p3), %vm280_vm0, %v3415_v0  ;;  %296 = vst.msk [vmem:[#allocation2 + $0x38] sm:$0xf] (!%p220_p3), %vm280_vm0, %v3415_v0  ;;  %vm837_vm8 = vcmask (!%p220_p3), 64512   ;;  %vm854_vm9 = vcmask (!%p220_p3), 97280  }
   0xe   : > { %295 = vst.msk [vmem:[#allocation2 + $0x34] sm:$0x1] %vm282_vm1, %v3415_v0  ;;  %297 = vst.msk [vmem:[#allocation2 + $0x3c] sm:$0x1] %vm282_vm1, %v3415_v0  ;;  %s4298_s18 = smov (!%p258_p4, %s3405_s18), 1  ;;  %vm1535_vm12 = vcmask 1042432  }
   0xf   : > { %298 = vst.msk [vmem:[#allocation2 + $0x40] sm:$0xf] %vm280_vm0, %v3415_v0  ;;  %300 = vst.msk [vmem:[#allocation2 + $0x48] sm:$0xf] %vm280_vm0, %v3415_v0  ;;  %s3112_s22 = sshll.u32 %s4298_s18, 5  ;;  %vm1536_vm13 = vcmask 1046532  }
  0x10   : > { %299 = vst.msk [vmem:[#allocation2 + $0x44] sm:$0x1] %vm282_vm1, %v3415_v0  ;;  %301 = vst.msk [vmem:[#allocation2 + $0x4c] sm:$0x1] %vm282_vm1, %v3415_v0  ;;  %s3499_s25 = scalar_lea.vmem %s4268_s0, %s3112_s22  ;;  %v1127_v5 = vld [vmem:[#allocation2] sm:$0xe] }
  0x11   : > { %v3123_v2 = vld [vmem:[%s3499_s25] sm:$0xff]   ;;  %v3138_v3 = vld [vmem:[%s3499_s25 + $0x8] sm:$0xff]   ;;  %v3139_v4 = vld [vmem:[%s3499_s25 + $0x10] sm:$0xff]   ;;  %vm911_vm10 = vsmask.f32 3328  ;;  %vm1044_vm14 = vcmask 130048  }
  0x12   : > { %v1128_v6 = vld [vmem:[#allocation2 + $0x4] sm:$0x1]  ;;  %v1143_v7 = vld [vmem:[#allocation2] sm:$0xf]  ;;  %v3125_v8 = vunpack.c.h.bf16 %v3123_v2  ;;  %v3124_v9 = vunpack.c.l.bf16 %v3123_v2  ;;  %v3128_v10 = vunpack.c.l.bf16 %v3138_v3  ;;  %v3129_v11 = vunpack.c.h.bf16 %v3138_v3  ;;  %v481_v54 = vld [vmem:[#allocation2 + $0x10] sm:$0xf] }
  0x13   : > { %v2945_v12 = vcombine.low %v1127_v5, %v1128_v6  ;;  %v2953_v13 = vcombine.low %v1143_v7, %v1128_v6  ;;  %v540_v14 = vld [vmem:[#allocation2] sm:$0xf]  ;;  %v541_v15 = vld [vmem:[#allocation2 + $0x4] sm:$0x1]  ;;  %v3132_v17 = vunpack.c.l.bf16 %v3139_v4  ;;  %v3133_v18 = vunpack.c.h.bf16 %v3139_v4  ;;  %v484_v55 = vld [vmem:[#allocation2 + $0x14] sm:$0x1] }
  0x14   : > { %v2900_v19 = vcombine.low %v540_v14, %v540_v14  ;;  %v2892_v20 = vcombine.low %v540_v14, %v541_v15  ;;  %v326_v21 = vmul.f32 %v3125_v8, %v3504_v1  ;;  %v325_v22 = vmul.f32 %v3124_v9, %v3504_v1  ;;  %vm3531_vm4 = vmand %vm280_vm0, %vm470_vm2  ;;  %v472_v63 = vld [vmem:[#allocation2 + $0x8] sm:$0xf]  ;;  %v478_v0 = vld [vmem:[#allocation2 + $0xc] sm:$0x1]  ;;  %s3113_s22 = sshll.u32 %s4298_s18, 4 }
  0x15   : > { %v1368_v23 = vshrl.u32 %v2953_v13, 16  ;;  %v1371_v24 = vshll.u32 %v2953_v13, 16  ;;  %1327 = vrot.lane.b32.xlu0 %v2945_v12, %s3416_s30  ;;  %v327_v25 = vmul.f32 %v3128_v10, %v3504_v1  ;;  %v328_v26 = vmul.f32 %v3129_v11, %v3504_v1  ;;  %vm3537_vm5 = vmand %vm282_vm1, %vm476_vm3  ;;  %v487_v5 = vld [vmem:[#allocation2 + $0x18] sm:$0xf]  ;;  %v490_v12 = vld [vmem:[#allocation2 + $0x1c] sm:$0x1] }
  0x16   : > { %v741_v27 = vshrl.u32 %v2900_v19, 16  ;;  %v744_v28 = vshll.u32 %v2900_v19, 16  ;;  %716 = vrot.lane.b32.xlu1 %v2892_v20, %s3416_s30  ;;  %v341_v29 = vadd.f32 %v3512_v16, %v326_v21  ;;  %v340_v30 = vadd.f32 %v3512_v16, %v325_v22  ;;  %v493_v13 = vld [vmem:[#allocation2 + $0x20] sm:$0xf]  ;;  %vm3959_vm0 = vmor %vm1535_vm12, %vm1536_vm13 }
  0x17   : > { %v1370_v31 = vrot.slane %v1368_v23, 7  ;;  %v342_v32 = vadd.f32 %v3512_v16, %v327_v25  ;;  %v343_v33 = vadd.f32 %v3512_v16, %v328_v26  ;;  %v329_v34 = vmul.f32 %v3132_v17, %v3504_v1 }
  0x18   : > { %v743_v35 = vrot.slane %v741_v27, 7  ;;  %v349_v36 = vmax.f32 %v341_v29, 0.0  ;;  %v348_v37 = vmax.f32 %v340_v30, 0.0  ;;  %v330_v38 = vmul.f32 %v3133_v18, %v3504_v1  ;;  %v496_v27 = vld [vmem:[#allocation2 + $0x24] sm:$0x1] }
  0x19   : > { %v350_v39 = vmax.f32 %v342_v32, 0.0  ;;  %v351_v40 = vmax.f32 %v343_v33, 0.0  ;;  %v344_v41 = vadd.f32 %v3512_v16, %v329_v34  ;;  %v1373_v43 = vor.u32 %v1371_v24, %v1370_v31  ;;  %v502_v31 = vld [vmem:[#allocation2 + $0x2c] sm:$0x1]  ;;  %v499_v32 = vld [vmem:[#allocation2 + $0x28] sm:$0xf] }
  0x1a   : > { %v746_v42 = vor.u32 %v744_v28, %v743_v35  ;;  %v3115_v44 = vpack.c.bf16 %v349_v36, %v349_v36  ;;  %v3114_v45 = vpack.c.bf16 %v348_v37, %v348_v37  ;;  %v345_v49 = vadd.f32 %v3512_v16, %v330_v38 }
  0x1b   : > { %v3116_v46 = vpack.c.bf16 %v350_v39, %v350_v39  ;;  %v3117_v47 = vpack.c.bf16 %v351_v40, %v351_v40  ;;  %v352_v48 = vmax.f32 %v344_v41, 0.0  ;;  %v505_v41 = vld [vmem:[#allocation2 + $0x30] sm:$0xf]  ;;  %vm912_vm11 = vsmask.f32 7440 }
  0x1c   : > { %796 = vrot.lane.b32.xlu0 %v746_v42, %s3417_s6  ;;  %v397_v50 = vshrl.u32 %v3115_v44, 16  ;;  %v400_v51 = vshll.u32 %v3115_v44, 16  ;;  %v389_v52 = vshrl.u32 %v3114_v45, 16  ;;  %v392_v53 = vshll.u32 %v3114_v45, 16  ;;  %vm3931_vm15 = vmor %vm911_vm10, %vm912_vm11 }
  0x1d   : > { %v405_v56 = vshrl.u32 %v3116_v46, 16  ;;  %v408_v57 = vshll.u32 %v3116_v46, 16  ;;  %v413_v58 = vshrl.u32 %v3117_v47, 16  ;;  %v416_v59 = vshll.u32 %v3117_v47, 16 }
  0x1e   : > { %v399_v60 = vrot.slane %v397_v50, 7  ;;  %v391_v62 = vrot.slane %v389_v52, 7  ;;  %v3118_v2 = vpack.c.bf16 %v352_v48, %v352_v48  ;;  %v353_v7 = vmax.f32 %v345_v49, 0.0 }
  0x1f   : > { %v407_v4 = vrot.slane %v405_v56, 7  ;;  %v415_v6 = vrot.slane %v413_v58, 7  ;;  %v3140_v56 = vld [vmem:[%s3499_s25 + $0x18] sm:$0xff]   ;;  %s278_s25 = scalar_lea.vmem %s4273_s5, %s3113_s22  ;;  %vm1101_vm1 = vcmask 518144  }
  0x20   : > { %1423 = vrot.lane.b32.xlu0 %v1373_v43, %s3417_s6  ;;  %v402_v8 = vor.u32 %v400_v51, %v399_v60  ;;  %v403_v9 = vrot.slane %v399_v60, 4  ;;  %v394_v10 = vor.u32 %v392_v53, %v391_v62  ;;  %v395_v11 = vrot.slane %v391_v62, 4 }
  0x21   : > { %v410_v14 = vor.u32 %v408_v57, %v407_v4  ;;  %v411_v15 = vrot.slane %v407_v4, 4  ;;  %v418_v17 = vor.u32 %v416_v59, %v415_v6  ;;  %v421_v18 = vshrl.u32 %v3118_v2, 16 }
  0x22   : > { %v482_v19 = vsel %vm3531_vm4, %v402_v8, %v481_v54  ;;  %v485_v20 = vsel %vm3537_vm5, %v403_v9, %v484_v55  ;;  %v473_v21 = vsel %vm3531_vm4, %v394_v10, %v472_v63  ;;  %v479_v22 = vsel %vm3537_vm5, %v395_v11, %v478_v0 }
  0x23   : > { %483 = vst [vmem:[#allocation2 + $0x10] sm:$0xf] %v482_v19  ;;  %486 = vst [vmem:[#allocation2 + $0x14] sm:$0x1] %v485_v20  ;;  %v488_v23 = vsel %vm3531_vm4, %v410_v14, %v487_v5  ;;  %v491_v24 = vsel %vm3537_vm5, %v411_v15, %v490_v12  ;;  %v494_v25 = vsel %vm3531_vm4, %v418_v17, %v493_v13  ;;  %v423_v26 = vrot.slane %v421_v18, 7 }
  0x24   : > { %474 = vst [vmem:[#allocation2 + $0x8] sm:$0xf] %v473_v21  ;;  %480 = vst [vmem:[#allocation2 + $0xc] sm:$0x1] %v479_v22  ;;  %v424_v28 = vshll.u32 %v3118_v2, 16  ;;  %v419_v29 = vrot.slane %v415_v6, 4  ;;  %v3119_v30 = vpack.c.bf16 %v353_v7, %v353_v7  ;;  %v3136_v6 = vunpack.c.l.bf16 %v3140_v56 }
  0x25   : > { %489 = vst [vmem:[#allocation2 + $0x18] sm:$0xf] %v488_v23  ;;  %492 = vst [vmem:[#allocation2 + $0x1c] sm:$0x1] %v491_v24  ;;  %v427_v33 = vrot.slane %v423_v26, 4 }
  0x26   : > { %495 = vst [vmem:[#allocation2 + $0x20] sm:$0xf] %v494_v25  ;;  %v426_v34 = vor.u32 %v424_v28, %v423_v26  ;;  %v497_v35 = vsel %vm3537_vm5, %v419_v29, %v496_v27  ;;  %v429_v36 = vshrl.u32 %v3119_v30, 16  ;;  %v432_v37 = vshll.u32 %v3119_v30, 16 }
  0x27   : > { %498 = vst [vmem:[#allocation2 + $0x24] sm:$0x1] %v497_v35  ;;  %v503_v38 = vsel %vm3537_vm5, %v427_v33, %v502_v31  ;;  %v331_v25 = vmul.f32 %v3136_v6, %v3504_v1  ;;  %v3137_v29 = vunpack.c.h.bf16 %v3140_v56 }
  0x28   : > { %v500_v39 = vsel %vm3531_vm4, %v426_v34, %v499_v32  ;;  %v3562_v40 = vrot.slane %v429_v36, 7  ;;  %504 = vst [vmem:[#allocation2 + $0x2c] sm:$0x1] %v503_v38 }
  0x29   : > { %501 = vst [vmem:[#allocation2 + $0x28] sm:$0xf] %v500_v39 }
  0x2a   : > { %v544_v42 = vld [vmem:[#allocation2 + $0x10] sm:$0xf]  ;;  %v545_v43 = vld [vmem:[#allocation2 + $0x14] sm:$0x1]  ;;  %v434_v45 = vor.u32 %v432_v37, %v3562_v40 }
  0x2b   : > { %v542_v44 = vld [vmem:[#allocation2 + $0x8] sm:$0xf]  ;;  %v2894_v46 = vcombine.low %v544_v42, %v545_v43  ;;  %v543_v47 = vld [vmem:[#allocation2 + $0xc] sm:$0x1]  ;;  %v1131_v48 = vld [vmem:[#allocation2 + $0x10] sm:$0xe]  ;;  %v2902_v30 = vcombine.low %v544_v42, %v544_v42 }
  0x2c   : > { %v3565_v49 = vld [vmem:[#allocation2 + $0x14] sm:$0x1]  ;;  %v2893_v50 = vcombine.low %v542_v44, %v543_v47  ;;  %v1129_v51 = vld [vmem:[#allocation2 + $0x8] sm:$0xe]  ;;  %v1130_v52 = vld [vmem:[#allocation2 + $0xc] sm:$0x1]  ;;  %v506_v53 = vsel %vm3531_vm4, %v434_v45, %v505_v41  ;;  %v2901_v54 = vcombine.low %v542_v44, %v542_v44  ;;  %v346_v44 = vadd.f32 %v3512_v16, %v331_v25 }
  0x2d   : > { %720 = vrot.lane.b32.xlu0 %v2894_v46, %s3416_s30  ;;  %v2947_v55 = vcombine.low %v1131_v48, %v3565_v49  ;;  %507 = vst [vmem:[#allocation2 + $0x30] sm:$0xf] %v506_v53  ;;  %v2946_v57 = vcombine.low %v1129_v51, %v1130_v52  ;;  %v3573_v58 = vld [vmem:[#allocation2 + $0x8] sm:$0xf]  ;;  %v546_v59 = vld [vmem:[#allocation2 + $0x18] sm:$0xf]  ;;  %v332_v45 = vmul.f32 %v3137_v29, %v3504_v1 }
  0x2e   : > { %718 = vrot.lane.b32.xlu1 %v2893_v50, %s3416_s30  ;;  %v547_v60 = vld [vmem:[#allocation2 + $0x1c] sm:$0x1]  ;;  %v2884_v62 = vcombine.low %v3573_v58, %v3573_v58  ;;  %v3577_v63 = vld [vmem:[#allocation2 + $0x10] sm:$0xf]  ;;  %v3581_v2 = vld [vmem:[#allocation2 + $0xc] sm:$0x1]  ;;  %v2903_v56 = vcombine.low %v546_v59, %v546_v59 }
  0x2f   : > { %v2885_v0 = vcombine.low %v3577_v63, %v3577_v63  ;;  %v1119_v4 = vld [vmem:[#allocation2 + $0x8] sm:$0xf]  ;;  %v3583_v5 = vld [vmem:[#allocation2 + $0x14] sm:$0x1]  ;;  %v1133_v9 = vld [vmem:[#allocation2 + $0x18] sm:$0xe]  ;;  %v2895_v13 = vcombine.low %v546_v59, %v547_v60  ;;  %v347_v1 = vadd.f32 %v3512_v16, %v332_v45 }
  0x30   : > { %v605_v7 = vshrl.u32 %v2884_v62, 16  ;;  %v608_v8 = vshll.u32 %v2884_v62, 16  ;;  %v748_v10 = vshrl.u32 %v2901_v54, 16  ;;  %v2937_v11 = vcombine.low %v1119_v4, %v3581_v2  ;;  %v1120_v12 = vld [vmem:[#allocation2 + $0x10] sm:$0xf] }
  0x31   : > { %1331 = vrot.lane.b32.xlu0 %v2947_v55, %s3416_s30  ;;  %v3588_v14 = vld [vmem:[#allocation2 + $0x1c] sm:$0x1]  ;;  %v612_v15 = vshrl.u32 %v2885_v0, 16  ;;  %v2938_v17 = vcombine.low %v1120_v12, %v3583_v5  ;;  %v3591_v18 = vld [vmem:[#allocation2 + $0x18] sm:$0xf]  ;;  %v615_v20 = vshll.u32 %v2885_v0, 16 }
  0x32   : > { %1329 = vrot.lane.b32.xlu1 %v2946_v57, %s3416_s30  ;;  %v607_v19 = vrot.slane %v605_v7, 7  ;;  %v1216_v21 = vshrl.u32 %v2937_v11, 16  ;;  %v3593_v22 = vld [vmem:[#allocation2 + $0x20] sm:$0xf]  ;;  %v2886_v24 = vcombine.low %v3591_v18, %v3591_v18  ;;  %v750_v27 = vrot.slane %v748_v10, 7 }
  0x33   : > { %v614_v23 = vrot.slane %v612_v15, 7  ;;  %v751_v28 = vshll.u32 %v2901_v54, 16  ;;  %v1144_v31 = vld [vmem:[#allocation2 + $0x8] sm:$0xf]  ;;  %v2948_v32 = vcombine.low %v1133_v9, %v3588_v14  ;;  %v1223_v33 = vshrl.u32 %v2938_v17, 16 }
  0x34   : > { %v610_v26 = vor.u32 %v608_v8, %v607_v19  ;;  %v2887_v34 = vcombine.low %v3593_v22, %v3593_v22  ;;  %v1218_v36 = vrot.slane %v1216_v21, 7  ;;  %v1219_v37 = vshll.u32 %v2937_v11, 16  ;;  %v3603_v39 = vld [vmem:[#allocation2 + $0x1c] sm:$0x1]  ;;  %v1121_v41 = vld [vmem:[#allocation2 + $0x18] sm:$0xf] }
  0x35   : > { %v617_v35 = vor.u32 %v615_v20, %v614_v23  ;;  %v619_v38 = vshrl.u32 %v2886_v24, 16  ;;  %v2954_v42 = vcombine.low %v1144_v31, %v1130_v52  ;;  %v753_v43 = vor.u32 %v751_v28, %v750_v27  ;;  %v3610_v52 = vld [vmem:[#allocation2 + $0x28] sm:$0xf]  ;;  %v1145_v62 = vld [vmem:[#allocation2 + $0x10] sm:$0xf] }
  0x36   : > { %722 = vrot.lane.b32.xlu1 %v2895_v13, %s3416_s30  ;;  %660 = vrot.lane.b32.xlu0 %v610_v26, %s3418_s7  ;;  %v1225_v46 = vrot.slane %v1223_v33, 7  ;;  %v1226_v47 = vshll.u32 %v2938_v17, 16  ;;  %v626_v48 = vshrl.u32 %v2887_v34, 16  ;;  %v755_v50 = vshrl.u32 %v2902_v30, 16  ;;  %v3617_v11 = vld [vmem:[#allocation2 + $0x24] sm:$0x1] }
  0x37   : > { %v1221_v51 = vor.u32 %v1219_v37, %v1218_v36  ;;  %v621_v53 = vrot.slane %v619_v38, 7  ;;  %v622_v54 = vshll.u32 %v2886_v24, 16  ;;  %v2939_v55 = vcombine.low %v1121_v41, %v3603_v39  ;;  %v1122_v12 = vld [vmem:[#allocation2 + $0x20] sm:$0xf]  ;;  %v3625_v28 = vld [vmem:[#allocation2 + $0x30] sm:$0xf] }
  0x38   : > { %v1375_v57 = vshrl.u32 %v2954_v42, 16  ;;  %v354_v60 = vmax.f32 %v346_v44, 0.0  ;;  %v1228_v0 = vor.u32 %v1226_v47, %v1225_v46  ;;  %v628_v4 = vrot.slane %v626_v48, 7  ;;  %v1146_v31 = vld [vmem:[#allocation2 + $0x18] sm:$0xf] }
  0x39   : > { %v629_v6 = vshll.u32 %v2887_v34, 16  ;;  %v757_v7 = vrot.slane %v755_v50, 7  ;;  %v624_v8 = vor.u32 %v622_v54, %v621_v53  ;;  %v758_v9 = vshll.u32 %v2902_v30, 16  ;;  %v508_v30 = vld [vmem:[#allocation2 + $0x34] sm:$0x1] }
  0x3a   : > { %1333 = vrot.lane.b32.xlu1 %v2948_v32, %s3416_s30  ;;  %662 = vrot.lane.b32.xlu0 %v617_v35, %s3418_s7  ;;  %v1230_v10 = vshrl.u32 %v2939_v55, 16  ;;  %v2888_v59 = vcombine.low %v3610_v52, %v3610_v52  ;;  %v762_v13 = vshrl.u32 %v2903_v56, 16  ;;  %v3620_v16 = vcombine.low %v1145_v62, %v3565_v49  ;;  %v548_v47 = vld [vmem:[#allocation2 + $0x20] sm:$0xf]  ;;  %v511_v53 = vld [vmem:[#allocation2 + $0x38] sm:$0xf] }
  0x3b   : > { %v1377_v15 = vrot.slane %v1375_v57, 7  ;;  %v1378_v17 = vshll.u32 %v2954_v42, 16  ;;  %v355_v19 = vmax.f32 %v347_v1, 0.0  ;;  %v631_v20 = vor.u32 %v629_v6, %v628_v4  ;;  %v514_v62 = vld [vmem:[#allocation2 + $0x3c] sm:$0x1] }
  0x3c   : > { %v2940_v21 = vcombine.low %v1122_v12, %v3617_v11  ;;  %v3120_v23 = vpack.c.bf16 %v354_v60, %v354_v60  ;;  %v760_v24 = vor.u32 %v758_v9, %v757_v7  ;;  %v1232_v25 = vrot.slane %v1230_v10, 7  ;;  %v517_v6 = vld [vmem:[#allocation2 + $0x40] sm:$0xf]  ;;  %v1123_v9 = vld [vmem:[#allocation2 + $0x28] sm:$0xf] }
  0x3d   : > { %v1233_v26 = vshll.u32 %v2939_v55, 16  ;;  %v633_v27 = vshrl.u32 %v2888_v59, 16  ;;  %v764_v29 = vrot.slane %v762_v13, 7  ;;  %v765_v49 = vshll.u32 %v2903_v56, 16 }
  0x3e   : > { %798 = vrot.lane.b32.xlu1 %v753_v43, %s3417_s6  ;;  %1271 = vrot.lane.b32.xlu0 %v1221_v51, %s3418_s7  ;;  %v1380_v32 = vor.u32 %v1378_v17, %v1377_v15  ;;  %v1382_v33 = vshrl.u32 %v3620_v16, 16  ;;  %v435_v34 = vrot.slane %v3562_v40, 4  ;;  %v3121_v35 = vpack.c.bf16 %v355_v19, %v355_v19 }
  0x3f   : > { %v636_v36 = vshll.u32 %v2888_v59, 16  ;;  %v1237_v37 = vshrl.u32 %v2940_v21, 16  ;;  %v2889_v38 = vcombine.low %v3625_v28, %v3625_v28  ;;  %v437_v41 = vshrl.u32 %v3120_v23, 16  ;;  %v520_v59 = vld [vmem:[#allocation2 + $0x44] sm:$0x1] }
  0x40   : > { %v1235_v42 = vor.u32 %v1233_v26, %v1232_v25  ;;  %v635_v43 = vrot.slane %v633_v27, 7  ;;  %v509_v44 = vsel %vm3537_vm5, %v435_v34, %v508_v30  ;;  %v440_v45 = vshll.u32 %v3120_v23, 16 }
  0x41   : > { %v2956_v46 = vcombine.low %v1146_v31, %v3588_v14  ;;  %v767_v40 = vor.u32 %v765_v49, %v764_v29  ;;  %510 = vst [vmem:[#allocation2 + $0x34] sm:$0x1] %v509_v44  ;;  %v439_v48 = vrot.slane %v437_v41, 7  ;;  %v1240_v50 = vshll.u32 %v2940_v21, 16  ;;  %v549_v29 = vld [vmem:[#allocation2 + $0x24] sm:$0x1] }
  0x42   : > { %1273 = vrot.lane.b32.xlu1 %v1228_v0, %s3418_s7  ;;  %664 = vrot.lane.b32.xlu0 %v624_v8, %s3418_s7  ;;  %v1385_v51 = vshll.u32 %v3620_v16, 16  ;;  %v445_v54 = vshrl.u32 %v3121_v35, 16  ;;  %v448_v55 = vshll.u32 %v3121_v35, 16  ;;  %v1239_v56 = vrot.slane %v1237_v37, 7  ;;  %v1112_v8 = vld [vmem:[#allocation2 + $0x2c] sm:$0x1] }
  0x43   : > { %v1384_v57 = vrot.slane %v1382_v33, 7  ;;  %v640_v60 = vshrl.u32 %v2889_v38, 16  ;;  %v442_v1 = vor.u32 %v440_v45, %v439_v48  ;;  %v638_v14 = vor.u32 %v636_v36, %v635_v43  ;;  %v1124_v33 = vld [vmem:[#allocation2 + $0x30] sm:$0xf]  ;;  %v551_v44 = vld [vmem:[#allocation2 + $0x2c] sm:$0x1] }
  0x44   : > { %v2904_v0 = vcombine.low %v548_v47, %v548_v47  ;;  %v447_v4 = vrot.slane %v445_v54, 7  ;;  %v443_v7 = vrot.slane %v439_v48, 4  ;;  %v643_v12 = vshll.u32 %v2889_v38, 16  ;;  %v1147_v48 = vld [vmem:[#allocation2 + $0x20] sm:$0xf] }
  0x45   : > { %v512_v10 = vsel %vm3531_vm4, %v442_v1, %v511_v53  ;;  %v1242_v17 = vor.u32 %v1240_v50, %v1239_v56  ;;  %v1387_v19 = vor.u32 %v1385_v51, %v1384_v57  ;;  %v1389_v21 = vshrl.u32 %v2956_v46, 16  ;;  %v1136_v53 = vld [vmem:[#allocation2 + $0x24] sm:$0x1]  ;;  %v1135_v1 = vld [vmem:[#allocation2 + $0x20] sm:$0xe] }
  0x46   : > { %666 = vrot.lane.b32.xlu1 %v631_v20, %s3418_s7  ;;  %800 = vrot.lane.b32.xlu0 %v760_v24, %s3417_s6  ;;  %513 = vst [vmem:[#allocation2 + $0x38] sm:$0xf] %v512_v10  ;;  %v450_v13 = vor.u32 %v448_v55, %v447_v4  ;;  %v515_v16 = vsel %vm3537_vm5, %v443_v7, %v514_v62  ;;  %v451_v15 = vrot.slane %v447_v4, 4  ;;  %v642_v20 = vrot.slane %v640_v60, 7  ;;  %v550_v24 = vld [vmem:[#allocation2 + $0x28] sm:$0xf] }
  0x47   : > { %516 = vst [vmem:[#allocation2 + $0x3c] sm:$0x1] %v515_v16  ;;  %v769_v23 = vshrl.u32 %v2904_v0, 16  ;;  %v2941_v25 = vcombine.low %v1123_v9, %v1112_v8  ;;  %v1391_v30 = vrot.slane %v1389_v21, 7  ;;  %v1392_v31 = vshll.u32 %v2956_v46, 16 }
  0x48   : > { %v518_v26 = vsel %vm3531_vm4, %v450_v13, %v517_v6  ;;  %v521_v27 = vsel %vm3537_vm5, %v451_v15, %v520_v59  ;;  %v645_v49 = vor.u32 %v643_v12, %v642_v20  ;;  %v2896_v34 = vcombine.low %v548_v47, %v549_v29  ;;  %v1114_v37 = vld [vmem:[#allocation2 + $0x34] sm:$0x1]  ;;  %v1148_v9 = vld [vmem:[#allocation2 + $0x28] sm:$0xf]  ;;  %v552_v59 = vld [vmem:[#allocation2 + $0x30] sm:$0xf] }
  0x49   : > { %519 = vst [vmem:[#allocation2 + $0x40] sm:$0xf] %v518_v26  ;;  %522 = vst [vmem:[#allocation2 + $0x44] sm:$0x1] %v521_v27  ;;  %v771_v35 = vrot.slane %v769_v23, 7  ;;  %v772_v36 = vshll.u32 %v2904_v0, 16  ;;  %v1394_v3 = vor.u32 %v1392_v31, %v1391_v30  ;;  %v2897_v47 = vcombine.low %v550_v24, %v551_v44 }
  0x4a   : > { %1425 = vrot.lane.b32.xlu1 %v1380_v32, %s3417_s6  ;;  %1275 = vrot.lane.b32.xlu0 %v1235_v42, %s3418_s7  ;;  %v2905_v32 = vcombine.low %v550_v24, %v550_v24  ;;  %v1244_v61 = vshrl.u32 %v2941_v25, 16  ;;  %v2942_v42 = vcombine.low %v1124_v33, %v1114_v37  ;;  %v1247_v46 = vshll.u32 %v2941_v25, 16  ;;  %v1138_v12 = vld [vmem:[#allocation2 + $0x2c] sm:$0x1] }
  0x4b   : > { %v774_v43 = vor.u32 %v772_v36, %v771_v35  ;;  %v2957_v56 = vcombine.low %v1147_v48, %v1136_v53  ;;  %v2949_v6 = vcombine.low %v1135_v1, %v1136_v53  ;;  %v2958_v16 = vcombine.low %v1148_v9, %v1138_v12 }
  0x4c   : > { %v776_v41 = vshrl.u32 %v2905_v32, 16  ;;  %v1246_v45 = vrot.slane %v1244_v61, 7  ;;  %v779_v51 = vshll.u32 %v2905_v32, 16  ;;  %v1251_v54 = vshrl.u32 %v2942_v42, 16 }
  0x4d   : > { %v536_v38 = vld [vmem:[#allocation2 + $0x38] sm:$0xf]  ;;  %v1254_v0 = vshll.u32 %v2942_v42, 16  ;;  %v1396_v10 = vshrl.u32 %v2957_v56, 16  ;;  %v1399_v21 = vshll.u32 %v2957_v56, 16  ;;  %v2906_v23 = vcombine.low %v552_v59, %v552_v59 }
  0x4e   : > { %802 = vrot.lane.b32.xlu1 %v767_v40, %s3417_s6  ;;  %668 = vrot.lane.b32.xlu0 %v638_v14, %s3418_s7  ;;  %v2890_v40 = vcombine.low %v536_v38, %v536_v38  ;;  %v778_v50 = vrot.slane %v776_v41, 7  ;;  %v1249_v55 = vor.u32 %v1247_v46, %v1246_v45  ;;  %v1253_v14 = vrot.slane %v1251_v54, 7  ;;  %v1116_v24 = vld [vmem:[#allocation2 + $0x3c] sm:$0x1]  ;;  %v1125_v25 = vld [vmem:[#allocation2 + $0x38] sm:$0xf] }
  0x4f   : > { %v1398_v20 = vrot.slane %v1396_v10, 7  ;;  %v783_v31 = vshrl.u32 %v2906_v23, 16  ;;  %v554_v32 = vld [vmem:[#allocation2 + $0x38] sm:$0xf]  ;;  %v2943_v33 = vcombine.low %v1125_v25, %v1116_v24  ;;  %v1406_v35 = vshll.u32 %v2958_v16, 16 }
  0x50   : > { %v647_v57 = vshrl.u32 %v2890_v40, 16  ;;  %v538_v60 = vld [vmem:[#allocation2 + $0x40] sm:$0xf]  ;;  %v781_v62 = vor.u32 %v779_v51, %v778_v50  ;;  %v650_v8 = vshll.u32 %v2890_v40, 16  ;;  %v1256_v13 = vor.u32 %v1254_v0, %v1253_v14  ;;  %v1140_v45 = vld [vmem:[#allocation2 + $0x34] sm:$0x1] }
  0x51   : > { %v2891_v4 = vcombine.low %v538_v60, %v538_v60  ;;  %v1401_v30 = vor.u32 %v1399_v21, %v1398_v20  ;;  %v786_v37 = vshll.u32 %v2906_v23, 16  ;;  %v2907_v38 = vcombine.low %v554_v32, %v554_v32  ;;  %v1126_v44 = vld [vmem:[#allocation2 + $0x40] sm:$0xf]  ;;  %v1149_v46 = vld [vmem:[#allocation2 + $0x30] sm:$0xf] }
  0x52   : > { %1277 = vrot.lane.b32.xlu1 %v1242_v17, %s3418_s7  ;;  %1427 = vrot.lane.b32.xlu0 %v1387_v19, %s3417_s6  ;;  %v649_v7 = vrot.slane %v647_v57, 7  ;;  %v1137_v19 = vld [vmem:[#allocation2 + $0x28] sm:$0xe]  ;;  %v785_v41 = vrot.slane %v783_v31, 7  ;;  %v1258_v42 = vshrl.u32 %v2943_v33, 16  ;;  %v1261_v54 = vshll.u32 %v2943_v33, 16 }
  0x53   : > { %v654_v15 = vshrl.u32 %v2891_v4, 16  ;;  %v2950_v26 = vcombine.low %v1137_v19, %v1138_v12  ;;  %v657_v29 = vshll.u32 %v2891_v4, 16  ;;  %v790_v48 = vshrl.u32 %v2907_v38, 16  ;;  %v555_v51 = vld [vmem:[#allocation2 + $0x3c] sm:$0x1] }
  0x54   : > { %v652_v17 = vor.u32 %v650_v8, %v649_v7  ;;  %v788_v50 = vor.u32 %v786_v37, %v785_v41  ;;  %v1260_v53 = vrot.slane %v1258_v42, 7  ;;  %v1643_v56 = vld [vmem:[#allocation2 + $0x10] sm:$0xf]  ;;  %v1142_v57 = vld [vmem:[#allocation2 + $0x3c] sm:$0x1]  ;;  %v2899_v60 = vcombine.low %v554_v32, %v555_v51 }
  0x55   : > { %v656_v27 = vrot.slane %v654_v15, 7  ;;  %v792_v1 = vrot.slane %v790_v48, 7  ;;  %v1150_v0 = vld [vmem:[#allocation2 + $0x38] sm:$0xf]  ;;  %v3000_v7 = vcombine.low %v1643_v56, %v1643_v56  ;;  %v1139_v8 = vld [vmem:[#allocation2 + $0x30] sm:$0xe] }
  0x56   : > { %670 = vrot.lane.b32.xlu1 %v645_v49, %s3418_s7  ;;  %724 = vrot.lane.b32.xlu0 %v2896_v34, %s3416_s30  ;;  %v1403_v49 = vshrl.u32 %v2958_v16, 16  ;;  %v553_v34 = vld [vmem:[#allocation2 + $0x34] sm:$0x1]  ;;  %v1263_v4 = vor.u32 %v1261_v54, %v1260_v53  ;;  %v2960_v9 = vcombine.low %v1150_v0, %v1142_v57  ;;  %v1645_v19 = vld [vmem:[#allocation2 + $0x18] sm:$0xf]  ;;  %v4274_v20 = vmov 0.0  }
  0x57   : > { %v659_v36 = vor.u32 %v657_v29, %v656_v27  ;;  %3161 = vmatprep.subr.bf16.mxu0 %v4274_v20  ;;  %v1659_v21 = vld [vmem:[#allocation2 + $0x8] sm:$0xf]  ;;  %3173 = vmatprep.subr.bf16.mxu1 %v4274_v20  ;;  %v3001_v25 = vcombine.low %v1645_v19, %v1645_v19  ;;  %v1141_v27 = vld [vmem:[#allocation2 + $0x38] sm:$0xe]  ;;  %v2212_v31 = vld [vmem:[#allocation2 + $0x14] sm:$0x1] }
  0x58   : > { %v1405_v61 = vrot.slane %v1403_v49, 7  ;;  %v1417_v24 = vshrl.u32 %v2960_v9, 16  ;;  %v1727_v49 = vshll.u32 %v3000_v7, 16  ;;  %v2227_v32 = vld [vmem:[#allocation2 + $0x10] sm:$0xf]  ;;  %v2952_v33 = vcombine.low %v1141_v27, %v1142_v57  ;;  %3169 = vmatprep.mubr.msk.bf16.mxu0 %vm3420_vm6, %v4274_v20  ;;  %3181 = vmatprep.mubr.msk.bf16.mxu1 %vm3420_vm6, %v4274_v20 }
  0x59   : > { %v1660_v41 = vld [vmem:[#allocation2 + $0xc] sm:$0x1]  ;;  %v2228_v51 = vld [vmem:[#allocation2 + $0x18] sm:$0xf]  ;;  %v1647_v53 = vld [vmem:[#allocation2 + $0x20] sm:$0xf] }
  0x5a   : > { %1429 = vrot.lane.b32.xlu1 %v1394_v3, %s3417_s6  ;;  %804 = vrot.lane.b32.xlu0 %v774_v43, %s3417_s6  ;;  %v2898_v3 = vcombine.low %v552_v59, %v553_v34  ;;  %v1118_v43 = vld [vmem:[#allocation2 + $0x44] sm:$0x1]  ;;  %v1408_v40 = vor.u32 %v1406_v35, %v1405_v61  ;;  %v1419_v34 = vrot.slane %v1417_v24, 7  ;;  %v1420_v35 = vshll.u32 %v2960_v9, 16  ;;  %v2251_v0 = vld [vmem:[#allocation2 + $0x8] sm:$0xf] }
  0x5b   : > { %v2252_v27 = vld [vmem:[#allocation2 + $0x10] sm:$0xf] }
  0x5c   : > { %v1422_v42 = vor.u32 %v1420_v35, %v1419_v34 }
  0x5e   : > { %726 = vrot.lane.b32.xlu1 %v2897_v47, %s3416_s30  ;;  %1279 = vrot.lane.b32.xlu0 %v1249_v55, %s3418_s7  ;;  %v2944_v47 = vcombine.low %v1126_v44, %v1118_v43  ;;  %v2959_v55 = vcombine.low %v1149_v46, %v1140_v45  ;;  %v1734_v44 = vshll.u32 %v3001_v25, 16  ;;  %v2214_v46 = vld [vmem:[#allocation2 + $0x1c] sm:$0x1] }
  0x5f   : > { %v3056_v56 = vcombine.low %v2228_v51, %v2214_v46 }
  0x60   : > { %v1265_v14 = vshrl.u32 %v2944_v47, 16  ;;  %v1268_v12 = vshll.u32 %v2944_v47, 16  ;;  %v1413_v15 = vshll.u32 %v2959_v55, 16 }
  0x61   : > { %v2331_v9 = vshrl.u32 %v3056_v56, 16 }
  0x62   : > { %806 = vrot.lane.b32.xlu1 %v781_v62, %s3417_s6  ;;  %1335 = vrot.lane.b32.xlu0 %v2949_v6, %s3416_s30  ;;  %v793_v62 = vshll.u32 %v2907_v38, 16  ;;  %v1410_v6 = vshrl.u32 %v2959_v55, 16  ;;  %v1267_v59 = vrot.slane %v1265_v14, 7  ;;  %v1661_v38 = vld [vmem:[#allocation2 + $0x10] sm:$0xf]  ;;  %v3002_v14 = vcombine.low %v1647_v53, %v1647_v53 }
  0x63   : > { %v2333_v19 = vrot.slane %v2331_v9, 7  ;;  %v2253_v53 = vld [vmem:[#allocation2 + $0x18] sm:$0xf] }
  0x64   : > { %v795_v10 = vor.u32 %v793_v62, %v792_v1  ;;  %v1412_v16 = vrot.slane %v1410_v6, 7  ;;  %v1270_v23 = vor.u32 %v1268_v12, %v1267_v59  ;;  %v1738_v12 = vshrl.u32 %v3002_v14, 16 }
  0x66   : > { %1281 = vrot.lane.b32.xlu1 %v1256_v13, %s3418_s7  ;;  %672 = vrot.lane.b32.xlu0 %v652_v17, %s3418_s7  ;;  %v2951_v13 = vcombine.low %v1139_v8, %v1140_v45  ;;  %v1724_v17 = vshrl.u32 %v3000_v7, 16  ;;  %v3017_v45 = vcombine.low %v1661_v38, %v1661_v38  ;;  %v2236_v8 = vld [vmem:[#allocation2 + $0xc] sm:$0x1] }
  0x67   : > { %v3071_v59 = vcombine.low %v2251_v0, %v2236_v8 }
  0x68   : > { %v1726_v29 = vrot.slane %v1724_v17, 7  ;;  %v1867_v55 = vshrl.u32 %v3017_v45, 16  ;;  %v1870_v7 = vshll.u32 %v3017_v45, 16 }
  0x6a   : > { %1337 = vrot.lane.b32.xlu1 %v2950_v26, %s3416_s30  ;;  %1431 = vrot.lane.b32.xlu0 %v1401_v30, %s3417_s6  ;;  %v1415_v26 = vor.u32 %v1413_v15, %v1412_v16  ;;  %v3016_v30 = vcombine.low %v1659_v21, %v1659_v21  ;;  %v1729_v61 = vor.u32 %v1727_v49, %v1726_v29  ;;  %v1869_v6 = vrot.slane %v1867_v55, 7  ;;  %v2235_v16 = vld [vmem:[#allocation2 + $0x8] sm:$0xe]  ;;  %v1663_v49 = vld [vmem:[#allocation2 + $0x18] sm:$0xf] }
  0x6b   : > { %v3063_v24 = vcombine.low %v2235_v16, %v2236_v8  ;;  %v2476_v29 = vshrl.u32 %v3071_v59, 16  ;;  %v2230_v55 = vld [vmem:[#allocation2 + $0x28] sm:$0xf]  ;;  %v1651_v8 = vld [vmem:[#allocation2 + $0x30] sm:$0xf] }
  0x6c   : > { %v1860_v37 = vshrl.u32 %v3016_v30, 16  ;;  %v1863_v47 = vshll.u32 %v3016_v30, 16  ;;  %v1872_v17 = vor.u32 %v1870_v7, %v1869_v6  ;;  %v2238_v30 = vld [vmem:[#allocation2 + $0x14] sm:$0x1] }
  0x6e   : > { %674 = vrot.lane.b32.xlu1 %v659_v36, %s3418_s7  ;;  %728 = vrot.lane.b32.xlu0 %v2898_v3, %s3416_s30  ;;  %v1731_v36 = vshrl.u32 %v3001_v25, 16  ;;  %v3055_v3 = vcombine.low %v2227_v32, %v2212_v31  ;;  %v1862_v48 = vrot.slane %v1860_v37, 7  ;;  %v1740_v25 = vrot.slane %v1738_v12, 7  ;;  %v1666_v12 = vld [vmem:[#allocation2 + $0x24] sm:$0x1] }
  0x6f   : > { %v3072_v32 = vcombine.low %v2252_v27, %v2238_v30  ;;  %v2479_v37 = vshll.u32 %v3071_v59, 16  ;;  %v1653_v59 = vld [vmem:[#allocation2 + $0x38] sm:$0xf] }
  0x70   : > { %v1733_v43 = vrot.slane %v1731_v36, 7  ;;  %v1865_v57 = vor.u32 %v1863_v47, %v1862_v48  ;;  %v2327_v62 = vshll.u32 %v3055_v3, 16  ;;  %v2237_v36 = vld [vmem:[#allocation2 + $0x10] sm:$0xe]  ;;  %v3695_v48 = vld [vmem:[#allocation2 + $0x20] sm:$0xf] }
  0x71   : > { %v2483_v45 = vshrl.u32 %v3072_v32, 16 }
  0x72   : > { %1433 = vrot.lane.b32.xlu1 %v1408_v40, %s3417_s6  ;;  %808 = vrot.lane.b32.xlu0 %v788_v50, %s3417_s6  ;;  %v3008_v40 = vcombine.low %v1659_v21, %v1660_v41  ;;  %v2324_v50 = vshrl.u32 %v3055_v3, 16  ;;  %v1736_v54 = vor.u32 %v1734_v44, %v1733_v43  ;;  %v2334_v21 = vshll.u32 %v3056_v56, 16  ;;  %v2216_v3 = vld [vmem:[#allocation2 + $0x24] sm:$0x1]  ;;  %v2229_v41 = vld [vmem:[#allocation2 + $0x20] sm:$0xf] }
  0x73   : > { %v3057_v47 = vcombine.low %v2229_v41, %v2216_v3  ;;  %v2220_v41 = vld [vmem:[#allocation2 + $0x34] sm:$0x1] }
  0x74   : > { %v2326_v1 = vrot.slane %v2324_v50, 7  ;;  %v2336_v31 = vor.u32 %v2334_v21, %v2333_v19  ;;  %v1664_v50 = vld [vmem:[#allocation2 + $0x1c] sm:$0x1]  ;;  %v3718_v19 = vcombine.low %v1651_v8, %v1651_v8  ;;  %v2254_v21 = vld [vmem:[#allocation2 + $0x20] sm:$0xf] }
  0x75   : > { %v3010_v0 = vcombine.low %v1663_v49, %v1664_v50  ;;  %v2338_v7 = vshrl.u32 %v3057_v47, 16  ;;  %v2341_v27 = vshll.u32 %v3057_v47, 16 }
  0x76   : > { %730 = vrot.lane.b32.xlu1 %v2899_v60, %s3416_s30  ;;  %1283 = vrot.lane.b32.xlu0 %v1263_v4, %s3418_s7  ;;  %v1662_v60 = vld [vmem:[#allocation2 + $0x14] sm:$0x1] }
  0x77   : > { %v3009_v4 = vcombine.low %v1661_v38, %v1662_v60  ;;  %v3018_v38 = vcombine.low %v1663_v49, %v1663_v49  ;;  %v2485_v60 = vrot.slane %v2483_v45, 7  ;;  %v3727_v49 = vcombine.low %v1653_v59, %v1653_v59 }
  0x79   : > { %v1877_v6 = vshll.u32 %v3018_v38, 16 }
  0x7a   : > { %810 = vrot.lane.b32.xlu1 %v795_v10, %s3417_s6  ;;  %1339 = vrot.lane.b32.xlu0 %v2951_v13, %s3416_s30  ;;  %v2329_v10 = vor.u32 %v2327_v62, %v2326_v1  ;;  %v1649_v13 = vld [vmem:[#allocation2 + $0x28] sm:$0xf]  ;;  %v2486_v1 = vshll.u32 %v3072_v32, 16  ;;  %v3704_v62 = vcombine.low %v3695_v48, %v3695_v48 }
  0x7c   : > { %v2488_v16 = vor.u32 %v2486_v1, %v2485_v60 }
  0x7e   : > { %1285 = vrot.lane.b32.xlu1 %v1270_v23, %s3418_s7  ;;  %1435 = vrot.lane.b32.xlu0 %v1415_v26, %s3417_s6  ;;  %v3003_v23 = vcombine.low %v1649_v13, %v1649_v13  ;;  %v1741_v26 = vshll.u32 %v3002_v14, 16  ;;  %v3706_v14 = vld [vmem:[#allocation2 + $0x1c] sm:$0x1]  ;;  %v3714_v13 = vld [vmem:[#allocation2 + $0xc] sm:$0x1] }
  0x7f   : > { %v3710_v9 = vcombine.low %v2253_v53, %v3706_v14  ;;  %v3762_v53 = vld [vmem:[#allocation2 + $0x10] sm:$0xe] }
  0x80   : > { %v1743_v34 = vor.u32 %v1741_v26, %v1740_v25  ;;  %v1748_v44 = vshll.u32 %v3003_v23, 16  ;;  %v2340_v26 = vrot.slane %v2338_v7, 7  ;;  %v3778_v7 = vld [vmem:[#allocation2 + $0x2c] sm:$0x1] }
  0x82   : > { %1341 = vrot.lane.b32.xlu1 %v2952_v33, %s3416_s30  ;;  %1779 = vrot.lane.b32.xlu0 %v1729_v61, %s3418_s7  ;;  %v1745_v33 = vshrl.u32 %v3003_v23, 16  ;;  %v2478_v61 = vrot.slane %v2476_v29, 7  ;;  %v3720_v23 = vld [vmem:[#allocation2 + $0x28] sm:$0xf]  ;;  %v3725_v29 = vld [vmem:[#allocation2 + $0x18] sm:$0xe] }
  0x83   : > { %v3747_v3 = vcombine.low %v3720_v23, %v3720_v23  ;;  %v3065_v45 = vcombine.low %v3725_v29, %v3706_v14  ;;  %v3770_v14 = vld [vmem:[#allocation2 + $0x1c] sm:$0x1] }
  0x84   : > { %v1747_v43 = vrot.slane %v1745_v33, 7  ;;  %v2481_v46 = vor.u32 %v2479_v37, %v2478_v61  ;;  %v3734_v33 = vld [vmem:[#allocation2 + $0x24] sm:$0x1]  ;;  %v2876_v61 = vcombine.low %v3573_v58, %v3714_v13  ;;  %v3740_v37 = vld [vmem:[#allocation2 + $0x8] sm:$0xe]  ;;  %v1752_v58 = vshrl.u32 %v3718_v19, 16 }
  0x86   : > { %1437 = vrot.lane.b32.xlu1 %v1422_v42, %s3417_s6  ;;  %1835 = vrot.lane.b32.xlu0 %v3008_v40, %s3416_s30  ;;  %v3064_v42 = vcombine.low %v2237_v36, %v2238_v30  ;;  %v1874_v40 = vshrl.u32 %v3018_v38, 16  ;;  %v3011_v36 = vcombine.low %v3695_v48, %v1666_v12  ;;  %v3743_v38 = vcombine.low %v2254_v21, %v3734_v33 }
  0x87   : > { %v3681_v15 = vpop.permute.xlu0 %1327  ;;  %v2343_v48 = vor.u32 %v2341_v27, %v2340_v26  ;;  %v1755_v12 = vshll.u32 %v3718_v19, 16  ;;  %v3794_v26 = vld [vmem:[#allocation2 + $0x24] sm:$0x1] }
  0x88   : > { %v3700_v56 = vpop.permute.xlu1 %716  ;;  %v2497_v8 = vshrl.u32 %v3743_v38, 16 }
  0x8a   : > { %1781 = vrot.lane.b32.xlu1 %v1736_v54, %s3418_s7  ;;  %1915 = vrot.lane.b32.xlu0 %v1865_v57, %s3417_s6  ;;  %v2218_v54 = vld [vmem:[#allocation2 + $0x2c] sm:$0x1]  ;;  %v1750_v57 = vor.u32 %v1748_v44, %v1747_v43  ;;  %v1884_v44 = vshll.u32 %v3704_v62, 16 }
  0x8e   : > { %1837 = vrot.lane.b32.xlu1 %v3009_v4, %s3416_s30  ;;  %2379 = vrot.lane.b32.xlu0 %v2329_v10, %s3418_s7  ;;  %v3687_v35 = vpop.permute.xlu0 %796  ;;  %v1876_v4 = vrot.slane %v1874_v40, 7  ;;  %v3712_v10 = vcombine.low %v2230_v55, %v2218_v54  ;;  %v1759_v54 = vshrl.u32 %v3727_v49, 16  ;;  %v3765_v55 = vld [vmem:[#allocation2 + $0x30] sm:$0xf] }
  0x8f   : > { %v3786_v13 = vcombine.low %v3765_v55, %v3765_v55 }
  0x90   : > { %v1879_v25 = vor.u32 %v1877_v6, %v1876_v4  ;;  %v2345_v32 = vshrl.u32 %v3712_v10, 16  ;;  %v2348_v50 = vshll.u32 %v3712_v10, 16  ;;  %v2929_v4 = vcombine.low %v3740_v37, %v3581_v2 }
  0x91   : > { %v1888_v10 = vshrl.u32 %v3747_v3, 16  ;;  %v1761_v21 = vrot.slane %v1759_v54, 7 }
  0x92   : > { %1917 = vrot.lane.b32.xlu1 %v1872_v17, %s3417_s6  ;;  %2435 = vrot.lane.b32.xlu0 %v3063_v24, %s3416_s30  ;;  %v3697_v51 = vpop.permute.xlu0 %1423  ;;  %v1881_v17 = vshrl.u32 %v3704_v62, 16  ;;  %v2347_v60 = vrot.slane %v2345_v32, 7  ;;  %v2493_v62 = vshll.u32 %v3710_v9, 16 }
  0x94   : > { %v1883_v43 = vrot.slane %v1881_v17, 7  ;;  %v2878_v17 = vcombine.low %v3591_v18, %v3770_v14  ;;  %v2350_v19 = vor.u32 %v2348_v50, %v2347_v60 }
  0x96   : > { %2381 = vrot.lane.b32.xlu1 %v2336_v31, %s3418_s7  ;;  %1783 = vrot.lane.b32.xlu0 %v1743_v34, %s3418_s7  ;;  %v3731_v31 = vld [vmem:[#allocation2 + $0x14] sm:$0x1]  ;;  %v2490_v34 = vshrl.u32 %v3710_v9, 16  ;;  %v1886_v59 = vor.u32 %v1884_v44, %v1883_v43  ;;  %v1754_v9 = vrot.slane %v1752_v58, 7  ;;  %v2499_v43 = vrot.slane %v2497_v8, 7 }
  0x97   : > { %v2877_v47 = vcombine.low %v3577_v63, %v3731_v31  ;;  %v1890_v44 = vrot.slane %v1888_v10, 7  ;;  %v1891_v58 = vshll.u32 %v3747_v3, 16  ;;  %v3827_v10 = vld [vmem:[#allocation2 + $0x2c] sm:$0x1] }
  0x98   : > { %v2492_v1 = vrot.slane %v2490_v34, 7  ;;  %v3802_v34 = vld [vmem:[#allocation2 + $0x18] sm:$0xe]  ;;  %v1757_v54 = vor.u32 %v1755_v12, %v1754_v9  ;;  %v3829_v9 = vld [vmem:[#allocation2 + $0x20] sm:$0xe] }
  0x99   : > { %v3844_v60 = vor.u32 %v1891_v58, %v1890_v44 }
  0x9a   : > { %2437 = vrot.lane.b32.xlu1 %v3064_v42, %s3416_s30  ;;  %2531 = vrot.lane.b32.xlu0 %v2481_v46, %s3417_s6  ;;  %v2231_v42 = vld [vmem:[#allocation2 + $0x30] sm:$0xf]  ;;  %v3754_v46 = vld [vmem:[#allocation2 + $0x20] sm:$0xe]  ;;  %v3798_v29 = vor.u32 %v2493_v62, %v2492_v1  ;;  %v1895_v1 = vshrl.u32 %v3786_v13, 16 }
  0x9b   : > { %v3066_v6 = vcombine.low %v3754_v46, %v3734_v33  ;;  %v3816_v62 = vld [vmem:[#allocation2 + $0x28] sm:$0xe] }
  0x9e   : > { %1785 = vrot.lane.b32.xlu1 %v1750_v57, %s3418_s7  ;;  %1839 = vrot.lane.b32.xlu0 %v3010_v0, %s3416_s30  ;;  %v3772_v0 = vcombine.low %v2231_v42, %v2220_v41 }
  0x9f   : > { %v3723_v24 = vpop.permute.xlu0 %720 }
  0xa0   : > { %v3729_v30 = vpop.permute.xlu1 %718  ;;  %v2352_v41 = vshrl.u32 %v3772_v0, 16 }
  0xa2   : > { %2533 = vrot.lane.b32.xlu1 %v2488_v16, %s3417_s6  ;;  %1919 = vrot.lane.b32.xlu0 %v1879_v25, %s3417_s6  ;;  %v1762_v25 = vshll.u32 %v3727_v49, 16  ;;  %v2500_v49 = vshll.u32 %v3743_v38, 16  ;;  %v3847_v16 = vld [vmem:[#allocation2 + $0x34] sm:$0x1] }
  0xa3   : > { %v3757_v40 = vpop.permute.xlu0 %1331 }
  0xa4   : > { %v3767_v57 = vpop.permute.xlu1 %1329  ;;  %v3821_v3 = vor.u32 %v1762_v25, %v1761_v21  ;;  %v2355_v21 = vshll.u32 %v3772_v0, 16  ;;  %v3842_v8 = vor.u32 %v2500_v49, %v2499_v43  ;;  %v3859_v49 = vld [vmem:[#allocation2 + $0x30] sm:$0xe] }
  0xa6   : > { %1841 = vrot.lane.b32.xlu1 %v3011_v36, %s3416_s30  ;;  %2383 = vrot.lane.b32.xlu0 %v2343_v48, %s3418_s7  ;;  %v3804_v36 = vld [vmem:[#allocation2 + $0x34] sm:$0x1]  ;;  %v3809_v48 = vld [vmem:[#allocation2 + $0x2c] sm:$0x1] }
  0xa8   : > { %v3796_v27 = vpop.permute.xlu1 %722  ;;  %v661_v42 = vpop.permute.xlu0 %660 }
  0xa9   : > { %v815_v50 = vsel %vm812_vm7, %v2876_v61, %v661_v42  ;;  %v2222_v42 = vld [vmem:[#allocation2 + $0x3c] sm:$0x1] }
  0xaa   : > { %1921 = vrot.lane.b32.xlu1 %v1886_v59, %s3417_s6  ;;  %v839_v38 = vsel %vm837_vm8, %v815_v50, %v3700_v56  ;;  %2439 = vrot.lane.b32.xlu0 %v3065_v45, %s3416_s30  ;;  %v2255_v59 = vld [vmem:[#allocation2 + $0x28] sm:$0xf]  ;;  %v2354_v45 = vrot.slane %v2352_v41, 7  ;;  %v2232_v50 = vld [vmem:[#allocation2 + $0x38] sm:$0xf]  ;;  %v1897_v41 = vrot.slane %v1895_v1, 7 }
  0xab   : > { %v3833_v12 = vsel %vm854_vm9, %v839_v38, %v3687_v35  ;;  %v1898_v35 = vshll.u32 %v3786_v13, 16  ;;  %v1655_v38 = vld [vmem:[#allocation2 + $0x40] sm:$0xf]  ;;  %v3857_v43 = vcombine.low %v2255_v59, %v3827_v10  ;;  %v3861_v13 = vld [vmem:[#allocation2 + $0x34] sm:$0x1]  ;;  %v3866_v31 = vcombine.low %v2232_v50, %v2222_v42 }
  0xac   : > { %v3835_v56 = vpop.permute.xlu1 %1333  ;;  %v2908_v20 = vcombine.low %v3833_v12, %v3833_v12  ;;  %v663_v61 = vpop.permute.xlu0 %662  ;;  %v3870_v1 = vor.u32 %v2355_v21, %v2354_v45  ;;  %v3068_v42 = vcombine.low %v3859_v49, %v3861_v13  ;;  %v2256_v21 = vld [vmem:[#allocation2 + $0x30] sm:$0xf] }
  0xad   : > { %v818_v0 = vsel %vm812_vm7, %v2877_v47, %v663_v61  ;;  %v3872_v61 = vcombine.low %v1655_v38, %v1655_v38  ;;  %v3887_v45 = vor.u32 %v1898_v35, %v1897_v41  ;;  %v2909_v38 = vcombine.high %v3833_v12, %v3833_v12  ;;  %v1657_v41 = vld [vmem:[#allocation2 + $0x48] sm:$0xf] }
  0xae   : > { %2385 = vrot.lane.b32.xlu1 %v2350_v19, %s3418_s7  ;;  %v915_v44 = vshrl.u32 %v2908_v20, 16  ;;  %v918_v58 = vshll.u32 %v2908_v20, 16  ;;  %1787 = vrot.lane.b32.xlu0 %v1757_v54, %s3418_s7  ;;  %v841_v19 = vsel %vm837_vm8, %v818_v0, %v3729_v30  ;;  %v2881_v20 = vcombine.low %v3625_v28, %v3847_v16 }
  0xaf   : > { %v2359_v2 = vshrl.u32 %v3866_v31, 16  ;;  %v2362_v37 = vshll.u32 %v3866_v31, 16  ;;  %v2504_v35 = vshrl.u32 %v3857_v43, 16 }
  0xb0   : > { %v799_v47 = vpop.permute.xlu1 %798  ;;  %v917_v59 = vrot.slane %v915_v44, 4  ;;  %v920_v54 = vrot.slane %v918_v58, 5  ;;  %v1272_v32 = vpop.permute.xlu0 %1271 }
  0xb1   : > { %v858_v25 = vsel %vm854_vm9, %v841_v19, %v799_v47  ;;  %v1441_v30 = vsel %vm812_vm7, %v2929_v4, %v1272_v32  ;;  %v1766_v32 = vshrl.u32 %v3872_v61, 16  ;;  %v924_v47 = vshll.u32 %v2909_v38, 16 }
  0xb2   : > { %v2910_v50 = vcombine.low %v858_v25, %v858_v25  ;;  %v2911_v63 = vcombine.high %v858_v25, %v858_v25  ;;  %2441 = vrot.lane.b32.xlu1 %v3066_v6, %s3416_s30  ;;  %v1464_v0 = vsel %vm837_vm8, %v1441_v30, %v3681_v15  ;;  %2535 = vrot.lane.b32.xlu0 %v3798_v29, %s3417_s6  ;;  %v1769_v15 = vshll.u32 %v3872_v61, 16 }
  0xb3   : > { %v1480_v4 = vsel %vm854_vm9, %v1464_v0, %v3697_v51  ;;  %v921_v25 = vor.u32 %v920_v54, %v917_v59  ;;  %v3902_v29 = vcombine.low %v2256_v21, %v3861_v13  ;;  %v4280_v61 = vcombine.low %v3720_v23, %v3778_v7  ;;  %v4034_v13 = vld [vmem:[#allocation2 + $0x3c] sm:$0x1] }
  0xb4   : > { %v929_v33 = vshrl.u32 %v2910_v50, 16  ;;  %v932_v46 = vshll.u32 %v2910_v50, 16  ;;  %v1274_v6 = vpop.permute.xlu1 %1273  ;;  %v665_v12 = vpop.permute.xlu0 %664  ;;  %v938_v31 = vshll.u32 %v2911_v63, 16  ;;  %v2961_v19 = vcombine.low %v1480_v4, %v1480_v4  ;;  %v3916_v50 = vld [vmem:[#allocation2 + $0x38] sm:$0xf] }
  0xb5   : > { %v821_v51 = vsel %vm812_vm7, %v2878_v17, %v665_v12  ;;  %v2361_v59 = vrot.slane %v2359_v2, 7  ;;  %v2507_v54 = vshll.u32 %v3857_v43, 16  ;;  %v2962_v30 = vcombine.high %v1480_v4, %v1480_v4 }
  0xb6   : > { %v931_v44 = vrot.slane %v929_v33, 4  ;;  %v934_v58 = vrot.slane %v932_v46, 5  ;;  %1789 = vrot.lane.b32.xlu1 %v3821_v3, %s3418_s7  ;;  %1843 = vrot.lane.b32.xlu0 %v4280_v61, %s3416_s30  ;;  %v1768_v14 = vrot.slane %v1766_v32, 7  ;;  %v3918_v17 = vcombine.low %v1657_v41, %v1657_v41 }
  0xb7   : > { %v4281_v3 = vcombine.low %v3762_v53, %v3583_v5  ;;  %v843_v23 = vsel %vm837_vm8, %v821_v51, %v3723_v24  ;;  %v922_v38 = vrot.slane %v921_v25, 4  ;;  %v2506_v0 = vrot.slane %v2504_v35, 7 }
  0xb8   : > { %v935_v63 = vor.u32 %v934_v58, %v931_v44  ;;  %v667_v18 = vpop.permute.xlu1 %666  ;;  %v801_v7 = vpop.permute.xlu0 %800  ;;  %v940_v2 = vrot.slane %v938_v31, 5  ;;  %v3937_v5 = vcombine.low %v3916_v50, %v3916_v50  ;;  %v2977_v24 = vrot.slane %v2961_v19, 9 }
  0xb9   : > { %v1444_v21 = vsel %vm812_vm7, %v4281_v3, %v1274_v6  ;;  %v860_v33 = vsel %vm854_vm9, %v843_v23, %v801_v7  ;;  %v926_v4 = vrot.slane %v924_v47, 5  ;;  %v2511_v6 = vshrl.u32 %v3902_v29, 16 }
  0xba   : > { %v936_v43 = vrot.slane %v935_v63, 4  ;;  %2537 = vrot.lane.b32.xlu1 %v3842_v8, %s3417_s6  ;;  %v2912_v53 = vcombine.low %v860_v33, %v860_v33  ;;  %1923 = vrot.lane.b32.xlu0 %v3844_v60, %s3417_s6  ;;  %v1540_v32 = vrot.slane %v2962_v30, 5  ;;  %v4284_v8 = vcombine.low %v3593_v22, %v3794_v26 }
  0xbb   : > { %v1466_v25 = vsel %vm837_vm8, %v1444_v21, %v3767_v57  ;;  %v927_v51 = vsel %vm3931_vm15, %v922_v38, %v926_v4  ;;  %v4285_v22 = vcombine.low %v3765_v55, %v3804_v36  ;;  %v2364_v26 = vor.u32 %v2362_v37, %v2361_v59 }
  0xbc   : > { %v824_v12 = vsel %vm812_vm7, %v4284_v8, %v667_v18  ;;  %v1426_v35 = vpop.permute.xlu1 %1425  ;;  %v941_v41 = vsel %vm3931_vm15, %v936_v43, %v940_v2  ;;  %v943_v44 = vshrl.u32 %v2912_v53, 16  ;;  %v946_v58 = vshll.u32 %v2912_v53, 16  ;;  %v1276_v31 = vpop.permute.xlu0 %1275  ;;  %v3989_v8 = vld [vmem:[#allocation2 + $0x44] sm:$0x1] }
  0xbd   : > { %v1482_v60 = vsel %vm854_vm9, %v1466_v25, %v1426_v35  ;;  %v2924_v57 = vcombine.low %v927_v51, %v941_v41  ;;  %v845_v30 = vsel %vm837_vm8, %v824_v12, %v3796_v27  ;;  %v1771_v18 = vor.u32 %v1769_v15, %v1768_v14 }
  0xbe   : > { %v2963_v47 = vcombine.low %v1482_v60, %v1482_v60  ;;  %v2964_v19 = vcombine.high %v1482_v60, %v1482_v60  ;;  %1845 = vrot.lane.b32.xlu1 %v4285_v22, %s3416_s30  ;;  %v945_v63 = vrot.slane %v943_v44, 4  ;;  %2387 = vrot.lane.b32.xlu0 %v3870_v1, %s3418_s7  ;;  %v1773_v3 = vshrl.u32 %v3918_v17, 16  ;;  %v2233_v44 = vld [vmem:[#allocation2 + $0x40] sm:$0xf] }
  0xbf   : > { %v948_v55 = vrot.slane %v946_v58, 5  ;;  %v1049_v59 = vsel %vm1044_vm14, %v2924_v57, 0  ;;  %v2913_v23 = vcombine.high %v860_v33, %v860_v33  ;;  %v1541_v1 = vsel %vm3959_vm0, %v2977_v24, %v1540_v32  ;;  %v3987_v32 = vld [vmem:[#allocation2 + $0x40] sm:$0xf]  ;;  %v1672_v58 = vld [vmem:[#allocation2 + $0x3c] sm:$0x1] }
  0xc0   : > { %v2978_v36 = vrot.slane %v2963_v47, 9  ;;  %v1544_v21 = vrot.slane %v2964_v19, 5  ;;  %v803_v37 = vpop.permute.xlu1 %802  ;;  %v669_v38 = vpop.permute.xlu0 %668  ;;  %3162 = vmatpush3.bf16.xpose.msra.mxu0 %v1049_v59  ;;  %v1776_v43 = vshll.u32 %v3918_v17, 16  ;;  %v4288_v27 = vcombine.low %v3802_v34, %v3603_v39  ;;  %v4014_v59 = vld [vmem:[#allocation2 + $0x4c] sm:$0x1] }
  0xc1   : > { %v862_v7 = vsel %vm854_vm9, %v845_v30, %v803_v37  ;;  %v4289_v53 = vcombine.low %v3816_v62, %v3827_v10  ;;  %v2509_v17 = vor.u32 %v2507_v54, %v2506_v0  ;;  %v4290_v4 = vmov 0.0  }
  0xc2   : > { %v1447_v15 = vsel %vm812_vm7, %v4288_v27, %v1276_v31  ;;  %v2914_v14 = vcombine.low %v862_v7, %v862_v7  ;;  %v2915_v2 = vcombine.high %v862_v7, %v862_v7  ;;  %1925 = vrot.lane.b32.xlu1 %v3887_v45, %s3417_s6  ;;  %v1545_v33 = vsel %vm3959_vm0, %v2978_v36, %v1544_v21 }
  0xc3   : > { %2443 = vrot.lane.b32.xlu0 %v4289_v53, %s3416_s30  ;;  %v2986_v24 = vcombine.low %v1541_v1, %v1545_v33  ;;  %3163 = vmatprep.subr.bf16.mxu0 %v4290_v4  ;;  %v2513_v39 = vrot.slane %v2511_v6, 7  ;;  %v1902_v34 = vshrl.u32 %v3937_v5, 16  ;;  %v949_v45 = vor.u32 %v948_v55, %v945_v63 }
  0xc4   : > { %v957_v12 = vshrl.u32 %v2914_v14, 16  ;;  %v960_v25 = vshll.u32 %v2914_v14, 16  ;;  %v1278_v35 = vpop.permute.xlu1 %1277  ;;  %v2514_v41 = vshll.u32 %v3902_v29, 16  ;;  %v952_v62 = vshll.u32 %v2913_v23, 16  ;;  %v1428_v54 = vpop.permute.xlu0 %1427  ;;  %v2234_v23 = vld [vmem:[#allocation2 + $0x48] sm:$0xf] }
  0xc5   : > { %v1468_v10 = vsel %vm837_vm8, %v1447_v15, %v3757_v40  ;;  %v1588_v0 = vsel %vm1044_vm14, %v2986_v24, 0  ;;  %v1775_v6 = vrot.slane %v1773_v3, 7  ;;  %v966_v51 = vshll.u32 %v2915_v2, 16 }
  0xc6   : > { %v959_v60 = vrot.slane %v957_v12, 4  ;;  %v962_v31 = vrot.slane %v960_v25, 5  ;;  %v1484_v47 = vsel %vm854_vm9, %v1468_v10, %v1428_v54  ;;  %2389 = vrot.lane.b32.xlu1 %v2364_v26, %s3418_s7  ;;  %3174 = vmatpush3.bf16.xpose.msra.mxu1 %v1588_v0  ;;  %v1904_v29 = vrot.slane %v1902_v34, 7  ;;  %v1674_v34 = vld [vmem:[#allocation2 + $0x44] sm:$0x1] }
  0xc7   : > { %1791 = vrot.lane.b32.xlu0 %v1771_v18, %s3418_s7  ;;  %v1905_v19 = vshll.u32 %v3937_v5, 16  ;;  %3175 = vmatprep.subr.bf16.mxu1 %v4290_v4  ;;  %v4002_v40 = vcombine.low %v3987_v32, %v3987_v32  ;;  %v4005_v22 = vcombine.low %v2233_v44, %v3989_v8  ;;  %v950_v57 = vrot.slane %v949_v45, 4  ;;  %v4050_v54 = vld [vmem:[#allocation2 + $0x44] sm:$0x1]  ;;  %v2258_v0 = vld [vmem:[#allocation2 + $0x40] sm:$0xf] }
  0xc8   : > { %v963_v63 = vor.u32 %v962_v31, %v959_v60  ;;  %v4007_v30 = vpop.permute.xlu1 %670  ;;  %v3014_v26 = vcombine.low %v3916_v50, %v1672_v58  ;;  %v2516_v3 = vor.u32 %v2514_v41, %v2513_v39  ;;  %v954_v18 = vrot.slane %v952_v62, 5  ;;  %v725_v21 = vpop.permute.xlu0 %724  ;;  %v3371_v31 = vld [vmem:[#allocation2 + $0x2c] sm:$0x1] }
  0xc9   : > { %v4291_v5 = vcombine.low %v3829_v9, %v3617_v11  ;;  %v2965_v36 = vcombine.low %v1484_v47, %v1484_v47  ;;  %v1778_v37 = vor.u32 %v1776_v43, %v1775_v6  ;;  %v968_v1 = vrot.slane %v966_v51, 5 }
  0xca   : > { %v964_v7 = vrot.slane %v963_v63, 4  ;;  %v4292_v27 = vcombine.low %v3610_v52, %v3809_v48  ;;  %v2966_v15 = vcombine.high %v1484_v47, %v1484_v47  ;;  %2445 = vrot.lane.b32.xlu1 %v3068_v42, %s3416_s30  ;;  %v1907_v11 = vor.u32 %v1905_v19, %v1904_v29  ;;  %v2257_v42 = vld [vmem:[#allocation2 + $0x38] sm:$0xf] }
  0xcb   : > { %v1450_v55 = vsel %vm812_vm7, %v4291_v5, %v1278_v35  ;;  %2539 = vrot.lane.b32.xlu0 %v2509_v17, %s3417_s6  ;;  %v2366_v9 = vshrl.u32 %v4005_v22, 16  ;;  %v2369_v43 = vshll.u32 %v4005_v22, 16  ;;  %v1909_v14 = vshrl.u32 %v4002_v40, 16 }
  0xcc   : > { %v827_v50 = vsel %vm812_vm7, %v4292_v27, %v669_v38  ;;  %v1470_v52 = vsel %vm837_vm8, %v1450_v55, %v3835_v56  ;;  %v1430_v48 = vpop.permute.xlu1 %1429  ;;  %v955_v38 = vsel %vm3931_vm15, %v950_v57, %v954_v18  ;;  %v969_v49 = vsel %vm3931_vm15, %v964_v7, %v968_v1  ;;  %v805_v17 = vpop.permute.xlu0 %804  ;;  %v4041_v56 = vld [vmem:[#allocation2 + $0x28] sm:$0xe]  ;;  %v2247_v1 = vld [vmem:[#allocation2 + $0x38] sm:$0xe] }
  0xcd   : > { %v4037_v2 = vcombine.low %v2234_v23, %v4014_v59  ;;  %v2979_v33 = vrot.slane %v2965_v36, 9  ;;  %v847_v53 = vsel %vm837_vm8, %v827_v50, %v725_v21  ;;  %v1486_v24 = vsel %vm854_vm9, %v1470_v52, %v1430_v48 }
  0xce   : > { %v2925_v39 = vcombine.low %v955_v38, %v969_v49  ;;  %v1548_v45 = vrot.slane %v2966_v15, 5  ;;  %v2967_v12 = vcombine.low %v1486_v24, %v1486_v24  ;;  %v2968_v25 = vcombine.high %v1486_v24, %v1486_v24  ;;  %1793 = vrot.lane.b32.xlu1 %v1778_v37, %s3418_s7 }
  0xcf   : > { %v864_v35 = vsel %vm854_vm9, %v847_v53, %v805_v17  ;;  %1847 = vrot.lane.b32.xlu0 %v3014_v26, %s3416_s30  ;;  %v2368_v62 = vrot.slane %v2366_v9, 7  ;;  %v4048_v10 = vcombine.low %v2257_v42, %v4034_v13  ;;  %v2933_v51 = vcombine.low %v4041_v56, %v3371_v31 }
  0xd0   : > { %v2916_v41 = vcombine.low %v864_v35, %v864_v35  ;;  %v1052_v44 = vsel %vm1044_vm14, %v2925_v39, 0  ;;  %v2980_v6 = vrot.slane %v2967_v12, 9  ;;  %v1552_v58 = vrot.slane %v2968_v25, 5  ;;  %v727_v60 = vpop.permute.xlu1 %726  ;;  %v1280_v22 = vpop.permute.xlu0 %1279 }
  0xd1   : > { %3164 = vmatpush3.bf16.xpose.msra.mxu0 %v1052_v44  ;;  %v3015_v47 = vcombine.low %v3987_v32, %v1674_v34  ;;  %v1912_v57 = vshll.u32 %v4002_v40, 16  ;;  %v2373_v63 = vshrl.u32 %v4037_v2, 16  ;;  %v1549_v26 = vsel %vm3959_vm0, %v2979_v33, %v1548_v45  ;;  %v537_v33 = vld [vmem:[#allocation2 + $0x3c] sm:$0x1]  ;;  %v2249_v45 = vld [vmem:[#allocation2 + $0x40] sm:$0xe] }
  0xd2   : > { %v971_v29 = vshrl.u32 %v2916_v41, 16  ;;  %v974_v19 = vshll.u32 %v2916_v41, 16  ;;  %3165 = vmatprep.subr.bf16.mxu0 %v4290_v4  ;;  %2541 = vrot.lane.b32.xlu1 %v2516_v3, %s3417_s6  ;;  %v1553_v18 = vsel %vm3959_vm0, %v2980_v6, %v1552_v58  ;;  %v1911_v5 = vrot.slane %v1909_v14, 7  ;;  %v1113_v41 = vld [vmem:[#allocation2 + $0x30] sm:$0xe] }
  0xd3   : > { %v4063_v32 = vcombine.low %v2258_v0, %v4050_v54  ;;  %v830_v40 = vsel %vm812_vm7, %v2881_v20, %v4007_v30  ;;  %1927 = vrot.lane.b32.xlu0 %v1907_v11, %s3417_s6  ;;  %v2987_v55 = vcombine.low %v1549_v26, %v1553_v18  ;;  %v2371_v3 = vor.u32 %v2369_v43, %v2368_v62  ;;  %v3372_v44 = vld [vmem:[#allocation2 + $0x38] sm:$0xf] }
  0xd4   : > { %v2518_v36 = vshrl.u32 %v4048_v10, 16  ;;  %v973_v21 = vrot.slane %v971_v29, 4  ;;  %v976_v37 = vrot.slane %v974_v19, 5  ;;  %v849_v23 = vsel %vm837_vm8, %v830_v40, %v727_v60  ;;  %v807_v7 = vpop.permute.xlu1 %806  ;;  %v1336_v28 = vpop.permute.xlu0 %1335 }
  0xd5   : > { %v2376_v27 = vshll.u32 %v4037_v2, 16  ;;  %v2917_v50 = vcombine.high %v864_v35, %v864_v35  ;;  %v866_v15 = vsel %vm854_vm9, %v849_v23, %v807_v7  ;;  %v1591_v16 = vsel %vm1044_vm14, %v2987_v55, 0  ;;  %v539_v23 = vld [vmem:[#allocation2 + $0x44] sm:$0x1] }
  0xd6   : > { %v2375_v20 = vrot.slane %v2373_v63, 7  ;;  %v2918_v30 = vcombine.low %v866_v15, %v866_v15  ;;  %v2919_v11 = vcombine.high %v866_v15, %v866_v15  ;;  %1849 = vrot.lane.b32.xlu1 %v3015_v47, %s3416_s30  ;;  %3176 = vmatpush3.bf16.xpose.msra.mxu1 %v1591_v16  ;;  %v1914_v9 = vor.u32 %v1912_v57, %v1911_v5 }
  0xd7   : > { %2391 = vrot.lane.b32.xlu0 %v2371_v3, %s3418_s7  ;;  %v3069_v43 = vcombine.low %v2247_v1, %v4034_v13  ;;  %v2520_v14 = vrot.slane %v2518_v36, 7  ;;  %v2521_v52 = vshll.u32 %v4048_v10, 16  ;;  %3177 = vmatprep.subr.bf16.mxu1 %v4290_v4  ;;  %v977_v48 = vor.u32 %v976_v37, %v973_v21 }
  0xd8   : > { %v985_v38 = vshrl.u32 %v2918_v30, 16  ;;  %v988_v49 = vshll.u32 %v2918_v30, 16  ;;  %v1282_v42 = vpop.permute.xlu1 %1281  ;;  %v980_v2 = vshll.u32 %v2917_v50, 16  ;;  %v673_v53 = vpop.permute.xlu0 %672  ;;  %v2378_v24 = vor.u32 %v2376_v27, %v2375_v20 }
  0xd9   : > { %v2525_v17 = vshrl.u32 %v4063_v32, 16  ;;  %v1453_v56 = vsel %vm812_vm7, %v2933_v51, %v1280_v22  ;;  %v994_v13 = vshll.u32 %v2919_v11, 16  ;;  %v2523_v12 = vor.u32 %v2521_v52, %v2520_v14  ;;  %v3373_v22 = vld [vmem:[#allocation2 + $0x34] sm:$0x1]  ;;  %v1115_v11 = vld [vmem:[#allocation2 + $0x38] sm:$0xe] }
  0xda   : > { %v987_v39 = vrot.slane %v985_v38, 4  ;;  %v990_v34 = vrot.slane %v988_v49, 5  ;;  %1929 = vrot.lane.b32.xlu1 %v1914_v9, %s3417_s6  ;;  %v978_v25 = vrot.slane %v977_v48, 4  ;;  %v2882_v62 = vcombine.low %v3372_v44, %v537_v33  ;;  %v3374_v9 = vld [vmem:[#allocation2 + $0x40] sm:$0xf] }
  0xdb   : > { %2447 = vrot.lane.b32.xlu0 %v3069_v43, %s3416_s30  ;;  %v1472_v0 = vsel %vm837_vm8, %v1453_v56, %v1336_v28  ;;  %v3070_v58 = vcombine.low %v2249_v45, %v4050_v54  ;;  %v2527_v60 = vrot.slane %v2525_v17, 7  ;;  %v2528_v31 = vshll.u32 %v4063_v32, 16 }
  0xdc   : > { %v991_v35 = vor.u32 %v990_v34, %v987_v39  ;;  %v1338_v10 = vpop.permute.xlu1 %1337  ;;  %v1432_v6 = vpop.permute.xlu0 %1431  ;;  %v982_v51 = vrot.slane %v980_v2, 5  ;;  %v996_v29 = vrot.slane %v994_v13, 5  ;;  %v2934_v57 = vcombine.low %v1113_v41, %v3373_v22  ;;  %v3375_v2 = vld [vmem:[#allocation2 + $0x3c] sm:$0x1] }
  0xdd   : > { %v1488_v19 = vsel %vm854_vm9, %v1472_v0, %v1432_v6  ;;  %v833_v40 = vsel %vm812_vm7, %v2882_v62, %v673_v53  ;;  %v2530_v3 = vor.u32 %v2528_v31, %v2527_v60  ;;  %v2883_v43 = vcombine.low %v3374_v9, %v539_v23 }
  0xde   : > { %v992_v47 = vrot.slane %v991_v35, 4  ;;  %2393 = vrot.lane.b32.xlu1 %v2378_v24, %s3418_s7  ;;  %v983_v26 = vsel %vm3931_vm15, %v978_v25, %v982_v51  ;;  %v2969_v18 = vcombine.low %v1488_v19, %v1488_v19  ;;  %v2970_v55 = vcombine.high %v1488_v19, %v1488_v19  ;;  %v523_v24 = vld [vmem:[%s4272_s4] sm:$0x7] }
  0xdf   : > { %2543 = vrot.lane.b32.xlu0 %v2523_v12, %s3417_s6  ;;  %v1456_v36 = vsel %vm812_vm7, %v2934_v57, %v1282_v42  ;;  %v2935_v33 = vcombine.low %v1115_v11, %v3375_v2  ;;  %v1644_v57 = vld [vmem:[#allocation2 + $0x14] sm:$0x1] }
  0xe0   : > { %v675_v63 = vpop.permute.xlu1 %674  ;;  %v997_v54 = vsel %vm3931_vm15, %v992_v47, %v996_v29  ;;  %v729_v5 = vpop.permute.xlu0 %728  ;;  %v1474_v37 = vsel %vm837_vm8, %v1456_v36, %v1338_v10  ;;  %v2981_v1 = vrot.slane %v2969_v18, 9  ;;  %v1556_v28 = vrot.slane %v2970_v55, 5  ;;  %v1117_v47 = vld [vmem:[#allocation2 + $0x40] sm:$0xe]  ;;  %v3376_v18 = vld [vmem:[#allocation2 + $0x44] sm:$0x1] }
  0xe1   : > { %v2926_v32 = vcombine.low %v983_v26, %v997_v54  ;;  %v851_v27 = vsel %vm837_vm8, %v833_v40, %v729_v5  ;;  %v836_v39 = vsel %vm812_vm7, %v2883_v43, %v675_v63  ;;  %v2936_v5 = vcombine.low %v1117_v47, %v3376_v18  ;;  %v3377_v36 = vld [vmem:[#allocation2 + $0x10] sm:$0xf] }
  0xe2   : > { %2449 = vrot.lane.b32.xlu1 %v3070_v58, %s3416_s30  ;;  %v1557_v17 = vsel %vm3959_vm0, %v2981_v1, %v1556_v28 }
  0xe3   : > { %v1055_v21 = vsel %vm1044_vm14, %v2926_v32, 0  ;;  %1029 = vperm.xlu0 %3239, %v523_v24   ;;  %v1646_v24 = vld [vmem:[#allocation2 + $0x1c] sm:$0x1] }
  0xe4   : > { %v1434_v7 = vpop.permute.xlu1 %1433  ;;  %3166 = vmatpush3.bf16.xpose.msra.mxu0 %v1055_v21  ;;  %v809_v15 = vpop.permute.xlu0 %808  ;;  %v2992_v21 = vcombine.low %v3377_v36, %v1644_v57 }
  0xe5   : > { %v1490_v50 = vsel %vm854_vm9, %v1474_v37, %v1434_v7  ;;  %3167 = vmatprep.subr.bf16.mxu0 %v4290_v4  ;;  %v868_v30 = vsel %vm854_vm9, %v851_v27, %v809_v15 }
  0xe6   : > { %v2971_v16 = vcombine.low %v1490_v50, %v1490_v50  ;;  %v2972_v20 = vcombine.high %v1490_v50, %v1490_v50  ;;  %2545 = vrot.lane.b32.xlu1 %v2530_v3, %s3417_s6  ;;  %v2920_v14 = vcombine.low %v868_v30, %v868_v30  ;;  %v2921_v35 = vcombine.high %v868_v30, %v868_v30 }
  0xe8   : > { %v2982_v52 = vrot.slane %v2971_v16, 9  ;;  %v1560_v48 = vrot.slane %v2972_v20, 5  ;;  %v731_v38 = vpop.permute.xlu1 %730  ;;  %v999_v49 = vshrl.u32 %v2920_v14, 16  ;;  %v1002_v42 = vshll.u32 %v2920_v14, 16  ;;  %v1284_v53 = vpop.permute.xlu0 %1283 }
  0xe9   : > { %v853_v12 = vsel %vm837_vm8, %v836_v39, %v731_v38  ;;  %v1459_v41 = vsel %vm812_vm7, %v2935_v33, %v1284_v53  ;;  %v1008_v19 = vshll.u32 %v2921_v35, 16 }
  0xea   : > { %v1561_v56 = vsel %vm3959_vm0, %v2982_v52, %v1560_v48  ;;  %v1001_v13 = vrot.slane %v999_v49, 4  ;;  %v1004_v45 = vrot.slane %v1002_v42, 5 }
  0xeb   : > { %v2988_v34 = vcombine.low %v1557_v17, %v1561_v56  ;;  %v1010_v37 = vrot.slane %v1008_v19, 5 }
  0xec   : > { %v811_v25 = vpop.permute.xlu1 %810  ;;  %v1340_v62 = vpop.permute.xlu0 %1339  ;;  %v1005_v58 = vor.u32 %v1004_v45, %v1001_v13  ;;  %v3378_v45 = vld [vmem:[#allocation2 + $0x18] sm:$0xf] }
  0xed   : > { %v870_v44 = vsel %vm854_vm9, %v853_v12, %v811_v25  ;;  %v1594_v10 = vsel %vm1044_vm14, %v2988_v34, 0  ;;  %v1476_v51 = vsel %vm837_vm8, %v1459_v41, %v1340_v62  ;;  %v2993_v12 = vcombine.low %v3378_v45, %v1646_v24 }
  0xee   : > { %v2922_v0 = vcombine.low %v870_v44, %v870_v44  ;;  %v2923_v6 = vcombine.high %v870_v44, %v870_v44  ;;  %3178 = vmatpush3.bf16.xpose.msra.mxu1 %v1594_v10  ;;  %v1006_v40 = vrot.slane %v1005_v58, 4  ;;  %v1026_v44 = vld [vmem:[%s4271_s3] sm:$0x3] }
  0xef   : > { %3179 = vmatprep.subr.bf16.mxu1 %v4290_v4 }
  0xf0   : > { %v1013_v60 = vshrl.u32 %v2922_v0, 16  ;;  %v1016_v31 = vshll.u32 %v2922_v0, 16  ;;  %v1286_v29 = vpop.permute.xlu1 %1285  ;;  %v1436_v22 = vpop.permute.xlu0 %1435  ;;  %v1022_v54 = vshll.u32 %v2923_v6, 16  ;;  %v1011_v30 = vsel %vm3931_vm15, %v1006_v40, %v1010_v37 }
  0xf1   : > { %v1492_v32 = vsel %vm854_vm9, %v1476_v51, %v1436_v22  ;;  %v1462_v15 = vsel %vm812_vm7, %v2936_v5, %v1286_v29  ;;  %v2985_v5 = vld [vmem:[%s4271_s3 + $0x2] sm:$0x3] }
  0xf2   : > { %v1015_v63 = vrot.slane %v1013_v60, 4  ;;  %v1018_v26 = vrot.slane %v1016_v31, 5  ;;  %v1024_v1 = vrot.slane %v1022_v54, 5  ;;  %v2973_v27 = vcombine.low %v1492_v32, %v1492_v32  ;;  %v2211_v60 = vld [vmem:[#allocation2 + $0x10] sm:$0xe] }
  0xf3   : > { %v2974_v50 = vcombine.high %v1492_v32, %v1492_v32 }
  0xf4   : > { %v1019_v55 = vor.u32 %v1018_v26, %v1015_v63  ;;  %v1342_v3 = vpop.permute.xlu1 %1341  ;;  %v1780_v23 = vpop.permute.xlu0 %1779  ;;  %v2983_v52 = vrot.slane %v2973_v27, 9  ;;  %v3379_v63 = vld [vmem:[#allocation2 + $0x14] sm:$0x1]  ;;  %v1648_v27 = vld [vmem:[#allocation2 + $0x24] sm:$0x1] }
  0xf5   : > { %v1478_v28 = vsel %vm837_vm8, %v1462_v15, %v1342_v3  ;;  %v1933_v16 = vsel %vm812_vm7, %v2992_v21, %v1780_v23  ;;  %v1564_v48 = vrot.slane %v2974_v50, 5  ;;  %v3047_v26 = vcombine.low %v2211_v60, %v3379_v63  ;;  %v3382_v60 = vld [vmem:[#allocation2 + $0x28] sm:$0xf] }
  0xf6   : > { %v1020_v7 = vrot.slane %v1019_v55, 4 }
  0xf7   : > { %v1565_v34 = vsel %vm3959_vm0, %v2983_v52, %v1564_v48 }
  0xf8   : > { %v1438_v20 = vpop.permute.xlu1 %1437  ;;  %v1025_v11 = vsel %vm3931_vm15, %v1020_v7, %v1024_v1  ;;  %v1836_v43 = vpop.permute.xlu0 %1835 }
  0xf9   : > { %v1494_v9 = vsel %vm854_vm9, %v1478_v28, %v1438_v20  ;;  %v2927_v14 = vcombine.low %v1011_v30, %v1025_v11  ;;  %v1956_v42 = vsel %vm837_vm8, %v1933_v16, %v1836_v43  ;;  %v2213_v28 = vld [vmem:[#allocation2 + $0x18] sm:$0xe]  ;;  %v3380_v30 = vld [vmem:[#allocation2 + $0x20] sm:$0xf] }
  0xfa   : > { %v2975_v38 = vcombine.low %v1494_v9, %v1494_v9  ;;  %v2976_v49 = vcombine.high %v1494_v9, %v1494_v9  ;;  %v2994_v11 = vcombine.low %v3380_v30, %v1648_v27 }
  0xfb   : > { %v1058_v2 = vsel %vm1044_vm14, %v2927_v14, 0 }
  0xfc   : > { %v2984_v33 = vrot.slane %v2975_v38, 9  ;;  %v1568_v53 = vrot.slane %v2976_v49, 5  ;;  %v1782_v17 = vpop.permute.xlu1 %1781  ;;  %3168 = vmatpush3.bf16.xpose.msra.mxu0 %v1058_v2  ;;  %v1916_v56 = vpop.permute.xlu0 %1915  ;;  %v3381_v38 = vld [vmem:[#allocation2 + $0x1c] sm:$0x1] }
  0xfd   : > { %3185 = vmatprep.subr.bf16.mxu0 %v4290_v4  ;;  %v1972_v39 = vsel %vm854_vm9, %v1956_v42, %v1916_v56  ;;  %v1936_v58 = vsel %vm812_vm7, %v2993_v12, %v1782_v17  ;;  %v3048_v49 = vcombine.low %v2213_v28, %v3381_v38  ;;  %v1650_v12 = vld [vmem:[#allocation2 + $0x2c] sm:$0x1]  ;;  %v1652_v38 = vld [vmem:[#allocation2 + $0x34] sm:$0x1] }
  0xfe   : > { %v1569_v13 = vsel %vm3959_vm0, %v2984_v33, %v1568_v53  ;;  %v3024_v25 = vcombine.low %v1972_v39, %v1972_v39  ;;  %v3025_v19 = vcombine.high %v1972_v39, %v1972_v39 }
  0xff   : > { %v2989_v35 = vcombine.low %v1565_v34, %v1569_v13 }
 0x100   : > { %v1838_v41 = vpop.permute.xlu1 %1837  ;;  %v2028_v62 = vshrl.u32 %v3024_v25, 16  ;;  %v2031_v10 = vshll.u32 %v3024_v25, 16  ;;  %v2380_v0 = vpop.permute.xlu0 %2379  ;;  %v2037_v36 = vshll.u32 %v3025_v19, 16 }
 0x101   : > { %v1597_v6 = vsel %vm1044_vm14, %v2989_v35, 0  ;;  %v1958_v47 = vsel %vm837_vm8, %v1936_v58, %v1838_v41  ;;  %v2549_v37 = vsel %vm812_vm7, %v3047_v26, %v2380_v0 }
 0x102   : > { %3180 = vmatpush3.bf16.xpose.msra.mxu1 %v1597_v6  ;;  %v2030_v31 = vrot.slane %v2028_v62, 4  ;;  %v2033_v51 = vrot.slane %v2031_v10, 5  ;;  %v2039_v43 = vrot.slane %v2037_v36, 5 }
 0x103   : > { %3170 = vmatmul.mubr.msk.bf16.vlgmr.msra.gmra.mrb[0].mxu0 %vm1044_vm14, %v1026_v44  ;;  %3197 = vmatprep.subr.bf16.mxu1 %v4290_v4 }
 0x104   : > { %v1918_v29 = vpop.permute.xlu1 %1917  ;;  %3193 = vmatprep.mubr.msk.bf16.mxu0 %vm3420_vm6, %v4290_v4  ;;  %v2436_v57 = vpop.permute.xlu0 %2435  ;;  %v2034_v32 = vor.u32 %v2033_v51, %v2030_v31  ;;  %v2995_v31 = vcombine.low %v3382_v60, %v1650_v12  ;;  %v3385_v12 = vld [vmem:[#allocation2 + $0x2c] sm:$0x1] }
 0x105   : > { %v1974_v22 = vsel %vm854_vm9, %v1958_v47, %v1918_v29  ;;  %v2572_v20 = vsel %vm837_vm8, %v2549_v37, %v2436_v57 }
 0x106   : > { %v3026_v54 = vcombine.low %v1974_v22, %v1974_v22  ;;  %v3027_v18 = vcombine.high %v1974_v22, %v1974_v22  ;;  %v2035_v50 = vrot.slane %v2034_v32, 4 }
 0x108   : > { %v2042_v40 = vshrl.u32 %v3026_v54, 16  ;;  %v2045_v55 = vshll.u32 %v3026_v54, 16  ;;  %v2382_v3 = vpop.permute.xlu1 %2381  ;;  %v1784_v21 = vpop.permute.xlu0 %1783  ;;  %v2051_v1 = vshll.u32 %v3027_v18, 16  ;;  %v2040_v2 = vsel %vm3931_vm15, %v2035_v50, %v2039_v43 }
 0x109   : > { %3182 = vmatmul.mubr.msk.bf16.vlgmr.msra.gmra.mrb[0].mxu1 %vm1044_vm14, %v2985_v5  ;;  %v1939_v56 = vsel %vm812_vm7, %v2994_v11, %v1784_v21  ;;  %v2552_v34 = vsel %vm812_vm7, %v3048_v49, %v2382_v3  ;;  %v2215_v5 = vld [vmem:[#allocation2 + $0x20] sm:$0xe] }
 0x10a   : > { %v2044_v23 = vrot.slane %v2042_v40, 4  ;;  %v2047_v7 = vrot.slane %v2045_v55, 5  ;;  %3205 = vmatprep.mubr.msk.bf16.mxu1 %vm3420_vm6, %v4290_v4  ;;  %v2053_v52 = vrot.slane %v2051_v1, 5  ;;  %v3383_v1 = vld [vmem:[#allocation2 + $0x24] sm:$0x1] }
 0x10b   : > { %v3049_v27 = vcombine.low %v2215_v5, %v3383_v1 }
 0x10c   : > { %v2048_v15 = vor.u32 %v2047_v7, %v2044_v23  ;;  %v2438_v16 = vpop.permute.xlu1 %2437  ;;  %v2532_v9 = vpop.permute.xlu0 %2531 }
 0x10d   : > { %v2588_v48 = vsel %vm854_vm9, %v2572_v20, %v2532_v9  ;;  %v2574_v45 = vsel %vm837_vm8, %v2552_v34, %v2438_v16 }
 0x10e   : > { %v2049_v14 = vrot.slane %v2048_v15, 4  ;;  %v3079_v53 = vcombine.low %v2588_v48, %v2588_v48  ;;  %v3080_v39 = vcombine.high %v2588_v48, %v2588_v48 }
 0x110   : > { %v1786_v42 = vpop.permute.xlu1 %1785  ;;  %v2054_v33 = vsel %vm3931_vm15, %v2049_v14, %v2053_v52  ;;  %v1840_v24 = vpop.permute.xlu0 %1839  ;;  %v3095_v35 = vrot.slane %v3079_v53, 9  ;;  %v2645_v10 = vrot.slane %v3080_v39, 5 }
 0x111   : > { %v3041_v17 = vcombine.low %v2040_v2, %v2054_v33  ;;  %v1960_v41 = vsel %vm837_vm8, %v1939_v56, %v1840_v24  ;;  %v1942_v18 = vsel %vm812_vm7, %v2995_v31, %v1786_v42  ;;  %v2217_v2 = vld [vmem:[#allocation2 + $0x28] sm:$0xe]  ;;  %v3384_v24 = vld [vmem:[#allocation2 + $0x30] sm:$0xf] }
 0x112   : > { %v2646_v26 = vsel %vm3959_vm0, %v3095_v35, %v2645_v10 }
 0x113   : > { %v2157_v13 = vsel %vm1044_vm14, %v3041_v17, 0  ;;  %v2996_v17 = vcombine.low %v3384_v24, %v1652_v38 }
 0x114   : > { %v2534_v25 = vpop.permute.xlu1 %2533  ;;  %3186 = vmatpush3.bf16.xpose.msra.mxu0 %v2157_v13  ;;  %v1920_v62 = vpop.permute.xlu0 %1919 }
 0x115   : > { %v2590_v44 = vsel %vm854_vm9, %v2574_v45, %v2534_v25  ;;  %3187 = vmatprep.subr.bf16.mxu0 %v4290_v4  ;;  %v1976_v58 = vsel %vm854_vm9, %v1960_v41, %v1920_v62  ;;  %v3050_v25 = vcombine.low %v2217_v2, %v3385_v12  ;;  %v1656_v12 = vld [vmem:[#allocation2 + $0x44] sm:$0x1] }
 0x116   : > { %v3081_v0 = vcombine.low %v2590_v44, %v2590_v44  ;;  %v3082_v6 = vcombine.high %v2590_v44, %v2590_v44  ;;  %v3028_v51 = vcombine.low %v1976_v58, %v1976_v58  ;;  %v3029_v21 = vcombine.high %v1976_v58, %v1976_v58 }
 0x118   : > { %v3096_v47 = vrot.slane %v3081_v0, 9  ;;  %v2649_v29 = vrot.slane %v3082_v6, 5  ;;  %v1842_v19 = vpop.permute.xlu1 %1841  ;;  %v2056_v22 = vshrl.u32 %v3028_v51, 16  ;;  %v2059_v57 = vshll.u32 %v3028_v51, 16  ;;  %v2384_v63 = vpop.permute.xlu0 %2383 }
 0x119   : > { %v1962_v3 = vsel %vm837_vm8, %v1942_v18, %v1842_v19  ;;  %v2065_v11 = vshll.u32 %v3029_v21, 16  ;;  %v2555_v43 = vsel %vm812_vm7, %v3049_v27, %v2384_v63 }
 0x11a   : > { %v2650_v54 = vsel %vm3959_vm0, %v3096_v47, %v2649_v29  ;;  %v2058_v40 = vrot.slane %v2056_v22, 4  ;;  %v2061_v55 = vrot.slane %v2059_v57, 5  ;;  %v1654_v47 = vld [vmem:[#allocation2 + $0x3c] sm:$0x1] }
 0x11b   : > { %v3104_v32 = vcombine.low %v2646_v26, %v2650_v54  ;;  %v2067_v39 = vrot.slane %v2065_v11, 5 }
 0x11c   : > { %v1922_v36 = vpop.permute.xlu1 %1921  ;;  %v2440_v23 = vpop.permute.xlu0 %2439  ;;  %v2062_v28 = vor.u32 %v2061_v55, %v2058_v40 }
 0x11d   : > { %v1978_v37 = vsel %vm854_vm9, %v1962_v3, %v1922_v36  ;;  %v2693_v7 = vsel %vm1044_vm14, %v3104_v32, 0  ;;  %v2576_v53 = vsel %vm837_vm8, %v2555_v43, %v2440_v23  ;;  %v3386_v32 = vld [vmem:[#allocation2 + $0x38] sm:$0xf] }
 0x11e   : > { %v3030_v50 = vcombine.low %v1978_v37, %v1978_v37  ;;  %v3031_v15 = vcombine.high %v1978_v37, %v1978_v37  ;;  %3198 = vmatpush3.bf16.xpose.msra.mxu1 %v2693_v7  ;;  %v2063_v49 = vrot.slane %v2062_v28, 4  ;;  %v2997_v40 = vcombine.low %v3386_v32, %v1654_v47  ;;  %v3389_v47 = vld [vmem:[#allocation2 + $0x3c] sm:$0x1] }
 0x11f   : > { %3199 = vmatprep.subr.bf16.mxu1 %v4290_v4 }
 0x120   : > { %v2070_v16 = vshrl.u32 %v3030_v50, 16  ;;  %v2073_v20 = vshll.u32 %v3030_v50, 16  ;;  %v2386_v30 = vpop.permute.xlu1 %2385  ;;  %v1788_v9 = vpop.permute.xlu0 %1787  ;;  %v2079_v48 = vshll.u32 %v3031_v15, 16  ;;  %v2068_v41 = vsel %vm3931_vm15, %v2063_v49, %v2067_v39  ;;  %v2219_v15 = vld [vmem:[#allocation2 + $0x30] sm:$0xe] }
 0x121   : > { %v1945_v6 = vsel %vm812_vm7, %v2996_v17, %v1788_v9  ;;  %v2558_v60 = vsel %vm812_vm7, %v3050_v25, %v2386_v30 }
 0x122   : > { %v2072_v14 = vrot.slane %v2070_v16, 4  ;;  %v2075_v52 = vrot.slane %v2073_v20, 5  ;;  %v2081_v13 = vrot.slane %v2079_v48, 5  ;;  %v3387_v48 = vld [vmem:[#allocation2 + $0x34] sm:$0x1] }
 0x123   : > { %v3051_v38 = vcombine.low %v2219_v15, %v3387_v48 }
 0x124   : > { %v2076_v42 = vor.u32 %v2075_v52, %v2072_v14  ;;  %v2442_v33 = vpop.permute.xlu1 %2441  ;;  %v2536_v56 = vpop.permute.xlu0 %2535 }
 0x125   : > { %v2592_v45 = vsel %vm854_vm9, %v2576_v53, %v2536_v56  ;;  %v2578_v51 = vsel %vm837_vm8, %v2558_v60, %v2442_v33 }
 0x126   : > { %v2077_v34 = vrot.slane %v2076_v42, 4  ;;  %v3083_v62 = vcombine.low %v2592_v45, %v2592_v45  ;;  %v3084_v58 = vcombine.high %v2592_v45, %v2592_v45 }
 0x128   : > { %v1790_v35 = vpop.permute.xlu1 %1789  ;;  %v2082_v44 = vsel %vm3931_vm15, %v2077_v34, %v2081_v13  ;;  %v1844_v10 = vpop.permute.xlu0 %1843  ;;  %v3097_v19 = vrot.slane %v3083_v62, 9  ;;  %v2653_v26 = vrot.slane %v3084_v58, 5 }
 0x129   : > { %v3042_v0 = vcombine.low %v2068_v41, %v2082_v44  ;;  %v1964_v22 = vsel %vm837_vm8, %v1945_v6, %v1844_v10  ;;  %v1948_v50 = vsel %vm812_vm7, %v2997_v40, %v1790_v35  ;;  %v2221_v41 = vld [vmem:[#allocation2 + $0x38] sm:$0xe]  ;;  %v3388_v10 = vld [vmem:[#allocation2 + $0x40] sm:$0xf] }
 0x12a   : > { %v2654_v1 = vsel %vm3959_vm0, %v3097_v19, %v2653_v26 }
 0x12b   : > { %v2160_v31 = vsel %vm1044_vm14, %v3042_v0, 0  ;;  %v2998_v0 = vcombine.low %v3388_v10, %v1656_v12  ;;  %v2225_v10 = vld [vmem:[#allocation2 + $0x48] sm:$0xe] }
 0x12c   : > { %v2538_v29 = vpop.permute.xlu1 %2537  ;;  %3188 = vmatpush3.bf16.xpose.msra.mxu0 %v2160_v31  ;;  %v1924_v63 = vpop.permute.xlu0 %1923 }
 0x12d   : > { %v2594_v57 = vsel %vm854_vm9, %v2578_v51, %v2538_v29  ;;  %3189 = vmatprep.subr.bf16.mxu0 %v4290_v4  ;;  %v1980_v5 = vsel %vm854_vm9, %v1964_v22, %v1924_v63  ;;  %v3052_v29 = vcombine.low %v2221_v41, %v3389_v47  ;;  %v3054_v47 = vcombine.low %v2225_v10, %v4014_v59 }
 0x12e   : > { %v3085_v54 = vcombine.low %v2594_v57, %v2594_v57  ;;  %v3086_v18 = vcombine.high %v2594_v57, %v2594_v57  ;;  %v3032_v55 = vcombine.low %v1980_v5, %v1980_v5  ;;  %v3033_v9 = vcombine.high %v1980_v5, %v1980_v5 }
 0x130   : > { %v3098_v3 = vrot.slane %v3085_v54, 9  ;;  %v2657_v36 = vrot.slane %v3086_v18, 5  ;;  %v1846_v21 = vpop.permute.xlu1 %1845  ;;  %v2084_v37 = vshrl.u32 %v3032_v55, 16  ;;  %v2087_v23 = vshll.u32 %v3032_v55, 16  ;;  %v2388_v7 = vpop.permute.xlu0 %2387 }
 0x131   : > { %v1966_v30 = vsel %vm837_vm8, %v1948_v50, %v1846_v21  ;;  %v2093_v17 = vshll.u32 %v3033_v9, 16  ;;  %v2561_v39 = vsel %vm812_vm7, %v3051_v38, %v2388_v7 }
 0x132   : > { %v2658_v27 = vsel %vm3959_vm0, %v3098_v3, %v2657_v36  ;;  %v2086_v16 = vrot.slane %v2084_v37, 4  ;;  %v2089_v20 = vrot.slane %v2087_v23, 5  ;;  %v1658_v3 = vld [vmem:[#allocation2 + $0x4c] sm:$0x1] }
 0x133   : > { %v3105_v28 = vcombine.low %v2654_v1, %v2658_v27  ;;  %v2095_v58 = vrot.slane %v2093_v17, 5 }
 0x134   : > { %v1926_v11 = vpop.permute.xlu1 %1925  ;;  %v2090_v2 = vor.u32 %v2089_v20, %v2086_v16  ;;  %v3390_v16 = vld [vmem:[#allocation2 + $0x48] sm:$0xf] }
 0x135   : > { %v1982_v43 = vsel %vm854_vm9, %v1966_v30, %v1926_v11  ;;  %v2444_v14 = vpop.permute.xlu0 %2443  ;;  %v2696_v52 = vsel %vm1044_vm14, %v3105_v28, 0  ;;  %v2223_v28 = vld [vmem:[#allocation2 + $0x40] sm:$0xe]  ;;  %v2999_v20 = vcombine.low %v3390_v16, %v1658_v3  ;;  %v3040_v16 = vld [vmem:[%s4271_s3 + $0x4] sm:$0x3] }
 0x136   : > { %v3034_v49 = vcombine.low %v1982_v43, %v1982_v43  ;;  %v3035_v42 = vcombine.high %v1982_v43, %v1982_v43  ;;  %3200 = vmatpush3.bf16.xpose.msra.mxu1 %v2696_v52  ;;  %v2091_v25 = vrot.slane %v2090_v2, 4  ;;  %v2580_v62 = vsel %vm837_vm8, %v2561_v39, %v2444_v14 }
 0x137   : > { %3201 = vmatprep.subr.bf16.mxu1 %v4290_v4  ;;  %v3053_v48 = vcombine.low %v2223_v28, %v3989_v8 }
 0x138   : > { %v2098_v33 = vshrl.u32 %v3034_v49, 16  ;;  %v2101_v53 = vshll.u32 %v3034_v49, 16  ;;  %v2390_v24 = vpop.permute.xlu1 %2389  ;;  %v2107_v45 = vshll.u32 %v3035_v42, 16  ;;  %v2096_v22 = vsel %vm3931_vm15, %v2091_v25, %v2095_v58 }
 0x139   : > { %v1792_v56 = vpop.permute.xlu0 %1791  ;;  %v2564_v32 = vsel %vm812_vm7, %v3052_v29, %v2390_v24 }
 0x13a   : > { %v2100_v34 = vrot.slane %v2098_v33, 4  ;;  %v2103_v13 = vrot.slane %v2101_v53, 5  ;;  %v2109_v31 = vrot.slane %v2107_v45, 5  ;;  %v1951_v18 = vsel %vm812_vm7, %v2998_v0, %v1792_v56 }
 0x13c   : > { %v2104_v35 = vor.u32 %v2103_v13, %v2100_v34  ;;  %v2446_v44 = vpop.permute.xlu1 %2445 }
 0x13d   : > { %v2540_v6 = vpop.permute.xlu0 %2539  ;;  %v2582_v55 = vsel %vm837_vm8, %v2564_v32, %v2446_v44 }
 0x13e   : > { %v2105_v60 = vrot.slane %v2104_v35, 4  ;;  %v2596_v51 = vsel %vm854_vm9, %v2580_v62, %v2540_v6 }
 0x13f   : > { %v3087_v63 = vcombine.low %v2596_v51, %v2596_v51  ;;  %v3088_v5 = vcombine.high %v2596_v51, %v2596_v51 }
 0x140   : > { %v1794_v19 = vpop.permute.xlu1 %1793  ;;  %v2110_v57 = vsel %vm3931_vm15, %v2105_v60, %v2109_v31 }
 0x141   : > { %v1848_v26 = vpop.permute.xlu0 %1847  ;;  %v3043_v54 = vcombine.low %v2096_v22, %v2110_v57  ;;  %v3099_v21 = vrot.slane %v3087_v63, 9  ;;  %v2661_v1 = vrot.slane %v3088_v5, 5  ;;  %v1954_v2 = vsel %vm812_vm7, %v2999_v20, %v1794_v19 }
 0x142   : > { %v1968_v37 = vsel %vm837_vm8, %v1951_v18, %v1848_v26 }
 0x143   : > { %v2163_v40 = vsel %vm1044_vm14, %v3043_v54, 0  ;;  %v2662_v49 = vsel %vm3959_vm0, %v3099_v21, %v2661_v1 }
 0x144   : > { %v2542_v36 = vpop.permute.xlu1 %2541  ;;  %3190 = vmatpush3.bf16.xpose.msra.mxu0 %v2163_v40 }
 0x145   : > { %v2598_v23 = vsel %vm854_vm9, %v2582_v55, %v2542_v36  ;;  %v1928_v7 = vpop.permute.xlu0 %1927  ;;  %3191 = vmatprep.subr.bf16.mxu0 %v4290_v4 }
 0x146   : > { %v3089_v27 = vcombine.low %v2598_v23, %v2598_v23  ;;  %v3090_v50 = vcombine.high %v2598_v23, %v2598_v23  ;;  %v1984_v15 = vsel %vm854_vm9, %v1968_v37, %v1928_v7 }
 0x147   : > { %v3036_v30 = vcombine.low %v1984_v15, %v1984_v15  ;;  %v3037_v39 = vcombine.high %v1984_v15, %v1984_v15 }
 0x148   : > { %v3100_v11 = vrot.slane %v3089_v27, 9  ;;  %v2665_v9 = vrot.slane %v3090_v50, 5  ;;  %v1850_v43 = vpop.permute.xlu1 %1849 }
 0x149   : > { %v2112_v14 = vshrl.u32 %v3036_v30, 16  ;;  %v2115_v52 = vshll.u32 %v3036_v30, 16  ;;  %v2392_v38 = vpop.permute.xlu0 %2391  ;;  %v1970_v17 = vsel %vm837_vm8, %v1954_v2, %v1850_v43  ;;  %v2121_v6 = vshll.u32 %v3037_v39, 16  ;;  %v3103_v30 = vld [vmem:[%s4271_s3 + $0x6] sm:$0x3] }
 0x14a   : > { %v2666_v42 = vsel %vm3959_vm0, %v3100_v11, %v2665_v9  ;;  %v2567_v34 = vsel %vm812_vm7, %v3053_v48, %v2392_v38 }
 0x14b   : > { %v3106_v33 = vcombine.low %v2662_v49, %v2666_v42  ;;  %v2114_v53 = vrot.slane %v2112_v14, 4  ;;  %v2117_v24 = vrot.slane %v2115_v52, 5 }
 0x14c   : > { %v1930_v56 = vpop.permute.xlu1 %1929 }
 0x14d   : > { %v1986_v8 = vsel %vm854_vm9, %v1970_v17, %v1930_v56  ;;  %v2699_v13 = vsel %vm1044_vm14, %v3106_v33, 0  ;;  %v2448_v45 = vpop.permute.xlu0 %2447  ;;  %v2118_v35 = vor.u32 %v2117_v24, %v2114_v53 }
 0x14e   : > { %v3038_v12 = vcombine.low %v1986_v8, %v1986_v8  ;;  %v3039_v25 = vcombine.high %v1986_v8, %v1986_v8  ;;  %3202 = vmatpush3.bf16.xpose.msra.mxu1 %v2699_v13  ;;  %v2584_v62 = vsel %vm837_vm8, %v2567_v34, %v2448_v45 }
 0x14f   : > { %3203 = vmatprep.subr.bf16.mxu1 %v4290_v4  ;;  %v2119_v19 = vrot.slane %v2118_v35, 4  ;;  %v2123_v4 = vrot.slane %v2121_v6, 5 }
 0x150   : > { %v2126_v41 = vshrl.u32 %v3038_v12, 16  ;;  %v2129_v44 = vshll.u32 %v3038_v12, 16  ;;  %v2394_v0 = vpop.permute.xlu1 %2393  ;;  %v2135_v51 = vshll.u32 %v3039_v25, 16 }
 0x151   : > { %v2544_v58 = vpop.permute.xlu0 %2543  ;;  %v2570_v5 = vsel %vm812_vm7, %v3054_v47, %v2394_v0  ;;  %v2124_v55 = vsel %vm3931_vm15, %v2119_v19, %v2123_v4 }
 0x152   : > { %v2128_v60 = vrot.slane %v2126_v41, 4  ;;  %v2131_v31 = vrot.slane %v2129_v44, 5  ;;  %v2600_v29 = vsel %vm854_vm9, %v2584_v62, %v2544_v58  ;;  %v2137_v26 = vrot.slane %v2135_v51, 5 }
 0x153   : > { %v3091_v54 = vcombine.low %v2600_v29, %v2600_v29  ;;  %v3092_v18 = vcombine.high %v2600_v29, %v2600_v29 }
 0x154   : > { %v2132_v22 = vor.u32 %v2131_v31, %v2128_v60  ;;  %v2450_v57 = vpop.permute.xlu1 %2449 }
 0x155   : > { %v2586_v32 = vsel %vm837_vm8, %v2570_v5, %v2450_v57  ;;  %v3101_v21 = vrot.slane %v3091_v54, 9  ;;  %v2669_v37 = vrot.slane %v3092_v18, 5 }
 0x156   : > { %v2133_v63 = vrot.slane %v2132_v22, 4 }
 0x157   : > { %v2670_v15 = vsel %vm3959_vm0, %v3101_v21, %v2669_v37 }
 0x158   : > { %v2546_v40 = vpop.permute.xlu1 %2545  ;;  %v2138_v59 = vsel %vm3931_vm15, %v2133_v63, %v2137_v26 }
 0x159   : > { %v2602_v3 = vsel %vm854_vm9, %v2586_v32, %v2546_v40  ;;  %v3044_v36 = vcombine.low %v2124_v55, %v2138_v59 }
 0x15a   : > { %v3093_v23 = vcombine.low %v2602_v3, %v2602_v3  ;;  %v3094_v7 = vcombine.high %v2602_v3, %v2602_v3 }
 0x15b   : > { %v2166_v1 = vsel %vm1044_vm14, %v3044_v36, 0 }
 0x15c   : > { %v3102_v27 = vrot.slane %v3093_v23, 9  ;;  %v2673_v50 = vrot.slane %v3094_v7, 5  ;;  %3192 = vmatpush3.bf16.xpose.msra.mxu0 %v2166_v1 }
 0x15e   : > { %v2674_v28 = vsel %vm3959_vm0, %v3102_v27, %v2673_v50 }
 0x15f   : > { %v3107_v46 = vcombine.low %v2670_v15, %v2674_v28 }
 0x161   : > { %v2702_v20 = vsel %vm1044_vm14, %v3107_v46, 0 }
 0x162   : > { %3204 = vmatpush3.bf16.xpose.msra.mxu1 %v2702_v20  ;;  %v1030_v11 = vpop.permute.xlu0 %1029 }
 0x163   : > { %3194 = vmatmul.mubr.msk.bf16.vlgmr.msra.gmra.mrb[4].mxu0 %vm1044_vm14, %v3040_v16 }
 0x169   : > { %3206 = vmatmul.mubr.msk.bf16.vlgmr.msra.gmra.mrb[4].mxu1 %vm1044_vm14, %v3103_v30 }
 0x1d6   : > { %v1094_v61 = vpop.f32.mrb[0].mxu0 }
 0x1d7   : > { %v3171_v9 = vpop.f32.mrb[1].mxu0  ;;  %v1095_v43 = vadd.f32 %v1094_v61, %v1030_v11 }
 0x1d8   : > { %v1097_v14 = vpop.f32.mrb[2].mxu0 }
 0x1d9   : > { %3363 = vtanh.f32 %v1095_v43  ;;  %v3172_v52 = vpop.f32.mrb[3].mxu0 }
 0x1dc   : > { %v1633_v48 = vpop.f32.mrb[0].mxu1 }
 0x1dd   : > { %v3183_v38 = vpop.f32.mrb[1].mxu1  ;;  %v1634_v49 = vadd.f32 %v1633_v48, %v1030_v11 }
 0x1de   : > { %v1636_v42 = vpop.f32.mrb[2].mxu1 }
 0x1df   : > { %v3184_v2 = vpop.f32.mrb[3].mxu1  ;;  %3365 = vtanh.f32 %v1634_v49 }
 0x1e3   : > { %v3364_v33 = vpop.eup %3363 }
 0x1e4   : > { %1102 = vst.msk [vmem:[%s278_s25] sm:$0x7] %vm1101_vm1, %v3364_v33 }
 0x1e9   : > { %v3366_v53 = vpop.eup %3365 }
 0x1ea   : > { %2991 = vst.msk [vmem:[%s278_s25 + $0x4] sm:$0x7] %vm1101_vm1, %v3366_v53 }
 0x236   : > { %v2202_v24 = vpop.f32.mrb[4].mxu0 }
 0x237   : > { %v2203_v17 = vadd.f32 %v2202_v24, %v1030_v11  ;;  %v3195_v56 = vpop.f32.mrb[5].mxu0 }
 0x238   : > { %v2205_v39 = vpop.f32.mrb[6].mxu0 }
 0x239   : > { %3367 = vtanh.f32 %v2203_v17  ;;  %v3196_v34 = vpop.f32.mrb[7].mxu0 }
 0x23c   : > { %v2738_v8 = vpop.f32.mrb[4].mxu1 }
 0x23d   : > { %v2739_v13 = vadd.f32 %v2738_v8, %v1030_v11  ;;  %v3207_v45 = vpop.f32.mrb[5].mxu1 }
 0x23e   : > { %v2741_v12 = vpop.f32.mrb[6].mxu1 }
 0x23f   : > { %3369 = vtanh.f32 %v2739_v13  ;;  %v3208_v25 = vpop.f32.mrb[7].mxu1 }
 0x243   : > { %v3368_v35 = vpop.eup %3367 }
 0x244   : > { %3046 = vst.msk [vmem:[%s278_s25 + $0x8] sm:$0x7] %vm1101_vm1, %v3368_v35 }
 0x249   : > { %v3370_v41 = vpop.eup %3369 }
 0x24a   : > { %3109 = vst.msk [vmem:[%s278_s25 + $0xc] sm:$0x7] %vm1101_vm1, %v3370_v41 }
 0x24b PF: > { %s15_s20 = sadd.s32 1, %s3413_s20   ;;  %s4293_s18 = smov %s3409_s19 }
 0x24c   : > { %p12_p5 = scmp.ge.s32.totalorder %s15_s20, 4   ;;  %s4294_s19 = smov %s4296_s21 }
 0x24e   :  { %14 = sbr.rel (!%p12_p5) target bundleno = 2 (0x2), region = 84 }

</bundles_post_ra>
